<compile_context>
chip_gen: v7x
topology: tpu7x:2x2x1
jax: 0.10.0
libtpu: 0.0.40
codegen_flags: <defaults>
</compile_context>

<pallas_src>
import jax
import jax.numpy as jnp
from jax.experimental import pallas as pl
from jax.experimental.pallas import tpu as pltpu

LANES = 128
CONV_COUT = (12, 24, 48)   # real output channels of conv1/2/3 (padded to 128)


# ----------------------------- Pallas kernels ------------------------------

def _conv_stage_kernel(p_ref, w_ref, b_ref, o_ref):
    """Fused conv(im2col matmul) + folded-BN bias + ReLU + 2x2 maxpool.

    p_ref : (4, TQ, K)  im2col patches; leading dim = the 4 positions of each
                        2x2 pooling window, rows ordered (n, ph, pw).
    w_ref : (K, 128)    conv weights with BN scale folded in, zero-padded lanes.
    b_ref : (1, 128)    conv bias with BN shift folded in, zero-padded lanes.
    o_ref : (TQ, 128)   pooled activation (lane-dense; padded lanes stay 0).
    """
    w = w_ref[...]
    d0 = jnp.dot(p_ref[0], w, preferred_element_type=jnp.float32)
    d1 = jnp.dot(p_ref[1], w, preferred_element_type=jnp.float32)
    d2 = jnp.dot(p_ref[2], w, preferred_element_type=jnp.float32)
    d3 = jnp.dot(p_ref[3], w, preferred_element_type=jnp.float32)
    # bias is per-channel and ReLU is monotone, so maxpool commutes with both.
    m = jnp.maximum(jnp.maximum(d0, d1), jnp.maximum(d2, d3))
    o_ref[...] = jnp.maximum(m + b_ref[...], 0.0)


def _tail_kernel(p_ref, w3_ref, b3_ref, w1_ref, b1_ref, w2_ref, b2_ref, o_ref):
    """Fused conv3 stage + flatten + fc1 + ReLU + dropout(identity) + fc2.

    p_ref  : (4, 4*N, K)  conv3 im2col patches, rows ordered (pool-cell j, n).
    w3_ref : (K, 128)     conv3 weights (BN folded, lane-padded).
    b3_ref : (1, 128)     conv3 bias (BN folded, lane-padded).
    w1_ref : (4, 128, 512) fc1 weights split per pool-cell position j (=h*2+w),
                          rows in padded-channel order so flatten == 4 matmuls.
    b1_ref : (1, 512)
    w2_ref : (512, 128)   fc2 weights, lane-padded outputs.
    b2_ref : (1, 128)
    o_ref  : (N, 128)     logits (first 100 lanes are real).
    """
    n = o_ref.shape[0]
    w3 = w3_ref[...]
    d0 = jnp.dot(p_ref[0], w3, preferred_element_type=jnp.float32)
    d1 = jnp.dot(p_ref[1], w3, preferred_element_type=jnp.float32)
    d2 = jnp.dot(p_ref[2], w3, preferred_element_type=jnp.float32)
    d3 = jnp.dot(p_ref[3], w3, preferred_element_type=jnp.float32)
    pooled = jnp.maximum(jnp.maximum(d0, d1), jnp.maximum(d2, d3))
    pooled = jnp.maximum(pooled + b3_ref[...], 0.0)       # (4N, 128), rows (j, n)
    # PyTorch's (c, h, w) flatten + fc1 == sum over the 4 spatial positions of
    # per-position matmuls; padded channels are zero in both operands.
    h = jnp.dot(pooled[0 * n:1 * n], w1_ref[0], preferred_element_type=jnp.float32)
    h = h + jnp.dot(pooled[1 * n:2 * n], w1_ref[1], preferred_element_type=jnp.float32)
    h = h + jnp.dot(pooled[2 * n:3 * n], w1_ref[2], preferred_element_type=jnp.float32)
    h = h + jnp.dot(pooled[3 * n:4 * n], w1_ref[3], preferred_element_type=jnp.float32)
    h = jnp.maximum(h + b1_ref[...], 0.0)
    # TODO(synk): train-mode stochastic dropout (p=0.01) not implemented; eval == identity.
    o_ref[...] = (jnp.dot(h, w2_ref[...], preferred_element_type=jnp.float32)
                  + b2_ref[...])


# ----------------------------- kernel wrappers ------------------------------

def _pick_row_tile(q, max_tile=1024):
    """Largest multiple-of-8 divisor of q that is <= max_tile (else q itself)."""
    if q <= max_tile:
        return q
    for t in range(max_tile - max_tile % 8, 7, -8):
        if q % t == 0:
            return t
    return q


def conv_stage(patches, w_eff, b_eff):
    """patches (4, Q, K) -> pooled activation (Q, 128)."""
    _, q, k = patches.shape
    tq = _pick_row_tile(q)
    return pl.pallas_call(
        _conv_stage_kernel,
        out_shape=jax.ShapeDtypeStruct((q, LANES), jnp.float32),
        grid=(q // tq,),
        in_specs=[
            pl.BlockSpec((4, tq, k), lambda i: (0, i, 0)),
            pl.BlockSpec((k, LANES), lambda i: (0, 0)),
            pl.BlockSpec((1, LANES), lambda i: (0, 0)),
        ],
        out_specs=pl.BlockSpec((tq, LANES), lambda i: (i, 0)),
        compiler_params=pltpu.CompilerParams(dimension_semantics=("parallel",)),
    )(patches, w_eff, b_eff)


def tail_stage(patches3, w3, b3, w1, b1, w2, b2, n):
    """conv3 + pool + flatten + fc1 + ReLU + dropout + fc2, one kernel."""
    vm = pl.BlockSpec(memory_space=pltpu.MemorySpace.VMEM)
    return pl.pallas_call(
        _tail_kernel,
        out_shape=jax.ShapeDtypeStruct((n, LANES), jnp.float32),
        in_specs=[vm, vm, vm, vm, vm, vm, vm],
        out_specs=vm,
    )(patches3, w3, b3, w1, b1, w2, b2)


# ------------------------------ JAX glue ops --------------------------------

def _pool_ordered_patches(x_nhwc, sample_major=True):
    """im2col for a 3x3 VALID conv, rows grouped by 2x2-pool window position.

    Returns (4, N*PH*PW, 9*C).  Leading axis is the pool-window offset
    (dy*2+dx), so a 2x2 maxpool is an elementwise max over it.
    Rows are ordered (n, ph, pw) if sample_major else (ph, pw, n).
    Pure data movement (XLA glue)."""
    n, h, w, c = x_nhwc.shape
    ho, wo = h - 2, w - 2
    ph, pw = ho // 2, wo // 2
    k = 9 * c
    cols = [x_nhwc[:, i:i + ho, j:j + wo, :] for i in range(3) for j in range(3)]
    p = jnp.concatenate(cols, axis=-1)                  # (N, Ho, Wo, K)
    p = p.reshape(n, ph, 2, pw, 2, k)
    if sample_major:
        p = jnp.transpose(p, (2, 4, 0, 1, 3, 5))        # (dy, dx, N, PH, PW, K)
    else:
        p = jnp.transpose(p, (2, 4, 1, 3, 0, 5))        # (dy, dx, PH, PW, N, K)
    return p.reshape(4, n * ph * pw, k), (n, ph, pw)


# ------------------------------ parameters ----------------------------------

def _conv_block_params(key, cout, cin):
    kw_, kb = jax.random.split(key)
    return dict(
        w=jax.random.normal(kw_, (cout, cin, 3, 3), jnp.float32) * 0.05,
        b=jax.random.normal(kb, (cout,), jnp.float32) * 0.05,
        gamma=1.0 + 0.02 * jnp.arange(cout, dtype=jnp.float32),
        beta=0.01 * jnp.arange(cout, dtype=jnp.float32),
        rmean=0.01 * jnp.arange(cout, dtype=jnp.float32),
        rvar=1.0 + 0.05 * jnp.arange(cout, dtype=jnp.float32),
    )


def init_params(key):
    k1, k2, k3, k4, k5, k6, k7 = jax.random.split(key, 7)
    return dict(
        c1=_conv_block_params(k1, 12, 3),
        c2=_conv_block_params(k2, 24, 12),
        c3=_conv_block_params(k3, 48, 24),
        fc1=dict(w=jax.random.normal(k4, (512, 192), jnp.float32) * 0.02,
                 b=jax.random.normal(k5, (512,), jnp.float32) * 0.02),
        fc2=dict(w=jax.random.normal(k6, (100, 512), jnp.float32) * 0.02,
                 b=jax.random.normal(k7, (100,), jnp.float32) * 0.02),
    )


def prepare_params(params, eps=1e-5):
    """One-time prep: fold eval-mode BN + conv bias into weights, pad output
    channels to 128 lanes, pre-transpose FC weights, and fold PyTorch's
    (C, H, W) flatten order + the channel padding into fc1's weight layout."""
    prep = {"conv": []}
    for name in ("c1", "c2", "c3"):
        p = params[name]
        cout, cin = p["w"].shape[0], p["w"].shape[1]
        scale = p["gamma"] / jnp.sqrt(p["rvar"] + eps)
        shift = p["beta"] - p["rmean"] * scale
        w_mat = jnp.transpose(p["w"], (2, 3, 1, 0)).reshape(9 * cin, cout)
        w_eff = w_mat * scale[None, :]                      # BN scale folded
        b_eff = scale * p["b"] + shift                      # BN shift folded
        prep["conv"].append(dict(
            w=jnp.pad(w_eff, ((0, 0), (0, LANES - cout))),
            b=jnp.pad(b_eff, (0, LANES - cout)).reshape(1, LANES),
        ))
    # fc1 input features: flatten of (48, 2, 2) in (c, h, w) order.  Conv3's
    # pooled rows come out per spatial position j = h*2 + w with 128 padded
    # channels, so build fc1_w as (4, 128, 512): fc1_w[j, c, o] = W[o, c*4 + j].
    w1 = params["fc1"]["w"].T.reshape(48, 2, 2, 512)        # (c, h, w, out)
    w1 = jnp.transpose(w1, (1, 2, 0, 3))                    # (h, w, c, out)
    w1 = jnp.pad(w1, ((0, 0), (0, 0), (0, LANES - 48), (0, 0)))
    prep["fc1_w"] = w1.reshape(4, LANES, 512)               # (j, c_pad, out)
    prep["fc1_b"] = params["fc1"]["b"].reshape(1, 512)
    prep["fc2_w"] = jnp.pad(params["fc2"]["w"].T, ((0, 0), (0, LANES - 100)))
    prep["fc2_b"] = jnp.pad(params["fc2"]["b"], (0, LANES - 100)).reshape(1, LANES)
    return prep


# ------------------------------- forward ------------------------------------

def net_forward(prep, x_nchw):
    x = jnp.transpose(x_nchw, (0, 2, 3, 1))                  # NCHW -> NHWC
    # conv1 / conv2 stages (each: conv + BN + ReLU + pool fused in one kernel)
    for stage, cout in zip(prep["conv"][:2], CONV_COUT[:2]):
        patches, (n, ph, pw) = _pool_ordered_patches(x, sample_major=True)
        pooled = conv_stage(patches, stage["w"], stage["b"])     # (n*ph*pw, 128)
        x = pooled.reshape(n, ph, pw, LANES)[:, :, :, :cout]     # real channels
    # fused tail: conv3 + BN + ReLU + pool3 + flatten + fc1 + ReLU + dropout + fc2
    patches3, (n, ph, pw) = _pool_ordered_patches(x, sample_major=False)
    out = tail_stage(patches3, prep["conv"][2]["w"], prep["conv"][2]["b"],
                     prep["fc1_w"], prep["fc1_b"],
                     prep["fc2_w"], prep["fc2_b"], n)            # (n, 128)
    return out[:, :100]


# --------------------------------- main --------------------------------------

if __name__ == "__main__":
    key = jax.random.PRNGKey(0)
    kx, kp = jax.random.split(key)
    # fc1 expects 48*2*2 features => input spatial must be 30x30
    # (30 -conv-> 28 -pool-> 14 -conv-> 12 -pool-> 6 -conv-> 4 -pool-> 2)
    x = jax.random.normal(kx, (2, 3, 30, 30), jnp.float32)   # NCHW like PyTorch
    params = init_params(kp)
    prep = prepare_params(params)        # one-time weight folding / padding

    fwd = jax.jit(net_forward)
    out = jax.block_until_ready(fwd(prep, x))
    assert out.shape == (2, 100), out.shape
    print("KERNEL_OK")
</pallas_src>

<mosaic_0001>
module attributes {stable_mosaic.version = 11 : i64} {
  func.func @_conv_stage_kernel(%arg0: i32, %arg1: memref<4x392x27xf32, #tpu.memory_space<vmem>>, %arg2: memref<27x128xf32, #tpu.memory_space<vmem>>, %arg3: memref<1x128xf32, #tpu.memory_space<vmem>>, %arg4: memref<392x128xf32, #tpu.memory_space<vmem>>) attributes {dimension_semantics = [#tpu.dimension_semantics<parallel>], iteration_bounds = array<i64: 1>, scalar_prefetch = 0 : i64, scratch_operands = 0 : i64, tpu.core_type = #tpu.core_type<tc>, window_params = [{transform_indices = @transform_0, window_bounds = array<i64: 4, 392, 27>}, {pipeline_mode = #tpu.pipeline_mode<synchronous>, transform_indices = @transform_1, window_bounds = array<i64: 27, 128>}, {pipeline_mode = #tpu.pipeline_mode<synchronous>, transform_indices = @transform_2, window_bounds = array<i64: 1, 128>}, {transform_indices = @transform_3, window_bounds = array<i64: 392, 128>}]} {
    %c0 = arith.constant 0 : index
    %c0_0 = arith.constant 0 : index
    %0 = vector.load %arg2[%c0, %c0_0] : memref<27x128xf32, #tpu.memory_space<vmem>>, vector<27x128xf32>
    %c0_1 = arith.constant 0 : index
    %c0_2 = arith.constant 0 : index
    %c0_3 = arith.constant 0 : index
    %1 = vector.load %arg1[%c0_1, %c0_2, %c0_3] : memref<4x392x27xf32, #tpu.memory_space<vmem>>, vector<1x392x27xf32>
    %2 = vector.shape_cast %1 : vector<1x392x27xf32> to vector<392x27xf32>
    %cst = arith.constant dense<0.000000e+00> : vector<392x128xf32>
    %3 = tpu.matmul %2, %0, %cst {dimension_numbers = #tpu.dot_dimension_numbers<[1], [0], [0], [1], [0, 0, 1, 1], [], []>} : vector<392x27xf32>, vector<27x128xf32>, vector<392x128xf32> -> vector<392x128xf32>
    %c1 = arith.constant 1 : index
    %c0_4 = arith.constant 0 : index
    %c0_5 = arith.constant 0 : index
    %4 = vector.load %arg1[%c1, %c0_4, %c0_5] : memref<4x392x27xf32, #tpu.memory_space<vmem>>, vector<1x392x27xf32>
    %5 = vector.shape_cast %4 : vector<1x392x27xf32> to vector<392x27xf32>
    %cst_6 = arith.constant dense<0.000000e+00> : vector<392x128xf32>
    %6 = tpu.matmul %5, %0, %cst_6 {dimension_numbers = #tpu.dot_dimension_numbers<[1], [0], [0], [1], [0, 0, 1, 1], [], []>} : vector<392x27xf32>, vector<27x128xf32>, vector<392x128xf32> -> vector<392x128xf32>
    %c2 = arith.constant 2 : index
    %c0_7 = arith.constant 0 : index
    %c0_8 = arith.constant 0 : index
    %7 = vector.load %arg1[%c2, %c0_7, %c0_8] : memref<4x392x27xf32, #tpu.memory_space<vmem>>, vector<1x392x27xf32>
    %8 = vector.shape_cast %7 : vector<1x392x27xf32> to vector<392x27xf32>
    %cst_9 = arith.constant dense<0.000000e+00> : vector<392x128xf32>
    %9 = tpu.matmul %8, %0, %cst_9 {dimension_numbers = #tpu.dot_dimension_numbers<[1], [0], [0], [1], [0, 0, 1, 1], [], []>} : vector<392x27xf32>, vector<27x128xf32>, vector<392x128xf32> -> vector<392x128xf32>
    %c3 = arith.constant 3 : index
    %c0_10 = arith.constant 0 : index
    %c0_11 = arith.constant 0 : index
    %10 = vector.load %arg1[%c3, %c0_10, %c0_11] : memref<4x392x27xf32, #tpu.memory_space<vmem>>, vector<1x392x27xf32>
    %11 = vector.shape_cast %10 : vector<1x392x27xf32> to vector<392x27xf32>
    %cst_12 = arith.constant dense<0.000000e+00> : vector<392x128xf32>
    %12 = tpu.matmul %11, %0, %cst_12 {dimension_numbers = #tpu.dot_dimension_numbers<[1], [0], [0], [1], [0, 0, 1, 1], [], []>} : vector<392x27xf32>, vector<27x128xf32>, vector<392x128xf32> -> vector<392x128xf32>
    %13 = arith.maximumf %3, %6 : vector<392x128xf32>
    %14 = arith.maximumf %9, %12 : vector<392x128xf32>
    %15 = arith.maximumf %13, %14 : vector<392x128xf32>
    %c0_13 = arith.constant 0 : index
    %c0_14 = arith.constant 0 : index
    %16 = vector.load %arg3[%c0_13, %c0_14] : memref<1x128xf32, #tpu.memory_space<vmem>>, vector<1x128xf32>
    %17 = vector.broadcast %16 : vector<1x128xf32> to vector<392x128xf32>
    %18 = arith.addf %15, %17 : vector<392x128xf32>
    %cst_15 = arith.constant 0.000000e+00 : f32
    %19 = vector.broadcast %cst_15 : f32 to vector<392x128xf32>
    %20 = arith.maximumf %18, %19 : vector<392x128xf32>
    %c0_16 = arith.constant 0 : index
    %c0_17 = arith.constant 0 : index
    %21 = vector.load %arg4[%c0_16, %c0_17] : memref<392x128xf32, #tpu.memory_space<vmem>>, vector<392x128xf32>
    tpu.vector_store %arg4[%c0_16, %c0_17], %20 {strides = array<i32>} : memref<392x128xf32, #tpu.memory_space<vmem>>, vector<392x128xf32>,
    return
  }
  func.func @transform_0(%arg0: i32) -> (i32, i32, i32) {
    %c0_i32 = arith.constant 0 : i32
    %c0_i32_0 = arith.constant 0 : i32
    %c0_i32_1 = arith.constant 0 : i32
    return %c0_i32, %arg0, %c0_i32_0 : i32, i32, i32
  }
  func.func @transform_1(%arg0: i32) -> (i32, i32) {
    %c0_i32 = arith.constant 0 : i32
    %c0_i32_0 = arith.constant 0 : i32
    %c0_i32_1 = arith.constant 0 : i32
    return %c0_i32, %c0_i32_0 : i32, i32
  }
  func.func @transform_2(%arg0: i32) -> (i32, i32) {
    %c0_i32 = arith.constant 0 : i32
    %c0_i32_0 = arith.constant 0 : i32
    %c0_i32_1 = arith.constant 0 : i32
    return %c0_i32, %c0_i32_0 : i32, i32
  }
  func.func @transform_3(%arg0: i32) -> (i32, i32) {
    %c0_i32 = arith.constant 0 : i32
    %c0_i32_0 = arith.constant 0 : i32
    return %arg0, %c0_i32 : i32, i32
  }
}

module attributes {stable_mosaic.version = 11 : i64} {
  func.func @_conv_stage_kernel(%arg0: i32, %arg1: memref<4x72x108xf32, #tpu.memory_space<vmem>>, %arg2: memref<108x128xf32, #tpu.memory_space<vmem>>, %arg3: memref<1x128xf32, #tpu.memory_space<vmem>>, %arg4: memref<72x128xf32, #tpu.memory_space<vmem>>) attributes {dimension_semantics = [#tpu.dimension_semantics<parallel>], iteration_bounds = array<i64: 1>, scalar_prefetch = 0 : i64, scratch_operands = 0 : i64, tpu.core_type = #tpu.core_type<tc>, window_params = [{transform_indices = @transform_0, window_bounds = array<i64: 4, 72, 108>}, {pipeline_mode = #tpu.pipeline_mode<synchronous>, transform_indices = @transform_1, window_bounds = array<i64: 108, 128>}, {pipeline_mode = #tpu.pipeline_mode<synchronous>, transform_indices = @transform_2, window_bounds = array<i64: 1, 128>}, {transform_indices = @transform_3, window_bounds = array<i64: 72, 128>}]} {
    %c0 = arith.constant 0 : index
    %c0_0 = arith.constant 0 : index
    %0 = vector.load %arg2[%c0, %c0_0] : memref<108x128xf32, #tpu.memory_space<vmem>>, vector<108x128xf32>
    %c0_1 = arith.constant 0 : index
    %c0_2 = arith.constant 0 : index
    %c0_3 = arith.constant 0 : index
    %1 = vector.load %arg1[%c0_1, %c0_2, %c0_3] : memref<4x72x108xf32, #tpu.memory_space<vmem>>, vector<1x72x108xf32>
    %2 = vector.shape_cast %1 : vector<1x72x108xf32> to vector<72x108xf32>
    %cst = arith.constant dense<0.000000e+00> : vector<72x128xf32>
    %3 = tpu.matmul %2, %0, %cst {dimension_numbers = #tpu.dot_dimension_numbers<[1], [0], [0], [1], [0, 0, 1, 1], [], []>} : vector<72x108xf32>, vector<108x128xf32>, vector<72x128xf32> -> vector<72x128xf32>
    %c1 = arith.constant 1 : index
    %c0_4 = arith.constant 0 : index
    %c0_5 = arith.constant 0 : index
    %4 = vector.load %arg1[%c1, %c0_4, %c0_5] : memref<4x72x108xf32, #tpu.memory_space<vmem>>, vector<1x72x108xf32>
    %5 = vector.shape_cast %4 : vector<1x72x108xf32> to vector<72x108xf32>
    %cst_6 = arith.constant dense<0.000000e+00> : vector<72x128xf32>
    %6 = tpu.matmul %5, %0, %cst_6 {dimension_numbers = #tpu.dot_dimension_numbers<[1], [0], [0], [1], [0, 0, 1, 1], [], []>} : vector<72x108xf32>, vector<108x128xf32>, vector<72x128xf32> -> vector<72x128xf32>
    %c2 = arith.constant 2 : index
    %c0_7 = arith.constant 0 : index
    %c0_8 = arith.constant 0 : index
    %7 = vector.load %arg1[%c2, %c0_7, %c0_8] : memref<4x72x108xf32, #tpu.memory_space<vmem>>, vector<1x72x108xf32>
    %8 = vector.shape_cast %7 : vector<1x72x108xf32> to vector<72x108xf32>
    %cst_9 = arith.constant dense<0.000000e+00> : vector<72x128xf32>
    %9 = tpu.matmul %8, %0, %cst_9 {dimension_numbers = #tpu.dot_dimension_numbers<[1], [0], [0], [1], [0, 0, 1, 1], [], []>} : vector<72x108xf32>, vector<108x128xf32>, vector<72x128xf32> -> vector<72x128xf32>
    %c3 = arith.constant 3 : index
    %c0_10 = arith.constant 0 : index
    %c0_11 = arith.constant 0 : index
    %10 = vector.load %arg1[%c3, %c0_10, %c0_11] : memref<4x72x108xf32, #tpu.memory_space<vmem>>, vector<1x72x108xf32>
    %11 = vector.shape_cast %10 : vector<1x72x108xf32> to vector<72x108xf32>
    %cst_12 = arith.constant dense<0.000000e+00> : vector<72x128xf32>
    %12 = tpu.matmul %11, %0, %cst_12 {dimension_numbers = #tpu.dot_dimension_numbers<[1], [0], [0], [1], [0, 0, 1, 1], [], []>} : vector<72x108xf32>, vector<108x128xf32>, vector<72x128xf32> -> vector<72x128xf32>
    %13 = arith.maximumf %3, %6 : vector<72x128xf32>
    %14 = arith.maximumf %9, %12 : vector<72x128xf32>
    %15 = arith.maximumf %13, %14 : vector<72x128xf32>
    %c0_13 = arith.constant 0 : index
    %c0_14 = arith.constant 0 : index
    %16 = vector.load %arg3[%c0_13, %c0_14] : memref<1x128xf32, #tpu.memory_space<vmem>>, vector<1x128xf32>
    %17 = vector.broadcast %16 : vector<1x128xf32> to vector<72x128xf32>
    %18 = arith.addf %15, %17 : vector<72x128xf32>
    %cst_15 = arith.constant 0.000000e+00 : f32
    %19 = vector.broadcast %cst_15 : f32 to vector<72x128xf32>
    %20 = arith.maximumf %18, %19 : vector<72x128xf32>
    %c0_16 = arith.constant 0 : index
    %c0_17 = arith.constant 0 : index
    %21 = vector.load %arg4[%c0_16, %c0_17] : memref<72x128xf32, #tpu.memory_space<vmem>>, vector<72x128xf32>
    tpu.vector_store %arg4[%c0_16, %c0_17], %20 {strides = array<i32>} : memref<72x128xf32, #tpu.memory_space<vmem>>, vector<72x128xf32>,
    return
  }
  func.func @transform_0(%arg0: i32) -> (i32, i32, i32) {
    %c0_i32 = arith.constant 0 : i32
    %c0_i32_0 = arith.constant 0 : i32
    %c0_i32_1 = arith.constant 0 : i32
    return %c0_i32, %arg0, %c0_i32_0 : i32, i32, i32
  }
  func.func @transform_1(%arg0: i32) -> (i32, i32) {
    %c0_i32 = arith.constant 0 : i32
    %c0_i32_0 = arith.constant 0 : i32
    %c0_i32_1 = arith.constant 0 : i32
    return %c0_i32, %c0_i32_0 : i32, i32
  }
  func.func @transform_2(%arg0: i32) -> (i32, i32) {
    %c0_i32 = arith.constant 0 : i32
    %c0_i32_0 = arith.constant 0 : i32
    %c0_i32_1 = arith.constant 0 : i32
    return %c0_i32, %c0_i32_0 : i32, i32
  }
  func.func @transform_3(%arg0: i32) -> (i32, i32) {
    %c0_i32 = arith.constant 0 : i32
    %c0_i32_0 = arith.constant 0 : i32
    return %arg0, %c0_i32 : i32, i32
  }
}

module attributes {stable_mosaic.version = 11 : i64} {
  func.func @_tail_kernel(%arg0: memref<4x8x216xf32, #tpu.memory_space<vmem>>, %arg1: memref<216x128xf32, #tpu.memory_space<vmem>>, %arg2: memref<1x128xf32, #tpu.memory_space<vmem>>, %arg3: memref<4x128x512xf32, #tpu.memory_space<vmem>>, %arg4: memref<1x512xf32, #tpu.memory_space<vmem>>, %arg5: memref<512x128xf32, #tpu.memory_space<vmem>>, %arg6: memref<1x128xf32, #tpu.memory_space<vmem>>, %arg7: memref<2x128xf32, #tpu.memory_space<vmem>>) attributes {dimension_semantics = [], scalar_prefetch = 0 : i64, scratch_operands = 0 : i64, tpu.core_type = #tpu.core_type<tc>} {
    %c0 = arith.constant 0 : index
    %c0_0 = arith.constant 0 : index
    %0 = vector.load %arg1[%c0, %c0_0] : memref<216x128xf32, #tpu.memory_space<vmem>>, vector<216x128xf32>
    %c0_1 = arith.constant 0 : index
    %c0_2 = arith.constant 0 : index
    %c0_3 = arith.constant 0 : index
    %1 = vector.load %arg0[%c0_1, %c0_2, %c0_3] : memref<4x8x216xf32, #tpu.memory_space<vmem>>, vector<1x8x216xf32>
    %2 = vector.shape_cast %1 : vector<1x8x216xf32> to vector<8x216xf32>
    %cst = arith.constant dense<0.000000e+00> : vector<8x128xf32>
    %3 = tpu.matmul %2, %0, %cst {dimension_numbers = #tpu.dot_dimension_numbers<[1], [0], [0], [1], [0, 0, 1, 1], [], []>} : vector<8x216xf32>, vector<216x128xf32>, vector<8x128xf32> -> vector<8x128xf32>
    %c1 = arith.constant 1 : index
    %c0_4 = arith.constant 0 : index
    %c0_5 = arith.constant 0 : index
    %4 = vector.load %arg0[%c1, %c0_4, %c0_5] : memref<4x8x216xf32, #tpu.memory_space<vmem>>, vector<1x8x216xf32>
    %5 = vector.shape_cast %4 : vector<1x8x216xf32> to vector<8x216xf32>
    %cst_6 = arith.constant dense<0.000000e+00> : vector<8x128xf32>
    %6 = tpu.matmul %5, %0, %cst_6 {dimension_numbers = #tpu.dot_dimension_numbers<[1], [0], [0], [1], [0, 0, 1, 1], [], []>} : vector<8x216xf32>, vector<216x128xf32>, vector<8x128xf32> -> vector<8x128xf32>
    %c2 = arith.constant 2 : index
    %c0_7 = arith.constant 0 : index
    %c0_8 = arith.constant 0 : index
    %7 = vector.load %arg0[%c2, %c0_7, %c0_8] : memref<4x8x216xf32, #tpu.memory_space<vmem>>, vector<1x8x216xf32>
    %8 = vector.shape_cast %7 : vector<1x8x216xf32> to vector<8x216xf32>
    %cst_9 = arith.constant dense<0.000000e+00> : vector<8x128xf32>
    %9 = tpu.matmul %8, %0, %cst_9 {dimension_numbers = #tpu.dot_dimension_numbers<[1], [0], [0], [1], [0, 0, 1, 1], [], []>} : vector<8x216xf32>, vector<216x128xf32>, vector<8x128xf32> -> vector<8x128xf32>
    %c3 = arith.constant 3 : index
    %c0_10 = arith.constant 0 : index
    %c0_11 = arith.constant 0 : index
    %10 = vector.load %arg0[%c3, %c0_10, %c0_11] : memref<4x8x216xf32, #tpu.memory_space<vmem>>, vector<1x8x216xf32>
    %11 = vector.shape_cast %10 : vector<1x8x216xf32> to vector<8x216xf32>
    %cst_12 = arith.constant dense<0.000000e+00> : vector<8x128xf32>
    %12 = tpu.matmul %11, %0, %cst_12 {dimension_numbers = #tpu.dot_dimension_numbers<[1], [0], [0], [1], [0, 0, 1, 1], [], []>} : vector<8x216xf32>, vector<216x128xf32>, vector<8x128xf32> -> vector<8x128xf32>
    %13 = arith.maximumf %3, %6 : vector<8x128xf32>
    %14 = arith.maximumf %9, %12 : vector<8x128xf32>
    %15 = arith.maximumf %13, %14 : vector<8x128xf32>
    %c0_13 = arith.constant 0 : index
    %c0_14 = arith.constant 0 : index
    %16 = vector.load %arg2[%c0_13, %c0_14] : memref<1x128xf32, #tpu.memory_space<vmem>>, vector<1x128xf32>
    %17 = vector.broadcast %16 : vector<1x128xf32> to vector<8x128xf32>
    %18 = arith.addf %15, %17 : vector<8x128xf32>
    %cst_15 = arith.constant 0.000000e+00 : f32
    %19 = vector.broadcast %cst_15 : f32 to vector<8x128xf32>
    %20 = arith.maximumf %18, %19 : vector<8x128xf32>
    %21 = vector.extract_strided_slice %20 {offsets = [0, 0], sizes = [2, 128], strides = [1, 1]} : vector<8x128xf32> to vector<2x128xf32>
    %c0_16 = arith.constant 0 : index
    %c0_17 = arith.constant 0 : index
    %c0_18 = arith.constant 0 : index
    %22 = vector.load %arg3[%c0_16, %c0_17, %c0_18] : memref<4x128x512xf32, #tpu.memory_space<vmem>>, vector<1x128x512xf32>
    %23 = vector.shape_cast %22 : vector<1x128x512xf32> to vector<128x512xf32>
    %cst_19 = arith.constant dense<0.000000e+00> : vector<2x512xf32>
    %24 = tpu.matmul %21, %23, %cst_19 {dimension_numbers = #tpu.dot_dimension_numbers<[1], [0], [0], [1], [0, 0, 1, 1], [], []>} : vector<2x128xf32>, vector<128x512xf32>, vector<2x512xf32> -> vector<2x512xf32>
    %25 = vector.extract_strided_slice %20 {offsets = [2, 0], sizes = [2, 128], strides = [1, 1]} : vector<8x128xf32> to vector<2x128xf32>
    %c1_20 = arith.constant 1 : index
    %c0_21 = arith.constant 0 : index
    %c0_22 = arith.constant 0 : index
    %26 = vector.load %arg3[%c1_20, %c0_21, %c0_22] : memref<4x128x512xf32, #tpu.memory_space<vmem>>, vector<1x128x512xf32>
    %27 = vector.shape_cast %26 : vector<1x128x512xf32> to vector<128x512xf32>
    %cst_23 = arith.constant dense<0.000000e+00> : vector<2x512xf32>
    %28 = tpu.matmul %25, %27, %cst_23 {dimension_numbers = #tpu.dot_dimension_numbers<[1], [0], [0], [1], [0, 0, 1, 1], [], []>} : vector<2x128xf32>, vector<128x512xf32>, vector<2x512xf32> -> vector<2x512xf32>
    %29 = arith.addf %24, %28 : vector<2x512xf32>
    %30 = vector.extract_strided_slice %20 {offsets = [4, 0], sizes = [2, 128], strides = [1, 1]} : vector<8x128xf32> to vector<2x128xf32>
    %c2_24 = arith.constant 2 : index
    %c0_25 = arith.constant 0 : index
    %c0_26 = arith.constant 0 : index
    %31 = vector.load %arg3[%c2_24, %c0_25, %c0_26] : memref<4x128x512xf32, #tpu.memory_space<vmem>>, vector<1x128x512xf32>
    %32 = vector.shape_cast %31 : vector<1x128x512xf32> to vector<128x512xf32>
    %cst_27 = arith.constant dense<0.000000e+00> : vector<2x512xf32>
    %33 = tpu.matmul %30, %32, %cst_27 {dimension_numbers = #tpu.dot_dimension_numbers<[1], [0], [0], [1], [0, 0, 1, 1], [], []>} : vector<2x128xf32>, vector<128x512xf32>, vector<2x512xf32> -> vector<2x512xf32>
    %34 = arith.addf %29, %33 : vector<2x512xf32>
    %35 = vector.extract_strided_slice %20 {offsets = [6, 0], sizes = [2, 128], strides = [1, 1]} : vector<8x128xf32> to vector<2x128xf32>
    %c3_28 = arith.constant 3 : index
    %c0_29 = arith.constant 0 : index
    %c0_30 = arith.constant 0 : index
    %36 = vector.load %arg3[%c3_28, %c0_29, %c0_30] : memref<4x128x512xf32, #tpu.memory_space<vmem>>, vector<1x128x512xf32>
    %37 = vector.shape_cast %36 : vector<1x128x512xf32> to vector<128x512xf32>
    %cst_31 = arith.constant dense<0.000000e+00> : vector<2x512xf32>
    %38 = tpu.matmul %35, %37, %cst_31 {dimension_numbers = #tpu.dot_dimension_numbers<[1], [0], [0], [1], [0, 0, 1, 1], [], []>} : vector<2x128xf32>, vector<128x512xf32>, vector<2x512xf32> -> vector<2x512xf32>
    %39 = arith.addf %34, %38 : vector<2x512xf32>
    %c0_32 = arith.constant 0 : index
    %c0_33 = arith.constant 0 : index
    %40 = vector.load %arg4[%c0_32, %c0_33] : memref<1x512xf32, #tpu.memory_space<vmem>>, vector<1x512xf32>
    %41 = vector.broadcast %40 : vector<1x512xf32> to vector<2x512xf32>
    %42 = arith.addf %39, %41 : vector<2x512xf32>
    %cst_34 = arith.constant 0.000000e+00 : f32
    %43 = vector.broadcast %cst_34 : f32 to vector<2x512xf32>
    %44 = arith.maximumf %42, %43 : vector<2x512xf32>
    %c0_35 = arith.constant 0 : index
    %c0_36 = arith.constant 0 : index
    %45 = vector.load %arg5[%c0_35, %c0_36] : memref<512x128xf32, #tpu.memory_space<vmem>>, vector<512x128xf32>
    %cst_37 = arith.constant dense<0.000000e+00> : vector<2x128xf32>
    %46 = tpu.matmul %44, %45, %cst_37 {dimension_numbers = #tpu.dot_dimension_numbers<[1], [0], [0], [1], [0, 0, 1, 1], [], []>} : vector<2x512xf32>, vector<512x128xf32>, vector<2x128xf32> -> vector<2x128xf32>
    %c0_38 = arith.constant 0 : index
    %c0_39 = arith.constant 0 : index
    %47 = vector.load %arg6[%c0_38, %c0_39] : memref<1x128xf32, #tpu.memory_space<vmem>>, vector<1x128xf32>
    %48 = vector.broadcast %47 : vector<1x128xf32> to vector<2x128xf32>
    %49 = arith.addf %46, %48 : vector<2x128xf32>
    %c0_40 = arith.constant 0 : index
    %c0_41 = arith.constant 0 : index
    %50 = vector.load %arg7[%c0_40, %c0_41] : memref<2x128xf32, #tpu.memory_space<vmem>>, vector<2x128xf32>
    tpu.vector_store %arg7[%c0_40, %c0_41], %49 {strides = array<i32>} : memref<2x128xf32, #tpu.memory_space<vmem>>, vector<2x128xf32>,
    return
  }
}

</mosaic_0001>

<bundles_post_ra>
// kernel: net_forward.3
= control target key start
LH: loop header
LB: loop body
LE: loop exit
PB: predicated region body
PF: predicated region fallthrough
CT: control target
= control target key end

     0   :  { %v3567_v0 = vmov 0.0|0.0   ;;  %vm215_vm0 = vcmask 1042432   ;;  %vm3568_vm1 = vmmov 0   ;;  %v3569_v6 = vmov 0.0   ;;  %s5433_s1 = inlined_call_operand.vmem [shape: f32[27,128], index: 1, kind: input, shape index: {}]   ;;  %s5434_s0 = inlined_call_operand.vmem [shape: f32[4,392,27], index: 0, kind: input, shape index: {}]   ;;  %s5435_s2 = inlined_call_operand.vmem [shape: f32[1,128], index: 2, kind: input, shape index: {}]   ;;  %s5436_s3 = inlined_call_operand.vmem [shape: f32[392,128], index: 3, kind: output, shape index: {}]  }
   0x1   :  { %3535 = vmatprep.subr.bf16.mxu0 %v3567_v0  ;;  %3542 = vmatprep.subr.bf16.mxu1 %v3567_v0  ;;  %v14_v1 = vld [vmem:[%s5433_s1] sm:$0xff]  ;;  %v15_v2 = vld [vmem:[%s5433_s1 + $0x8] sm:$0xff]  ;;  %v16_v3 = vld [vmem:[%s5433_s1 + $0x10] sm:$0xff]  ;;  %vm3570_vm2 = vmmov 1   ;;  %vm67_vm4 = vcmask 220160  }
   0x2   :  { %v3536_v4 = vpack.c.bf16 %v15_v2, %v14_v1  ;;  %v17_v5 = vld [vmem:[%s5433_s1 + $0x18] sm:$0x7]  ;;  %2923 = vmatprep.mubr.msk.f32.mxu0 %vm3568_vm1, %v3569_v6  ;;  %3078 = vmatprep.mubr.msk.f32.mxu1 %vm3568_vm1, %v3569_v6  ;;  %vm3607_vm3 = vmpackc.low %vm215_vm0, %vm3570_vm2  ;;  %v18_v9 = vld [vmem:[%s5434_s0] sm:$0xff] }
   0x3   :  { %v3539_v7 = vpack.c.bf16 %v17_v5, %v16_v3  ;;  %v2405_v10 = vld [vmem:[%s5434_s0 + $0x188] sm:$0xff]  ;;  %v2406_v12 = vld [vmem:[%s5434_s0 + $0x190] sm:$0xff]  ;;  %v2407_v14 = vld [vmem:[%s5434_s0 + $0x198] sm:$0xff] }
   0x4   :  { %3537 = vmatpush3.bf16.msra.mxu0 %v3536_v4  ;;  %3544 = vmatpush3.bf16.msra.mxu1 %v3536_v4  ;;  %v19_v11 = vld [vmem:[%s5434_s0 + $0x8] sm:$0xff]  ;;  %v20_v13 = vld [vmem:[%s5434_s0 + $0x10] sm:$0xff]  ;;  %v21_v15 = vld [vmem:[%s5434_s0 + $0x18] sm:$0xff] }
   0x5   :  { %3538 = vmatprep.subr.bf16.mxu0 %v3567_v0  ;;  %3545 = vmatprep.subr.bf16.mxu1 %v3567_v0  ;;  %v2408_v16 = vld [vmem:[%s5434_s0 + $0x1a0] sm:$0xff]  ;;  %v2409_v18 = vld [vmem:[%s5434_s0 + $0x1a8] sm:$0xff]  ;;  %v2410_v20 = vld [vmem:[%s5434_s0 + $0x1b0] sm:$0xff] }
   0x6   :  { %v22_v17 = vld [vmem:[%s5434_s0 + $0x20] sm:$0xff]  ;;  %v23_v19 = vld [vmem:[%s5434_s0 + $0x28] sm:$0xff]  ;;  %v24_v21 = vld [vmem:[%s5434_s0 + $0x30] sm:$0xff] }
   0x7   :  { %v2411_v22 = vld [vmem:[%s5434_s0 + $0x1b8] sm:$0xff]  ;;  %v2412_v24 = vld [vmem:[%s5434_s0 + $0x1c0] sm:$0xff]  ;;  %v2413_v26 = vld [vmem:[%s5434_s0 + $0x1c8] sm:$0xff] }
   0x8   :  { %3541 = vmatpush3.bf16.msk.msra.mxu0 %vm3607_vm3, %v3539_v7  ;;  %3548 = vmatpush3.bf16.msk.msra.mxu1 %vm3607_vm3, %v3539_v7  ;;  %v25_v23 = vld [vmem:[%s5434_s0 + $0x38] sm:$0xff]  ;;  %v26_v25 = vld [vmem:[%s5434_s0 + $0x40] sm:$0xff]  ;;  %v27_v27 = vld [vmem:[%s5434_s0 + $0x48] sm:$0xff] }
   0x9   :  { %3549 = vmatprep.subr.bf16.mxu0 %v3567_v0  ;;  %3556 = vmatprep.subr.bf16.mxu1 %v3567_v0  ;;  %v2414_v28 = vld [vmem:[%s5434_s0 + $0x1d0] sm:$0xff]  ;;  %v2415_v30 = vld [vmem:[%s5434_s0 + $0x1d8] sm:$0xff]  ;;  %v2416_v32 = vld [vmem:[%s5434_s0 + $0x1e0] sm:$0xff] }
   0xa   :  { %v28_v29 = vld [vmem:[%s5434_s0 + $0x50] sm:$0xff]  ;;  %v29_v31 = vld [vmem:[%s5434_s0 + $0x58] sm:$0xff]  ;;  %v30_v33 = vld [vmem:[%s5434_s0 + $0x60] sm:$0xff] }
   0xb   :  { %2924 = vmatmul.mubr.msk.f32.vlgmr.msra.gmra.mrb[0].mxu0 %vm67_vm4, %v18_v9  ;;  %3079 = vmatmul.mubr.msk.f32.vlgmr.msra.gmra.mrb[0].mxu1 %vm67_vm4, %v2405_v10  ;;  %v2417_v34 = vld [vmem:[%s5434_s0 + $0x1e8] sm:$0xff]  ;;  %v2418_v36 = vld [vmem:[%s5434_s0 + $0x1f0] sm:$0xff]  ;;  %v2419_v38 = vld [vmem:[%s5434_s0 + $0x1f8] sm:$0xff] }
   0xc   :  { %3551 = vmatpush3.bf16.msra.mxu0 %v3536_v4  ;;  %3558 = vmatpush3.bf16.msra.mxu1 %v3536_v4  ;;  %v31_v35 = vld [vmem:[%s5434_s0 + $0x68] sm:$0xff]  ;;  %v32_v37 = vld [vmem:[%s5434_s0 + $0x70] sm:$0xff]  ;;  %v33_v39 = vld [vmem:[%s5434_s0 + $0x78] sm:$0xff] }
   0xd   :  { %2926 = vmatprep.mubr.msk.f32.mxu0 %vm3568_vm1, %v3569_v6  ;;  %3081 = vmatprep.mubr.msk.f32.mxu1 %vm3568_vm1, %v3569_v6  ;;  %v2420_v40 = vld [vmem:[%s5434_s0 + $0x200] sm:$0xff]  ;;  %v2421_v42 = vld [vmem:[%s5434_s0 + $0x208] sm:$0xff]  ;;  %v2422_v44 = vld [vmem:[%s5434_s0 + $0x210] sm:$0xff] }
   0xe   :  { %3552 = vmatprep.subr.bf16.mxu0 %v3567_v0  ;;  %3559 = vmatprep.subr.bf16.mxu1 %v3567_v0  ;;  %v34_v41 = vld [vmem:[%s5434_s0 + $0x80] sm:$0xff]  ;;  %v35_v43 = vld [vmem:[%s5434_s0 + $0x88] sm:$0xff]  ;;  %v36_v45 = vld [vmem:[%s5434_s0 + $0x90] sm:$0xff] }
   0xf   :  { %2927 = vmatmul.mubr.msk.f32.gmra.mrb[2].mxu0 %vm67_vm4, %v19_v11  ;;  %3082 = vmatmul.mubr.msk.f32.gmra.mrb[2].mxu1 %vm67_vm4, %v2406_v12  ;;  %v2423_v46 = vld [vmem:[%s5434_s0 + $0x218] sm:$0xff]  ;;  %v2424_v48 = vld [vmem:[%s5434_s0 + $0x220] sm:$0xff]  ;;  %v2425_v50 = vld [vmem:[%s5434_s0 + $0x228] sm:$0xff] }
  0x10   :  { %2929 = vmatprep.mubr.msk.f32.mxu0 %vm3568_vm1, %v3569_v6  ;;  %3084 = vmatprep.mubr.msk.f32.mxu1 %vm3568_vm1, %v3569_v6  ;;  %v37_v47 = vld [vmem:[%s5434_s0 + $0x98] sm:$0xff]  ;;  %v38_v49 = vld [vmem:[%s5434_s0 + $0xa0] sm:$0xff]  ;;  %v39_v51 = vld [vmem:[%s5434_s0 + $0xa8] sm:$0xff] }
  0x11   :  { %3555 = vmatpush3.bf16.msk.msra.mxu0 %vm3607_vm3, %v3539_v7  ;;  %3562 = vmatpush3.bf16.msk.msra.mxu1 %vm3607_vm3, %v3539_v7  ;;  %v2426_v52 = vld [vmem:[%s5434_s0 + $0x230] sm:$0xff]  ;;  %v2427_v54 = vld [vmem:[%s5434_s0 + $0x238] sm:$0xff]  ;;  %v2428_v56 = vld [vmem:[%s5434_s0 + $0x240] sm:$0xff] }
  0x12   :  { %v40_v53 = vld [vmem:[%s5434_s0 + $0xb0] sm:$0xff]  ;;  %v41_v55 = vld [vmem:[%s5434_s0 + $0xb8] sm:$0xff]  ;;  %v42_v57 = vld [vmem:[%s5434_s0 + $0xc0] sm:$0xff] }
  0x13   :  { %2930 = vmatmul.mubr.msk.f32.gmra.mrb[4].mxu0 %vm67_vm4, %v20_v13  ;;  %3085 = vmatmul.mubr.msk.f32.gmra.mrb[4].mxu1 %vm67_vm4, %v2407_v14  ;;  %v2429_v58 = vld [vmem:[%s5434_s0 + $0x248] sm:$0xff]  ;;  %v2430_v60 = vld [vmem:[%s5434_s0 + $0x250] sm:$0xff]  ;;  %v2431_v62 = vld [vmem:[%s5434_s0 + $0x258] sm:$0xff] }
  0x14   :  { %2932 = vmatprep.mubr.msk.f32.mxu0 %vm3568_vm1, %v3569_v6  ;;  %3087 = vmatprep.mubr.msk.f32.mxu1 %vm3568_vm1, %v3569_v6  ;;  %v43_v59 = vld [vmem:[%s5434_s0 + $0xc8] sm:$0xff]  ;;  %v44_v61 = vld [vmem:[%s5434_s0 + $0xd0] sm:$0xff]  ;;  %v45_v63 = vld [vmem:[%s5434_s0 + $0xd8] sm:$0xff] }
  0x15   :  { %v2432_v0 = vld [vmem:[%s5434_s0 + $0x260] sm:$0xff]  ;;  %v2433_v2 = vld [vmem:[%s5434_s0 + $0x268] sm:$0xff]  ;;  %v2434_v4 = vld [vmem:[%s5434_s0 + $0x270] sm:$0xff] }
  0x16   :  { %v46_v1 = vld [vmem:[%s5434_s0 + $0xe0] sm:$0xff]  ;;  %v47_v3 = vld [vmem:[%s5434_s0 + $0xe8] sm:$0xff]  ;;  %v48_v5 = vld [vmem:[%s5434_s0 + $0xf0] sm:$0xff] }
  0x17   :  { %2933 = vmatmul.mubr.msk.f32.gmra.mrb[6].mxu0 %vm67_vm4, %v21_v15  ;;  %3088 = vmatmul.mubr.msk.f32.gmra.mrb[6].mxu1 %vm67_vm4, %v2408_v16  ;;  %v2435_v7 = vld [vmem:[%s5434_s0 + $0x278] sm:$0xff]  ;;  %v2436_v9 = vld [vmem:[%s5434_s0 + $0x280] sm:$0xff]  ;;  %v2437_v11 = vld [vmem:[%s5434_s0 + $0x288] sm:$0xff] }
  0x18   :  { %2935 = vmatprep.mubr.msk.f32.mxu0 %vm3568_vm1, %v3569_v6  ;;  %3090 = vmatprep.mubr.msk.f32.mxu1 %vm3568_vm1, %v3569_v6  ;;  %v49_v8 = vld [vmem:[%s5434_s0 + $0xf8] sm:$0xff]  ;;  %v50_v10 = vld [vmem:[%s5434_s0 + $0x100] sm:$0xff]  ;;  %v51_v12 = vld [vmem:[%s5434_s0 + $0x108] sm:$0xff] }
  0x19   :  { %v2438_v13 = vld [vmem:[%s5434_s0 + $0x290] sm:$0xff]  ;;  %v2439_v15 = vld [vmem:[%s5434_s0 + $0x298] sm:$0xff] }
  0x1a   :  { %v52_v14 = vld [vmem:[%s5434_s0 + $0x110] sm:$0xff]  ;;  %v53_v16 = vld [vmem:[%s5434_s0 + $0x118] sm:$0xff] }
  0x1b   :  { %2936 = vmatmul.mubr.msk.f32.gmra.mrb[8].mxu0 %vm67_vm4, %v22_v17  ;;  %3091 = vmatmul.mubr.msk.f32.gmra.mrb[8].mxu1 %vm67_vm4, %v2409_v18  ;;  %v2440_v17 = vld [vmem:[%s5434_s0 + $0x2a0] sm:$0xff] }
  0x1c   :  { %2938 = vmatprep.mubr.msk.f32.mxu0 %vm3568_vm1, %v3569_v6  ;;  %3093 = vmatprep.mubr.msk.f32.mxu1 %vm3568_vm1, %v3569_v6  ;;  %v54_v18 = vld [vmem:[%s5434_s0 + $0x120] sm:$0xff] }
  0x1f   :  { %2939 = vmatmul.mubr.msk.f32.gmra.mrb[10].mxu0 %vm67_vm4, %v23_v19  ;;  %3094 = vmatmul.mubr.msk.f32.gmra.mrb[10].mxu1 %vm67_vm4, %v2410_v20  ;;  %v2441_v19 = vld [vmem:[%s5434_s0 + $0x2a8] sm:$0xff] }
  0x20   :  { %2941 = vmatprep.mubr.msk.f32.mxu0 %vm3568_vm1, %v3569_v6  ;;  %3096 = vmatprep.mubr.msk.f32.mxu1 %vm3568_vm1, %v3569_v6  ;;  %v55_v20 = vld [vmem:[%s5434_s0 + $0x128] sm:$0xff] }
  0x23   :  { %2942 = vmatmul.mubr.msk.f32.gmra.mrb[12].mxu0 %vm67_vm4, %v24_v21  ;;  %3097 = vmatmul.mubr.msk.f32.gmra.mrb[12].mxu1 %vm67_vm4, %v2411_v22  ;;  %v2442_v21 = vld [vmem:[%s5434_s0 + $0x2b0] sm:$0xff] }
  0x24   :  { %2944 = vmatprep.mubr.msk.f32.mxu0 %vm3568_vm1, %v3569_v6  ;;  %3099 = vmatprep.mubr.msk.f32.mxu1 %vm3568_vm1, %v3569_v6  ;;  %v56_v22 = vld [vmem:[%s5434_s0 + $0x130] sm:$0xff] }
  0x27   :  { %2945 = vmatmul.mubr.msk.f32.gmra.mrb[14].mxu0 %vm67_vm4, %v25_v23  ;;  %3100 = vmatmul.mubr.msk.f32.gmra.mrb[14].mxu1 %vm67_vm4, %v2412_v24  ;;  %v2443_v23 = vld [vmem:[%s5434_s0 + $0x2b8] sm:$0xff] }
  0x28   :  { %2947 = vmatprep.mubr.msk.f32.mxu0 %vm3568_vm1, %v3569_v6  ;;  %3102 = vmatprep.mubr.msk.f32.mxu1 %vm3568_vm1, %v3569_v6  ;;  %v57_v24 = vld [vmem:[%s5434_s0 + $0x138] sm:$0xff] }
  0x2b   :  { %2948 = vmatmul.mubr.msk.f32.gmra.mrb[16].mxu0 %vm67_vm4, %v26_v25  ;;  %3103 = vmatmul.mubr.msk.f32.gmra.mrb[16].mxu1 %vm67_vm4, %v2413_v26  ;;  %v2444_v25 = vld [vmem:[%s5434_s0 + $0x2c0] sm:$0xff] }
  0x2c   :  { %2950 = vmatprep.mubr.msk.f32.mxu0 %vm3568_vm1, %v3569_v6  ;;  %3105 = vmatprep.mubr.msk.f32.mxu1 %vm3568_vm1, %v3569_v6  ;;  %v58_v26 = vld [vmem:[%s5434_s0 + $0x140] sm:$0xff] }
  0x2f   :  { %2951 = vmatmul.mubr.msk.f32.gmra.mrb[18].mxu0 %vm67_vm4, %v27_v27  ;;  %3106 = vmatmul.mubr.msk.f32.gmra.mrb[18].mxu1 %vm67_vm4, %v2414_v28  ;;  %v2445_v27 = vld [vmem:[%s5434_s0 + $0x2c8] sm:$0xff] }
  0x30   :  { %2953 = vmatprep.mubr.msk.f32.mxu0 %vm3568_vm1, %v3569_v6  ;;  %3108 = vmatprep.mubr.msk.f32.mxu1 %vm3568_vm1, %v3569_v6  ;;  %v59_v28 = vld [vmem:[%s5434_s0 + $0x148] sm:$0xff] }
  0x33   :  { %2954 = vmatmul.mubr.msk.f32.gmra.mrb[20].mxu0 %vm67_vm4, %v28_v29  ;;  %3109 = vmatmul.mubr.msk.f32.gmra.mrb[20].mxu1 %vm67_vm4, %v2415_v30  ;;  %v2446_v29 = vld [vmem:[%s5434_s0 + $0x2d0] sm:$0xff] }
  0x34   :  { %2956 = vmatprep.mubr.msk.f32.mxu0 %vm3568_vm1, %v3569_v6  ;;  %3111 = vmatprep.mubr.msk.f32.mxu1 %vm3568_vm1, %v3569_v6  ;;  %v60_v30 = vld [vmem:[%s5434_s0 + $0x150] sm:$0xff] }
  0x37   :  { %2957 = vmatmul.mubr.msk.f32.gmra.mrb[22].mxu0 %vm67_vm4, %v29_v31  ;;  %3112 = vmatmul.mubr.msk.f32.gmra.mrb[22].mxu1 %vm67_vm4, %v2416_v32  ;;  %v2447_v31 = vld [vmem:[%s5434_s0 + $0x2d8] sm:$0xff] }
  0x38   :  { %2959 = vmatprep.mubr.msk.f32.mxu0 %vm3568_vm1, %v3569_v6  ;;  %3114 = vmatprep.mubr.msk.f32.mxu1 %vm3568_vm1, %v3569_v6  ;;  %v61_v32 = vld [vmem:[%s5434_s0 + $0x158] sm:$0xff] }
  0x3b   :  { %2960 = vmatmul.mubr.msk.f32.gmra.mrb[24].mxu0 %vm67_vm4, %v30_v33  ;;  %3115 = vmatmul.mubr.msk.f32.gmra.mrb[24].mxu1 %vm67_vm4, %v2417_v34  ;;  %v2448_v33 = vld [vmem:[%s5434_s0 + $0x2e0] sm:$0xff] }
  0x3c   :  { %2962 = vmatprep.mubr.msk.f32.mxu0 %vm3568_vm1, %v3569_v6  ;;  %3117 = vmatprep.mubr.msk.f32.mxu1 %vm3568_vm1, %v3569_v6  ;;  %v62_v34 = vld [vmem:[%s5434_s0 + $0x160] sm:$0xff] }
  0x3f   :  { %2963 = vmatmul.mubr.msk.f32.gmra.mrb[26].mxu0 %vm67_vm4, %v31_v35  ;;  %3118 = vmatmul.mubr.msk.f32.gmra.mrb[26].mxu1 %vm67_vm4, %v2418_v36  ;;  %v2449_v35 = vld [vmem:[%s5434_s0 + $0x2e8] sm:$0xff] }
  0x40   :  { %2965 = vmatprep.mubr.msk.f32.mxu0 %vm3568_vm1, %v3569_v6  ;;  %3120 = vmatprep.mubr.msk.f32.mxu1 %vm3568_vm1, %v3569_v6  ;;  %v63_v36 = vld [vmem:[%s5434_s0 + $0x168] sm:$0xff] }
  0x43   :  { %2966 = vmatmul.mubr.msk.f32.gmra.mrb[28].mxu0 %vm67_vm4, %v32_v37  ;;  %3121 = vmatmul.mubr.msk.f32.gmra.mrb[28].mxu1 %vm67_vm4, %v2419_v38  ;;  %v2450_v37 = vld [vmem:[%s5434_s0 + $0x2f0] sm:$0xff] }
  0x44   :  { %2968 = vmatprep.mubr.msk.f32.mxu0 %vm3568_vm1, %v3569_v6  ;;  %3123 = vmatprep.mubr.msk.f32.mxu1 %vm3568_vm1, %v3569_v6  ;;  %v64_v38 = vld [vmem:[%s5434_s0 + $0x170] sm:$0xff] }
  0x47   :  { %2969 = vmatmul.mubr.msk.f32.gmra.mrb[30].mxu0 %vm67_vm4, %v33_v39  ;;  %3124 = vmatmul.mubr.msk.f32.gmra.mrb[30].mxu1 %vm67_vm4, %v2420_v40  ;;  %v2451_v39 = vld [vmem:[%s5434_s0 + $0x2f8] sm:$0xff] }
  0x48   :  { %2971 = vmatprep.mubr.msk.f32.mxu0 %vm3568_vm1, %v3569_v6  ;;  %3126 = vmatprep.mubr.msk.f32.mxu1 %vm3568_vm1, %v3569_v6  ;;  %v65_v40 = vld [vmem:[%s5434_s0 + $0x178] sm:$0xff] }
  0x4b   :  { %2972 = vmatmul.mubr.msk.f32.gmra.mrb[32].mxu0 %vm67_vm4, %v34_v41  ;;  %3127 = vmatmul.mubr.msk.f32.gmra.mrb[32].mxu1 %vm67_vm4, %v2421_v42  ;;  %v2452_v41 = vld [vmem:[%s5434_s0 + $0x300] sm:$0xff] }
  0x4c   :  { %2974 = vmatprep.mubr.msk.f32.mxu0 %vm3568_vm1, %v3569_v6  ;;  %3129 = vmatprep.mubr.msk.f32.mxu1 %vm3568_vm1, %v3569_v6  ;;  %v66_v42 = vld [vmem:[%s5434_s0 + $0x180] sm:$0xff] }
  0x4f   :  { %2975 = vmatmul.mubr.msk.f32.gmra.mrb[34].mxu0 %vm67_vm4, %v35_v43  ;;  %3130 = vmatmul.mubr.msk.f32.gmra.mrb[34].mxu1 %vm67_vm4, %v2422_v44  ;;  %v2453_v43 = vld [vmem:[%s5434_s0 + $0x308] sm:$0xff]  ;;  %v2504_v44 = vld [vmem:[%s5434_s0 + $0x310] sm:$0xff] }
  0x50   :  { %2977 = vmatprep.mubr.msk.f32.mxu0 %vm3568_vm1, %v3569_v6  ;;  %3132 = vmatprep.mubr.msk.f32.mxu1 %vm3568_vm1, %v3569_v6 }
  0x53   :  { %2978 = vmatmul.mubr.msk.f32.gmra.mrb[36].mxu0 %vm67_vm4, %v36_v45  ;;  %3133 = vmatmul.mubr.msk.f32.gmra.mrb[36].mxu1 %vm67_vm4, %v2423_v46  ;;  %v2603_v45 = vld [vmem:[%s5434_s0 + $0x498] sm:$0xff] }
  0x54   :  { %2980 = vmatprep.mubr.msk.f32.mxu0 %vm3568_vm1, %v3569_v6  ;;  %3135 = vmatprep.mubr.msk.f32.mxu1 %vm3568_vm1, %v3569_v6  ;;  %v2505_v46 = vld [vmem:[%s5434_s0 + $0x318] sm:$0xff] }
  0x57   :  { %2981 = vmatmul.mubr.msk.f32.gmra.mrb[38].mxu0 %vm67_vm4, %v37_v47  ;;  %3136 = vmatmul.mubr.msk.f32.gmra.mrb[38].mxu1 %vm67_vm4, %v2424_v48  ;;  %v2604_v47 = vld [vmem:[%s5434_s0 + $0x4a0] sm:$0xff] }
  0x58   :  { %2983 = vmatprep.mubr.msk.f32.mxu0 %vm3568_vm1, %v3569_v6  ;;  %3138 = vmatprep.mubr.msk.f32.mxu1 %vm3568_vm1, %v3569_v6  ;;  %v2506_v48 = vld [vmem:[%s5434_s0 + $0x320] sm:$0xff] }
  0x5b   :  { %2984 = vmatmul.mubr.msk.f32.gmra.mrb[40].mxu0 %vm67_vm4, %v38_v49  ;;  %3139 = vmatmul.mubr.msk.f32.gmra.mrb[40].mxu1 %vm67_vm4, %v2425_v50  ;;  %v2605_v49 = vld [vmem:[%s5434_s0 + $0x4a8] sm:$0xff] }
  0x5c   :  { %2986 = vmatprep.mubr.msk.f32.mxu0 %vm3568_vm1, %v3569_v6  ;;  %3141 = vmatprep.mubr.msk.f32.mxu1 %vm3568_vm1, %v3569_v6  ;;  %v2507_v50 = vld [vmem:[%s5434_s0 + $0x328] sm:$0xff] }
  0x5f   :  { %2987 = vmatmul.mubr.msk.f32.gmra.mrb[42].mxu0 %vm67_vm4, %v39_v51  ;;  %3142 = vmatmul.mubr.msk.f32.gmra.mrb[42].mxu1 %vm67_vm4, %v2426_v52  ;;  %v2606_v51 = vld [vmem:[%s5434_s0 + $0x4b0] sm:$0xff] }
  0x60   :  { %2989 = vmatprep.mubr.msk.f32.mxu0 %vm3568_vm1, %v3569_v6  ;;  %3144 = vmatprep.mubr.msk.f32.mxu1 %vm3568_vm1, %v3569_v6  ;;  %v2508_v52 = vld [vmem:[%s5434_s0 + $0x330] sm:$0xff] }
  0x63   :  { %2990 = vmatmul.mubr.msk.f32.gmra.mrb[44].mxu0 %vm67_vm4, %v40_v53  ;;  %3145 = vmatmul.mubr.msk.f32.gmra.mrb[44].mxu1 %vm67_vm4, %v2427_v54  ;;  %v2607_v53 = vld [vmem:[%s5434_s0 + $0x4b8] sm:$0xff] }
  0x64   :  { %2992 = vmatprep.mubr.msk.f32.mxu0 %vm3568_vm1, %v3569_v6  ;;  %3147 = vmatprep.mubr.msk.f32.mxu1 %vm3568_vm1, %v3569_v6 }
  0x67   :  { %2993 = vmatmul.mubr.msk.f32.gmra.mrb[46].mxu0 %vm67_vm4, %v41_v55  ;;  %3148 = vmatmul.mubr.msk.f32.gmra.mrb[46].mxu1 %vm67_vm4, %v2428_v56 }
  0x68   :  { %2995 = vmatprep.mubr.msk.f32.mxu0 %vm3568_vm1, %v3569_v6  ;;  %3150 = vmatprep.mubr.msk.f32.mxu1 %vm3568_vm1, %v3569_v6 }
  0x6b   :  { %2996 = vmatmul.mubr.msk.f32.gmra.mrb[48].mxu0 %vm67_vm4, %v42_v57  ;;  %3151 = vmatmul.mubr.msk.f32.gmra.mrb[48].mxu1 %vm67_vm4, %v2429_v58 }
  0x6c   :  { %2998 = vmatprep.mubr.msk.f32.mxu0 %vm3568_vm1, %v3569_v6  ;;  %3153 = vmatprep.mubr.msk.f32.mxu1 %vm3568_vm1, %v3569_v6 }
  0x6f   :  { %2999 = vmatmul.mubr.msk.f32.gmra.mrb[50].mxu0 %vm67_vm4, %v43_v59  ;;  %3154 = vmatmul.mubr.msk.f32.gmra.mrb[50].mxu1 %vm67_vm4, %v2430_v60  ;;  %v2509_v59 = vld [vmem:[%s5434_s0 + $0x338] sm:$0xff]  ;;  %v2608_v60 = vld [vmem:[%s5434_s0 + $0x4c0] sm:$0xff] }
  0x70   :  { %3001 = vmatprep.mubr.msk.f32.mxu0 %vm3568_vm1, %v3569_v6  ;;  %3156 = vmatprep.mubr.msk.f32.mxu1 %vm3568_vm1, %v3569_v6 }
  0x73   :  { %3002 = vmatmul.mubr.msk.f32.gmra.mrb[52].mxu0 %vm67_vm4, %v44_v61  ;;  %3157 = vmatmul.mubr.msk.f32.gmra.mrb[52].mxu1 %vm67_vm4, %v2431_v62 }
  0x74   :  { %3004 = vmatprep.mubr.msk.f32.mxu0 %vm3568_vm1, %v3569_v6  ;;  %3159 = vmatprep.mubr.msk.f32.mxu1 %vm3568_vm1, %v3569_v6 }
  0x77   :  { %3005 = vmatmul.mubr.msk.f32.gmra.mrb[54].mxu0 %vm67_vm4, %v45_v63  ;;  %3160 = vmatmul.mubr.msk.f32.gmra.mrb[54].mxu1 %vm67_vm4, %v2432_v0  ;;  %v2536_v63 = vld [vmem:[%s5434_s0 + $0x410] sm:$0xff] }
  0x78   :  { %3007 = vmatprep.mubr.msk.f32.mxu0 %vm3568_vm1, %v3569_v6  ;;  %3162 = vmatprep.mubr.msk.f32.mxu1 %vm3568_vm1, %v3569_v6 }
  0x7b   :  { %3008 = vmatmul.mubr.msk.f32.gmra.mrb[56].mxu0 %vm67_vm4, %v46_v1  ;;  %3163 = vmatmul.mubr.msk.f32.gmra.mrb[56].mxu1 %vm67_vm4, %v2433_v2  ;;  %v2510_v2 = vld [vmem:[%s5434_s0 + $0x340] sm:$0xff] }
  0x7c   :  { %3010 = vmatprep.mubr.msk.f32.mxu0 %vm3568_vm1, %v3569_v6  ;;  %3165 = vmatprep.mubr.msk.f32.mxu1 %vm3568_vm1, %v3569_v6 }
  0x7f   :  { %3011 = vmatmul.mubr.msk.f32.gmra.mrb[58].mxu0 %vm67_vm4, %v47_v3  ;;  %3166 = vmatmul.mubr.msk.f32.gmra.mrb[58].mxu1 %vm67_vm4, %v2434_v4  ;;  %v2609_v3 = vld [vmem:[%s5434_s0 + $0x4c8] sm:$0xff] }
  0x80   :  { %3013 = vmatprep.mubr.msk.f32.mxu0 %vm3568_vm1, %v3569_v6  ;;  %3168 = vmatprep.mubr.msk.f32.mxu1 %vm3568_vm1, %v3569_v6 }
  0x83   :  { %3014 = vmatmul.mubr.msk.f32.gmra.mrb[60].mxu0 %vm67_vm4, %v48_v5  ;;  %3169 = vmatmul.mubr.msk.f32.gmra.mrb[60].mxu1 %vm67_vm4, %v2435_v7 }
  0x84   :  { %3016 = vmatprep.mubr.msk.f32.mxu0 %vm3568_vm1, %v3569_v6  ;;  %3171 = vmatprep.mubr.msk.f32.mxu1 %vm3568_vm1, %v3569_v6 }
  0x87   :  { %3017 = vmatmul.mubr.msk.f32.gmra.mrb[62].mxu0 %vm67_vm4, %v49_v8  ;;  %3172 = vmatmul.mubr.msk.f32.gmra.mrb[62].mxu1 %vm67_vm4, %v2436_v9 }
  0x88   :  { %3019 = vmatprep.mubr.msk.f32.mxu0 %vm3568_vm1, %v3569_v6  ;;  %3174 = vmatprep.mubr.msk.f32.mxu1 %vm3568_vm1, %v3569_v6 }
  0x8b   :  { %3020 = vmatmul.mubr.msk.f32.gmra.mrb[64].mxu0 %vm67_vm4, %v50_v10  ;;  %3175 = vmatmul.mubr.msk.f32.gmra.mrb[64].mxu1 %vm67_vm4, %v2437_v11  ;;  %v2511_v10 = vld [vmem:[%s5434_s0 + $0x348] sm:$0xff]  ;;  %v2610_v11 = vld [vmem:[%s5434_s0 + $0x4d0] sm:$0xff] }
  0x8c   :  { %3022 = vmatprep.mubr.msk.f32.mxu0 %vm3568_vm1, %v3569_v6  ;;  %3177 = vmatprep.mubr.msk.f32.mxu1 %vm3568_vm1, %v3569_v6 }
  0x8f   :  { %3023 = vmatmul.mubr.msk.f32.gmra.mrb[66].mxu0 %vm67_vm4, %v51_v12  ;;  %3178 = vmatmul.mubr.msk.f32.gmra.mrb[66].mxu1 %vm67_vm4, %v2438_v13 }
  0x90   :  { %3025 = vmatprep.mubr.msk.f32.mxu0 %vm3568_vm1, %v3569_v6  ;;  %3180 = vmatprep.mubr.msk.f32.mxu1 %vm3568_vm1, %v3569_v6 }
  0x93   :  { %3026 = vmatmul.mubr.msk.f32.gmra.mrb[68].mxu0 %vm67_vm4, %v52_v14  ;;  %3181 = vmatmul.mubr.msk.f32.gmra.mrb[68].mxu1 %vm67_vm4, %v2439_v15  ;;  %v2535_v14 = vld [vmem:[%s5434_s0 + $0x408] sm:$0xff] }
  0x94   :  { %3028 = vmatprep.mubr.msk.f32.mxu0 %vm3568_vm1, %v3569_v6  ;;  %3183 = vmatprep.mubr.msk.f32.mxu1 %vm3568_vm1, %v3569_v6 }
  0x97   :  { %3029 = vmatmul.mubr.msk.f32.gmra.mrb[70].mxu0 %vm67_vm4, %v53_v16  ;;  %3184 = vmatmul.mubr.msk.f32.gmra.mrb[70].mxu1 %vm67_vm4, %v2440_v17  ;;  %v2512_v17 = vld [vmem:[%s5434_s0 + $0x350] sm:$0xff] }
  0x98   :  { %3031 = vmatprep.mubr.msk.f32.mxu0 %vm3568_vm1, %v3569_v6  ;;  %3186 = vmatprep.mubr.msk.f32.mxu1 %vm3568_vm1, %v3569_v6 }
  0x9b   :  { %3032 = vmatmul.mubr.msk.f32.gmra.mrb[72].mxu0 %vm67_vm4, %v54_v18  ;;  %3187 = vmatmul.mubr.msk.f32.gmra.mrb[72].mxu1 %vm67_vm4, %v2441_v19  ;;  %v2611_v18 = vld [vmem:[%s5434_s0 + $0x4d8] sm:$0xff] }
  0x9c   :  { %3034 = vmatprep.mubr.msk.f32.mxu0 %vm3568_vm1, %v3569_v6  ;;  %3189 = vmatprep.mubr.msk.f32.mxu1 %vm3568_vm1, %v3569_v6 }
  0x9f   :  { %3035 = vmatmul.mubr.msk.f32.gmra.mrb[74].mxu0 %vm67_vm4, %v55_v20  ;;  %3190 = vmatmul.mubr.msk.f32.gmra.mrb[74].mxu1 %vm67_vm4, %v2442_v21 }
  0xa0   :  { %3037 = vmatprep.mubr.msk.f32.mxu0 %vm3568_vm1, %v3569_v6  ;;  %3192 = vmatprep.mubr.msk.f32.mxu1 %vm3568_vm1, %v3569_v6 }
  0xa3   :  { %3038 = vmatmul.mubr.msk.f32.gmra.mrb[76].mxu0 %vm67_vm4, %v56_v22  ;;  %3193 = vmatmul.mubr.msk.f32.gmra.mrb[76].mxu1 %vm67_vm4, %v2443_v23 }
  0xa4   :  { %3040 = vmatprep.mubr.msk.f32.mxu0 %vm3568_vm1, %v3569_v6  ;;  %3195 = vmatprep.mubr.msk.f32.mxu1 %vm3568_vm1, %v3569_v6 }
  0xa7   :  { %3041 = vmatmul.mubr.msk.f32.gmra.mrb[78].mxu0 %vm67_vm4, %v57_v24  ;;  %3196 = vmatmul.mubr.msk.f32.gmra.mrb[78].mxu1 %vm67_vm4, %v2444_v25  ;;  %v2513_v24 = vld [vmem:[%s5434_s0 + $0x358] sm:$0xff]  ;;  %v2612_v25 = vld [vmem:[%s5434_s0 + $0x4e0] sm:$0xff] }
  0xa8   :  { %3043 = vmatprep.mubr.msk.f32.mxu0 %vm3568_vm1, %v3569_v6  ;;  %3198 = vmatprep.mubr.msk.f32.mxu1 %vm3568_vm1, %v3569_v6 }
  0xab   :  { %3044 = vmatmul.mubr.msk.f32.gmra.mrb[80].mxu0 %vm67_vm4, %v58_v26  ;;  %3199 = vmatmul.mubr.msk.f32.gmra.mrb[80].mxu1 %vm67_vm4, %v2445_v27 }
  0xac   :  { %3046 = vmatprep.mubr.msk.f32.mxu0 %vm3568_vm1, %v3569_v6  ;;  %3201 = vmatprep.mubr.msk.f32.mxu1 %vm3568_vm1, %v3569_v6 }
  0xaf   :  { %3047 = vmatmul.mubr.msk.f32.gmra.mrb[82].mxu0 %vm67_vm4, %v59_v28  ;;  %3202 = vmatmul.mubr.msk.f32.gmra.mrb[82].mxu1 %vm67_vm4, %v2446_v29  ;;  %v2534_v28 = vld [vmem:[%s5434_s0 + $0x400] sm:$0xff] }
  0xb0   :  { %3049 = vmatprep.mubr.msk.f32.mxu0 %vm3568_vm1, %v3569_v6  ;;  %3204 = vmatprep.mubr.msk.f32.mxu1 %vm3568_vm1, %v3569_v6 }
  0xb3   :  { %3050 = vmatmul.mubr.msk.f32.gmra.mrb[84].mxu0 %vm67_vm4, %v60_v30  ;;  %3205 = vmatmul.mubr.msk.f32.gmra.mrb[84].mxu1 %vm67_vm4, %v2447_v31  ;;  %v2514_v31 = vld [vmem:[%s5434_s0 + $0x360] sm:$0xff] }
  0xb4   :  { %3052 = vmatprep.mubr.msk.f32.mxu0 %vm3568_vm1, %v3569_v6  ;;  %3207 = vmatprep.mubr.msk.f32.mxu1 %vm3568_vm1, %v3569_v6 }
  0xb7   :  { %3053 = vmatmul.mubr.msk.f32.gmra.mrb[86].mxu0 %vm67_vm4, %v61_v32  ;;  %3208 = vmatmul.mubr.msk.f32.gmra.mrb[86].mxu1 %vm67_vm4, %v2448_v33  ;;  %v2613_v32 = vld [vmem:[%s5434_s0 + $0x4e8] sm:$0xff] }
  0xb8   :  { %3055 = vmatprep.mubr.msk.f32.mxu0 %vm3568_vm1, %v3569_v6  ;;  %3210 = vmatprep.mubr.msk.f32.mxu1 %vm3568_vm1, %v3569_v6 }
  0xbb   :  { %3056 = vmatmul.mubr.msk.f32.gmra.mrb[88].mxu0 %vm67_vm4, %v62_v34  ;;  %3211 = vmatmul.mubr.msk.f32.gmra.mrb[88].mxu1 %vm67_vm4, %v2449_v35 }
  0xbc   :  { %3058 = vmatprep.mubr.msk.f32.mxu0 %vm3568_vm1, %v3569_v6  ;;  %3213 = vmatprep.mubr.msk.f32.mxu1 %vm3568_vm1, %v3569_v6 }
  0xbf   :  { %3059 = vmatmul.mubr.msk.f32.gmra.mrb[90].mxu0 %vm67_vm4, %v63_v36  ;;  %3214 = vmatmul.mubr.msk.f32.gmra.mrb[90].mxu1 %vm67_vm4, %v2450_v37 }
  0xc0   :  { %3061 = vmatprep.mubr.msk.f32.mxu0 %vm3568_vm1, %v3569_v6  ;;  %3216 = vmatprep.mubr.msk.f32.mxu1 %vm3568_vm1, %v3569_v6 }
  0xc3   :  { %3062 = vmatmul.mubr.msk.f32.gmra.mrb[92].mxu0 %vm67_vm4, %v64_v38  ;;  %3217 = vmatmul.mubr.msk.f32.gmra.mrb[92].mxu1 %vm67_vm4, %v2451_v39  ;;  %v2515_v38 = vld [vmem:[%s5434_s0 + $0x368] sm:$0xff]  ;;  %v2614_v39 = vld [vmem:[%s5434_s0 + $0x4f0] sm:$0xff] }
  0xc4   :  { %3064 = vmatprep.mubr.msk.f32.mxu0 %vm3568_vm1, %v3569_v6  ;;  %3219 = vmatprep.mubr.msk.f32.mxu1 %vm3568_vm1, %v3569_v6 }
  0xc7   :  { %3065 = vmatmul.mubr.msk.f32.gmra.mrb[94].mxu0 %vm67_vm4, %v65_v40  ;;  %3220 = vmatmul.mubr.msk.f32.gmra.mrb[94].mxu1 %vm67_vm4, %v2452_v41 }
  0xc8   :  { %3067 = vmatprep.mubr.msk.f32.mxu0 %vm3568_vm1, %v3569_v6  ;;  %3222 = vmatprep.mubr.msk.f32.mxu1 %vm3568_vm1, %v3569_v6 }
  0xcb   :  { %3068 = vmatmul.mubr.msk.f32.gmra.mrb[96].mxu0 %vm67_vm4, %v66_v42  ;;  %3223 = vmatmul.mubr.msk.f32.gmra.mrb[96].mxu1 %vm67_vm4, %v2453_v43  ;;  %v2533_v42 = vld [vmem:[%s5434_s0 + $0x3f8] sm:$0xff] }
  0xcc   :  { %3233 = vmatprep.mubr.msk.f32.mxu0 %vm3568_vm1, %v3569_v6  ;;  %3388 = vmatprep.mubr.msk.f32.mxu1 %vm3568_vm1, %v3569_v6 }
  0xcf   :  { %3234 = vmatmul.mubr.msk.f32.vlgmr.msra.gmra.mrb[98].mxu0 %vm67_vm4, %v2504_v44  ;;  %3389 = vmatmul.mubr.msk.f32.vlgmr.msra.gmra.mrb[98].mxu1 %vm67_vm4, %v2603_v45  ;;  %v2516_v45 = vld [vmem:[%s5434_s0 + $0x370] sm:$0xff] }
  0xd0   :  { %3236 = vmatprep.mubr.msk.f32.mxu0 %vm3568_vm1, %v3569_v6  ;;  %3391 = vmatprep.mubr.msk.f32.mxu1 %vm3568_vm1, %v3569_v6 }
  0xd3   :  { %3237 = vmatmul.mubr.msk.f32.gmra.mrb[100].mxu0 %vm67_vm4, %v2505_v46  ;;  %3392 = vmatmul.mubr.msk.f32.gmra.mrb[100].mxu1 %vm67_vm4, %v2604_v47  ;;  %v2615_v46 = vld [vmem:[%s5434_s0 + $0x4f8] sm:$0xff] }
  0xd4   :  { %3239 = vmatprep.mubr.msk.f32.mxu0 %vm3568_vm1, %v3569_v6  ;;  %3394 = vmatprep.mubr.msk.f32.mxu1 %vm3568_vm1, %v3569_v6 }
  0xd7   :  { %3240 = vmatmul.mubr.msk.f32.gmra.mrb[102].mxu0 %vm67_vm4, %v2506_v48  ;;  %3395 = vmatmul.mubr.msk.f32.gmra.mrb[102].mxu1 %vm67_vm4, %v2605_v49 }
  0xd8   :  { %3242 = vmatprep.mubr.msk.f32.mxu0 %vm3568_vm1, %v3569_v6  ;;  %3397 = vmatprep.mubr.msk.f32.mxu1 %vm3568_vm1, %v3569_v6 }
  0xdb   :  { %3243 = vmatmul.mubr.msk.f32.gmra.mrb[104].mxu0 %vm67_vm4, %v2507_v50  ;;  %3398 = vmatmul.mubr.msk.f32.gmra.mrb[104].mxu1 %vm67_vm4, %v2606_v51 }
  0xdc   :  { %3245 = vmatprep.mubr.msk.f32.mxu0 %vm3568_vm1, %v3569_v6  ;;  %3400 = vmatprep.mubr.msk.f32.mxu1 %vm3568_vm1, %v3569_v6 }
  0xde   :  { %v4261_v54 = vpop.f32.mrb[0].mxu0  ;;  %v4263_v55 = vpop.f32.mrb[0].mxu1 }
  0xdf   :  { %v2925_v57 = vpop.f32.mrb[1].mxu0  ;;  %v3080_v58 = vpop.f32.mrb[1].mxu1  ;;  %3246 = vmatmul.mubr.msk.f32.gmra.mrb[106].mxu0 %vm67_vm4, %v2508_v52  ;;  %3401 = vmatmul.mubr.msk.f32.gmra.mrb[106].mxu1 %vm67_vm4, %v2607_v53  ;;  %v2517_v52 = vld [vmem:[%s5434_s0 + $0x378] sm:$0xff]  ;;  %v2616_v53 = vld [vmem:[%s5434_s0 + $0x500] sm:$0xff] }
  0xe0   :  { %3248 = vmatprep.mubr.msk.f32.mxu0 %vm3568_vm1, %v3569_v6  ;;  %3403 = vmatprep.mubr.msk.f32.mxu1 %vm3568_vm1, %v3569_v6 }
  0xe2   :  { %v4279_v61 = vpop.f32.mrb[2].mxu0  ;;  %v4281_v62 = vpop.f32.mrb[2].mxu1 }
  0xe3   :  { %v2928_v0 = vpop.f32.mrb[3].mxu0  ;;  %v3083_v1 = vpop.f32.mrb[3].mxu1  ;;  %3249 = vmatmul.mubr.msk.f32.gmra.mrb[108].mxu0 %vm67_vm4, %v2509_v59  ;;  %3404 = vmatmul.mubr.msk.f32.gmra.mrb[108].mxu1 %vm67_vm4, %v2608_v60  ;;  %v2532_v59 = vld [vmem:[%s5434_s0 + $0x3f0] sm:$0xff] }
  0xe4   :  { %3251 = vmatprep.mubr.msk.f32.mxu0 %vm3568_vm1, %v3569_v6  ;;  %3406 = vmatprep.mubr.msk.f32.mxu1 %vm3568_vm1, %v3569_v6  ;;  %v2518_v1 = vld [vmem:[%s5434_s0 + $0x380] sm:$0xff] }
  0xe6   :  { %v4297_v4 = vpop.f32.mrb[4].mxu0  ;;  %v4299_v5 = vpop.f32.mrb[4].mxu1 }
  0xe7   :  { %v2931_v8 = vpop.f32.mrb[5].mxu0  ;;  %v3086_v9 = vpop.f32.mrb[5].mxu1  ;;  %3252 = vmatmul.mubr.msk.f32.gmra.mrb[110].mxu0 %vm67_vm4, %v2510_v2  ;;  %3407 = vmatmul.mubr.msk.f32.gmra.mrb[110].mxu1 %vm67_vm4, %v2609_v3  ;;  %v2617_v2 = vld [vmem:[%s5434_s0 + $0x508] sm:$0xff] }
  0xe8   :  { %3254 = vmatprep.mubr.msk.f32.mxu0 %vm3568_vm1, %v3569_v6  ;;  %3409 = vmatprep.mubr.msk.f32.mxu1 %vm3568_vm1, %v3569_v6 }
  0xea   :  { %v4315_v12 = vpop.f32.mrb[6].mxu0  ;;  %v4317_v13 = vpop.f32.mrb[6].mxu1 }
  0xeb   :  { %v2934_v15 = vpop.f32.mrb[7].mxu0  ;;  %v3089_v16 = vpop.f32.mrb[7].mxu1  ;;  %3255 = vmatmul.mubr.msk.f32.gmra.mrb[112].mxu0 %vm67_vm4, %v2511_v10  ;;  %3410 = vmatmul.mubr.msk.f32.gmra.mrb[112].mxu1 %vm67_vm4, %v2610_v11 }
  0xec   :  { %3257 = vmatprep.mubr.msk.f32.mxu0 %vm3568_vm1, %v3569_v6  ;;  %3412 = vmatprep.mubr.msk.f32.mxu1 %vm3568_vm1, %v3569_v6  ;;  %v2519_v15 = vld [vmem:[%s5434_s0 + $0x388] sm:$0xff]  ;;  %v2618_v16 = vld [vmem:[%s5434_s0 + $0x510] sm:$0xff] }
  0xee   :  { %v4333_v19 = vpop.f32.mrb[8].mxu0  ;;  %v4335_v20 = vpop.f32.mrb[8].mxu1 }
  0xef   :  { %v2937_v22 = vpop.f32.mrb[9].mxu0  ;;  %v3092_v23 = vpop.f32.mrb[9].mxu1  ;;  %3258 = vmatmul.mubr.msk.f32.gmra.mrb[114].mxu0 %vm67_vm4, %v2512_v17  ;;  %3413 = vmatmul.mubr.msk.f32.gmra.mrb[114].mxu1 %vm67_vm4, %v2611_v18 }
  0xf0   :  { %3260 = vmatprep.mubr.msk.f32.mxu0 %vm3568_vm1, %v3569_v6  ;;  %3415 = vmatprep.mubr.msk.f32.mxu1 %vm3568_vm1, %v3569_v6  ;;  %v2531_v22 = vld [vmem:[%s5434_s0 + $0x3e8] sm:$0xff] }
  0xf2   :  { %v4351_v26 = vpop.f32.mrb[10].mxu0  ;;  %v4353_v27 = vpop.f32.mrb[10].mxu1 }
  0xf3   :  { %v2940_v29 = vpop.f32.mrb[11].mxu0  ;;  %v3095_v30 = vpop.f32.mrb[11].mxu1  ;;  %3261 = vmatmul.mubr.msk.f32.gmra.mrb[116].mxu0 %vm67_vm4, %v2513_v24  ;;  %3416 = vmatmul.mubr.msk.f32.gmra.mrb[116].mxu1 %vm67_vm4, %v2612_v25  ;;  %v2520_v25 = vld [vmem:[%s5434_s0 + $0x390] sm:$0xff] }
  0xf4   :  { %3263 = vmatprep.mubr.msk.f32.mxu0 %vm3568_vm1, %v3569_v6  ;;  %3418 = vmatprep.mubr.msk.f32.mxu1 %vm3568_vm1, %v3569_v6  ;;  %v2619_v29 = vld [vmem:[%s5434_s0 + $0x518] sm:$0xff] }
  0xf6   :  { %v4369_v33 = vpop.f32.mrb[12].mxu0  ;;  %v4371_v34 = vpop.f32.mrb[12].mxu1 }
  0xf7   :  { %v2943_v36 = vpop.f32.mrb[13].mxu0  ;;  %v3098_v37 = vpop.f32.mrb[13].mxu1  ;;  %3264 = vmatmul.mubr.msk.f32.gmra.mrb[118].mxu0 %vm67_vm4, %v2514_v31  ;;  %3419 = vmatmul.mubr.msk.f32.gmra.mrb[118].mxu1 %vm67_vm4, %v2613_v32 }
  0xf8   :  { %3266 = vmatprep.mubr.msk.f32.mxu0 %vm3568_vm1, %v3569_v6  ;;  %3421 = vmatprep.mubr.msk.f32.mxu1 %vm3568_vm1, %v3569_v6 }
  0xfa   :  { %v4387_v40 = vpop.f32.mrb[14].mxu0  ;;  %v4389_v41 = vpop.f32.mrb[14].mxu1 }
  0xfb   :  { %v2946_v43 = vpop.f32.mrb[15].mxu0  ;;  %v3101_v44 = vpop.f32.mrb[15].mxu1  ;;  %3267 = vmatmul.mubr.msk.f32.gmra.mrb[120].mxu0 %vm67_vm4, %v2515_v38  ;;  %3422 = vmatmul.mubr.msk.f32.gmra.mrb[120].mxu1 %vm67_vm4, %v2614_v39  ;;  %v2521_v38 = vld [vmem:[%s5434_s0 + $0x398] sm:$0xff]  ;;  %v2620_v39 = vld [vmem:[%s5434_s0 + $0x520] sm:$0xff] }
  0xfc   :  { %3269 = vmatprep.mubr.msk.f32.mxu0 %vm3568_vm1, %v3569_v6  ;;  %3424 = vmatprep.mubr.msk.f32.mxu1 %vm3568_vm1, %v3569_v6 }
  0xfe   :  { %v4405_v47 = vpop.f32.mrb[16].mxu0  ;;  %v4407_v48 = vpop.f32.mrb[16].mxu1 }
  0xff   :  { %v2949_v50 = vpop.f32.mrb[17].mxu0  ;;  %v3104_v51 = vpop.f32.mrb[17].mxu1  ;;  %3270 = vmatmul.mubr.msk.f32.gmra.mrb[122].mxu0 %vm67_vm4, %v2516_v45  ;;  %3425 = vmatmul.mubr.msk.f32.gmra.mrb[122].mxu1 %vm67_vm4, %v2615_v46  ;;  %v2530_v45 = vld [vmem:[%s5434_s0 + $0x3e0] sm:$0xff] }
 0x100   :  { %3272 = vmatprep.mubr.msk.f32.mxu0 %vm3568_vm1, %v3569_v6  ;;  %3427 = vmatprep.mubr.msk.f32.mxu1 %vm3568_vm1, %v3569_v6  ;;  %v2522_v51 = vld [vmem:[%s5434_s0 + $0x3a0] sm:$0xff] }
 0x102   :  { %v4423_v57 = vpop.f32.mrb[18].mxu0  ;;  %v4425_v58 = vpop.f32.mrb[18].mxu1 }
 0x103   :  { %v2952_v60 = vpop.f32.mrb[19].mxu0  ;;  %v3107_v0 = vpop.f32.mrb[19].mxu1  ;;  %3273 = vmatmul.mubr.msk.f32.gmra.mrb[124].mxu0 %vm67_vm4, %v2517_v52  ;;  %3428 = vmatmul.mubr.msk.f32.gmra.mrb[124].mxu1 %vm67_vm4, %v2616_v53  ;;  %v2621_v52 = vld [vmem:[%s5434_s0 + $0x528] sm:$0xff] }
 0x104   :  { %3275 = vmatprep.mubr.msk.f32.mxu0 %vm3568_vm1, %v3569_v6  ;;  %3430 = vmatprep.mubr.msk.f32.mxu1 %vm3568_vm1, %v3569_v6 }
 0x106   :  { %v4441_v3 = vpop.f32.mrb[20].mxu0  ;;  %v4443_v8 = vpop.f32.mrb[20].mxu1 }
 0x107   :  { %v2955_v10 = vpop.f32.mrb[21].mxu0  ;;  %v3110_v11 = vpop.f32.mrb[21].mxu1  ;;  %3276 = vmatmul.mubr.msk.f32.gmra.mrb[126].mxu0 %vm67_vm4, %v2518_v1  ;;  %3431 = vmatmul.mubr.msk.f32.gmra.mrb[126].mxu1 %vm67_vm4, %v2617_v2 }
 0x108   :  { %3278 = vmatprep.mubr.msk.f32.mxu0 %vm3568_vm1, %v3569_v6  ;;  %3433 = vmatprep.mubr.msk.f32.mxu1 %vm3568_vm1, %v3569_v6  ;;  %v2523_v10 = vld [vmem:[%s5434_s0 + $0x3a8] sm:$0xff]  ;;  %v2622_v11 = vld [vmem:[%s5434_s0 + $0x530] sm:$0xff] }
 0x10a   :  { %v4459_v17 = vpop.f32.mrb[22].mxu0  ;;  %v4461_v18 = vpop.f32.mrb[22].mxu1 }
 0x10b   :  { %v2958_v23 = vpop.f32.mrb[23].mxu0  ;;  %v3113_v24 = vpop.f32.mrb[23].mxu1  ;;  %3279 = vmatmul.mubr.msk.f32.gmra.mrb[128].mxu0 %vm67_vm4, %v2519_v15  ;;  %3434 = vmatmul.mubr.msk.f32.gmra.mrb[128].mxu1 %vm67_vm4, %v2618_v16 }
 0x10c   :  { %3281 = vmatprep.mubr.msk.f32.mxu0 %vm3568_vm1, %v3569_v6  ;;  %3436 = vmatprep.mubr.msk.f32.mxu1 %vm3568_vm1, %v3569_v6  ;;  %v2529_v23 = vld [vmem:[%s5434_s0 + $0x3d8] sm:$0xff] }
 0x10e   :  { %v4477_v30 = vpop.f32.mrb[24].mxu0  ;;  %v4479_v31 = vpop.f32.mrb[24].mxu1 }
 0x10f   :  { %v2961_v36 = vpop.f32.mrb[25].mxu0  ;;  %v3116_v37 = vpop.f32.mrb[25].mxu1  ;;  %3282 = vmatmul.mubr.msk.f32.gmra.mrb[130].mxu0 %vm67_vm4, %v2520_v25  ;;  %3437 = vmatmul.mubr.msk.f32.gmra.mrb[130].mxu1 %vm67_vm4, %v2619_v29  ;;  %v2524_v29 = vld [vmem:[%s5434_s0 + $0x3b0] sm:$0xff] }
 0x110   :  { %3284 = vmatprep.mubr.msk.f32.mxu0 %vm3568_vm1, %v3569_v6  ;;  %3439 = vmatprep.mubr.msk.f32.mxu1 %vm3568_vm1, %v3569_v6  ;;  %v2623_v36 = vld [vmem:[%s5434_s0 + $0x538] sm:$0xff] }
 0x112   :  { %v4495_v43 = vpop.f32.mrb[26].mxu0  ;;  %v4497_v44 = vpop.f32.mrb[26].mxu1 }
 0x113   :  { %v2964_v46 = vpop.f32.mrb[27].mxu0  ;;  %v3119_v50 = vpop.f32.mrb[27].mxu1  ;;  %3285 = vmatmul.mubr.msk.f32.gmra.mrb[132].mxu0 %vm67_vm4, %v2521_v38  ;;  %3440 = vmatmul.mubr.msk.f32.gmra.mrb[132].mxu1 %vm67_vm4, %v2620_v39 }
 0x114   :  { %3287 = vmatprep.mubr.msk.f32.mxu0 %vm3568_vm1, %v3569_v6  ;;  %3442 = vmatprep.mubr.msk.f32.mxu1 %vm3568_vm1, %v3569_v6 }
 0x116   :  { %v4513_v53 = vpop.f32.mrb[28].mxu0  ;;  %v4515_v60 = vpop.f32.mrb[28].mxu1 }
 0x117   :  { %v2967_v1 = vpop.f32.mrb[29].mxu0  ;;  %v3122_v2 = vpop.f32.mrb[29].mxu1  ;;  %3288 = vmatmul.mubr.msk.f32.gmra.mrb[134].mxu0 %vm67_vm4, %v2522_v51  ;;  %3443 = vmatmul.mubr.msk.f32.gmra.mrb[134].mxu1 %vm67_vm4, %v2621_v52  ;;  %v2525_v51 = vld [vmem:[%s5434_s0 + $0x3b8] sm:$0xff]  ;;  %v2624_v52 = vld [vmem:[%s5434_s0 + $0x540] sm:$0xff] }
 0x118   :  { %3290 = vmatprep.mubr.msk.f32.mxu0 %vm3568_vm1, %v3569_v6  ;;  %3445 = vmatprep.mubr.msk.f32.mxu1 %vm3568_vm1, %v3569_v6 }
 0x11a   :  { %v4531_v15 = vpop.f32.mrb[30].mxu0  ;;  %v4533_v16 = vpop.f32.mrb[30].mxu1 }
 0x11b   :  { %v2970_v24 = vpop.f32.mrb[31].mxu0  ;;  %v3125_v25 = vpop.f32.mrb[31].mxu1  ;;  %3291 = vmatmul.mubr.msk.f32.gmra.mrb[136].mxu0 %vm67_vm4, %v2523_v10  ;;  %3446 = vmatmul.mubr.msk.f32.gmra.mrb[136].mxu1 %vm67_vm4, %v2622_v11  ;;  %v2528_v10 = vld [vmem:[%s5434_s0 + $0x3d0] sm:$0xff] }
 0x11c   :  { %3293 = vmatprep.mubr.msk.f32.mxu0 %vm3568_vm1, %v3569_v6  ;;  %3448 = vmatprep.mubr.msk.f32.mxu1 %vm3568_vm1, %v3569_v6  ;;  %v2526_v25 = vld [vmem:[%s5434_s0 + $0x3c0] sm:$0xff] }
 0x11e   :  { %v4549_v37 = vpop.f32.mrb[32].mxu0  ;;  %v4551_v38 = vpop.f32.mrb[32].mxu1 }
 0x11f   :  { %v2973_v46 = vpop.f32.mrb[33].mxu0  ;;  %v3128_v50 = vpop.f32.mrb[33].mxu1  ;;  %3294 = vmatmul.mubr.msk.f32.gmra.mrb[138].mxu0 %vm67_vm4, %v2524_v29  ;;  %3449 = vmatmul.mubr.msk.f32.gmra.mrb[138].mxu1 %vm67_vm4, %v2623_v36  ;;  %v2625_v29 = vld [vmem:[%s5434_s0 + $0x548] sm:$0xff] }
 0x120   :  { %3296 = vmatprep.mubr.msk.f32.mxu0 %vm3568_vm1, %v3569_v6  ;;  %3451 = vmatprep.mubr.msk.f32.mxu1 %vm3568_vm1, %v3569_v6 }
 0x122   :  { %v4567_v1 = vpop.f32.mrb[34].mxu0  ;;  %v4569_v2 = vpop.f32.mrb[34].mxu1 }
 0x123   :  { %v2976_v11 = vpop.f32.mrb[35].mxu0  ;;  %v3131_v24 = vpop.f32.mrb[35].mxu1  ;;  %3297 = vmatmul.mubr.msk.f32.gmra.mrb[140].mxu0 %vm67_vm4, %v2525_v51  ;;  %3452 = vmatmul.mubr.msk.f32.gmra.mrb[140].mxu1 %vm67_vm4, %v2624_v52 }
 0x124   :  { %3299 = vmatprep.mubr.msk.f32.mxu0 %vm3568_vm1, %v3569_v6  ;;  %3454 = vmatprep.mubr.msk.f32.mxu1 %vm3568_vm1, %v3569_v6  ;;  %v2527_v11 = vld [vmem:[%s5434_s0 + $0x3c8] sm:$0xff]  ;;  %v2626_v24 = vld [vmem:[%s5434_s0 + $0x550] sm:$0xff] }
 0x126   :  { %v4585_v36 = vpop.f32.mrb[36].mxu0  ;;  %v4587_v46 = vpop.f32.mrb[36].mxu1 }
 0x127   :  { %v2979_v51 = vpop.f32.mrb[37].mxu0  ;;  %v3134_v52 = vpop.f32.mrb[37].mxu1  ;;  %3300 = vmatmul.mubr.msk.f32.gmra.mrb[142].mxu0 %vm67_vm4, %v2526_v25  ;;  %3455 = vmatmul.mubr.msk.f32.gmra.mrb[142].mxu1 %vm67_vm4, %v2625_v29  ;;  %v2627_v25 = vld [vmem:[%s5434_s0 + $0x558] sm:$0xff] }
 0x128   :  { %3302 = vmatprep.mubr.msk.f32.mxu0 %vm3568_vm1, %v3569_v6  ;;  %3457 = vmatprep.mubr.msk.f32.mxu1 %vm3568_vm1, %v3569_v6 }
 0x12a   :  { %v4603_v51 = vpop.f32.mrb[38].mxu0  ;;  %v4605_v52 = vpop.f32.mrb[38].mxu1 }
 0x12b   :  { %v2982_v29 = vpop.f32.mrb[39].mxu0  ;;  %v3137_v50 = vpop.f32.mrb[39].mxu1  ;;  %3303 = vmatmul.mubr.msk.f32.gmra.mrb[144].mxu0 %vm67_vm4, %v2527_v11  ;;  %3458 = vmatmul.mubr.msk.f32.gmra.mrb[144].mxu1 %vm67_vm4, %v2626_v24  ;;  %v2628_v11 = vld [vmem:[%s5434_s0 + $0x560] sm:$0xff] }
 0x12c   :  { %3305 = vmatprep.mubr.msk.f32.mxu0 %vm3568_vm1, %v3569_v6  ;;  %3460 = vmatprep.mubr.msk.f32.mxu1 %vm3568_vm1, %v3569_v6 }
 0x12e   :  { %v4621_v29 = vpop.f32.mrb[40].mxu0  ;;  %v4623_v50 = vpop.f32.mrb[40].mxu1 }
 0x12f   :  { %v2985_v24 = vpop.f32.mrb[41].mxu0  ;;  %v3140_v39 = vpop.f32.mrb[41].mxu1  ;;  %3306 = vmatmul.mubr.msk.f32.gmra.mrb[146].mxu0 %vm67_vm4, %v2528_v10  ;;  %3461 = vmatmul.mubr.msk.f32.gmra.mrb[146].mxu1 %vm67_vm4, %v2627_v25  ;;  %v2629_v10 = vld [vmem:[%s5434_s0 + $0x568] sm:$0xff] }
 0x130   :  { %3308 = vmatprep.mubr.msk.f32.mxu0 %vm3568_vm1, %v3569_v6  ;;  %3463 = vmatprep.mubr.msk.f32.mxu1 %vm3568_vm1, %v3569_v6 }
 0x132   :  { %v4639_v24 = vpop.f32.mrb[42].mxu0  ;;  %v4641_v39 = vpop.f32.mrb[42].mxu1 }
 0x133   :  { %v2988_v25 = vpop.f32.mrb[43].mxu0  ;;  %v3143_v0 = vpop.f32.mrb[43].mxu1  ;;  %3309 = vmatmul.mubr.msk.f32.gmra.mrb[148].mxu0 %vm67_vm4, %v2529_v23  ;;  %3464 = vmatmul.mubr.msk.f32.gmra.mrb[148].mxu1 %vm67_vm4, %v2628_v11  ;;  %v2630_v23 = vld [vmem:[%s5434_s0 + $0x570] sm:$0xff] }
 0x134   :  { %3311 = vmatprep.mubr.msk.f32.mxu0 %vm3568_vm1, %v3569_v6  ;;  %3466 = vmatprep.mubr.msk.f32.mxu1 %vm3568_vm1, %v3569_v6 }
 0x136   :  { %v4657_v25 = vpop.f32.mrb[44].mxu0  ;;  %v4659_v0 = vpop.f32.mrb[44].mxu1 }
 0x137   :  { %v2991_v11 = vpop.f32.mrb[45].mxu0  ;;  %v3146_v32 = vpop.f32.mrb[45].mxu1  ;;  %3312 = vmatmul.mubr.msk.f32.gmra.mrb[150].mxu0 %vm67_vm4, %v2530_v45  ;;  %3467 = vmatmul.mubr.msk.f32.gmra.mrb[150].mxu1 %vm67_vm4, %v2629_v10  ;;  %v2631_v45 = vld [vmem:[%s5434_s0 + $0x578] sm:$0xff] }
 0x138   :  { %3314 = vmatprep.mubr.msk.f32.mxu0 %vm3568_vm1, %v3569_v6  ;;  %3469 = vmatprep.mubr.msk.f32.mxu1 %vm3568_vm1, %v3569_v6 }
 0x13a   :  { %v4675_v11 = vpop.f32.mrb[46].mxu0  ;;  %v4677_v32 = vpop.f32.mrb[46].mxu1 }
 0x13b   :  { %v2994_v10 = vpop.f32.mrb[47].mxu0  ;;  %v3149_v9 = vpop.f32.mrb[47].mxu1  ;;  %3315 = vmatmul.mubr.msk.f32.gmra.mrb[152].mxu0 %vm67_vm4, %v2531_v22  ;;  %3470 = vmatmul.mubr.msk.f32.gmra.mrb[152].mxu1 %vm67_vm4, %v2630_v23  ;;  %v2632_v22 = vld [vmem:[%s5434_s0 + $0x580] sm:$0xff] }
 0x13c   :  { %3317 = vmatprep.mubr.msk.f32.mxu0 %vm3568_vm1, %v3569_v6  ;;  %3472 = vmatprep.mubr.msk.f32.mxu1 %vm3568_vm1, %v3569_v6 }
 0x13e   :  { %v4693_v10 = vpop.f32.mrb[48].mxu0  ;;  %v4695_v9 = vpop.f32.mrb[48].mxu1 }
 0x13f   :  { %5488 = vst [vmem:[#allocation2_spill] sm:$0xff] %v4695_v9  ;;  %v2997_v23 = vpop.f32.mrb[49].mxu0  ;;  %v3152_v49 = vpop.f32.mrb[49].mxu1  ;;  %3318 = vmatmul.mubr.msk.f32.gmra.mrb[154].mxu0 %vm67_vm4, %v2532_v59  ;;  %3473 = vmatmul.mubr.msk.f32.gmra.mrb[154].mxu1 %vm67_vm4, %v2631_v45  ;;  %v2633_v59 = vld [vmem:[%s5434_s0 + $0x588] sm:$0xff] }
 0x140   :  { %3320 = vmatprep.mubr.msk.f32.mxu0 %vm3568_vm1, %v3569_v6  ;;  %3475 = vmatprep.mubr.msk.f32.mxu1 %vm3568_vm1, %v3569_v6 }
 0x142   :  { %v4711_v23 = vpop.f32.mrb[50].mxu0  ;;  %v4713_v49 = vpop.f32.mrb[50].mxu1 }
 0x143   :  { %5489 = vst [vmem:[#allocation3_spill] sm:$0xff] %v4711_v23  ;;  %5490 = vst [vmem:[#allocation4_spill] sm:$0xff] %v4713_v49  ;;  %v3000_v45 = vpop.f32.mrb[51].mxu0  ;;  %v3155_v35 = vpop.f32.mrb[51].mxu1  ;;  %3321 = vmatmul.mubr.msk.f32.gmra.mrb[156].mxu0 %vm67_vm4, %v2533_v42  ;;  %3476 = vmatmul.mubr.msk.f32.gmra.mrb[156].mxu1 %vm67_vm4, %v2632_v22  ;;  %v2634_v42 = vld [vmem:[%s5434_s0 + $0x590] sm:$0xff] }
 0x144   :  { %3323 = vmatprep.mubr.msk.f32.mxu0 %vm3568_vm1, %v3569_v6  ;;  %3478 = vmatprep.mubr.msk.f32.mxu1 %vm3568_vm1, %v3569_v6 }
 0x146   :  { %v4729_v45 = vpop.f32.mrb[52].mxu0  ;;  %v4731_v35 = vpop.f32.mrb[52].mxu1 }
 0x147   :  { %5491 = vst [vmem:[#allocation5_spill] sm:$0xff] %v4729_v45  ;;  %5492 = vst [vmem:[#allocation6_spill] sm:$0xff] %v4731_v35  ;;  %v3003_v22 = vpop.f32.mrb[53].mxu0  ;;  %v3158_v21 = vpop.f32.mrb[53].mxu1  ;;  %3324 = vmatmul.mubr.msk.f32.gmra.mrb[158].mxu0 %vm67_vm4, %v2534_v28  ;;  %3479 = vmatmul.mubr.msk.f32.gmra.mrb[158].mxu1 %vm67_vm4, %v2633_v59  ;;  %v2635_v28 = vld [vmem:[%s5434_s0 + $0x598] sm:$0xff] }
 0x148   :  { %3326 = vmatprep.mubr.msk.f32.mxu0 %vm3568_vm1, %v3569_v6  ;;  %3481 = vmatprep.mubr.msk.f32.mxu1 %vm3568_vm1, %v3569_v6 }
 0x14a   :  { %v4747_v22 = vpop.f32.mrb[54].mxu0  ;;  %v4749_v21 = vpop.f32.mrb[54].mxu1 }
 0x14b   :  { %5493 = vst [vmem:[#allocation7_spill] sm:$0xff] %v4747_v22  ;;  %5494 = vst [vmem:[#allocation8_spill] sm:$0xff] %v4749_v21  ;;  %v3006_v59 = vpop.f32.mrb[55].mxu0  ;;  %v3161_v7 = vpop.f32.mrb[55].mxu1  ;;  %3327 = vmatmul.mubr.msk.f32.gmra.mrb[160].mxu0 %vm67_vm4, %v2535_v14  ;;  %3482 = vmatmul.mubr.msk.f32.gmra.mrb[160].mxu1 %vm67_vm4, %v2634_v42  ;;  %v2537_v21 = vld [vmem:[%s5434_s0 + $0x418] sm:$0xff]  ;;  %v2636_v14 = vld [vmem:[%s5434_s0 + $0x5a0] sm:$0xff] }
 0x14c   :  { %3329 = vmatprep.mubr.msk.f32.mxu0 %vm3568_vm1, %v3569_v6  ;;  %3484 = vmatprep.mubr.msk.f32.mxu1 %vm3568_vm1, %v3569_v6 }
 0x14e   :  { %v4765_v59 = vpop.f32.mrb[56].mxu0  ;;  %v4767_v7 = vpop.f32.mrb[56].mxu1 }
 0x14f   :  { %5495 = vst [vmem:[#allocation9_spill] sm:$0xff] %v4765_v59  ;;  %5496 = vst [vmem:[#allocation10_spill] sm:$0xff] %v4767_v7  ;;  %v3009_v42 = vpop.f32.mrb[57].mxu0  ;;  %v3164_v56 = vpop.f32.mrb[57].mxu1  ;;  %3330 = vmatmul.mubr.msk.f32.gmra.mrb[162].mxu0 %vm67_vm4, %v2536_v63  ;;  %3485 = vmatmul.mubr.msk.f32.gmra.mrb[162].mxu1 %vm67_vm4, %v2635_v28  ;;  %v2538_v59 = vld [vmem:[%s5434_s0 + $0x420] sm:$0xff]  ;;  %v2637_v63 = vld [vmem:[%s5434_s0 + $0x5a8] sm:$0xff] }
 0x150   :  { %3332 = vmatprep.mubr.msk.f32.mxu0 %vm3568_vm1, %v3569_v6  ;;  %3487 = vmatprep.mubr.msk.f32.mxu1 %vm3568_vm1, %v3569_v6 }
 0x152   :  { %v4783_v42 = vpop.f32.mrb[58].mxu0  ;;  %v4785_v56 = vpop.f32.mrb[58].mxu1 }
 0x153   :  { %5497 = vst [vmem:[#allocation11_spill] sm:$0xff] %v4783_v42  ;;  %5498 = vst [vmem:[#allocation12_spill] sm:$0xff] %v4785_v56  ;;  %v3012_v28 = vpop.f32.mrb[59].mxu0  ;;  %v3167_v7 = vpop.f32.mrb[59].mxu1  ;;  %3333 = vmatmul.mubr.msk.f32.gmra.mrb[164].mxu0 %vm67_vm4, %v2537_v21  ;;  %3488 = vmatmul.mubr.msk.f32.gmra.mrb[164].mxu1 %vm67_vm4, %v2636_v14  ;;  %v2539_v42 = vld [vmem:[%s5434_s0 + $0x428] sm:$0xff]  ;;  %v2638_v21 = vld [vmem:[%s5434_s0 + $0x5b0] sm:$0xff] }
 0x154   :  { %3335 = vmatprep.mubr.msk.f32.mxu0 %vm3568_vm1, %v3569_v6  ;;  %3490 = vmatprep.mubr.msk.f32.mxu1 %vm3568_vm1, %v3569_v6 }
 0x156   :  { %v4801_v28 = vpop.f32.mrb[60].mxu0  ;;  %v4803_v7 = vpop.f32.mrb[60].mxu1 }
 0x157   :  { %5499 = vst [vmem:[#allocation13_spill] sm:$0xff] %v4801_v28  ;;  %5500 = vst [vmem:[#allocation14_spill] sm:$0xff] %v4803_v7  ;;  %v3015_v14 = vpop.f32.mrb[61].mxu0  ;;  %v3170_v56 = vpop.f32.mrb[61].mxu1  ;;  %3336 = vmatmul.mubr.msk.f32.gmra.mrb[166].mxu0 %vm67_vm4, %v2538_v59  ;;  %3491 = vmatmul.mubr.msk.f32.gmra.mrb[166].mxu1 %vm67_vm4, %v2637_v63  ;;  %v2540_v28 = vld [vmem:[%s5434_s0 + $0x430] sm:$0xff]  ;;  %v2639_v59 = vld [vmem:[%s5434_s0 + $0x5b8] sm:$0xff] }
 0x158   :  { %3338 = vmatprep.mubr.msk.f32.mxu0 %vm3568_vm1, %v3569_v6  ;;  %3493 = vmatprep.mubr.msk.f32.mxu1 %vm3568_vm1, %v3569_v6 }
 0x15a   :  { %v4819_v14 = vpop.f32.mrb[62].mxu0  ;;  %v4821_v56 = vpop.f32.mrb[62].mxu1 }
 0x15b   :  { %5501 = vst [vmem:[#allocation15_spill] sm:$0xff] %v4819_v14  ;;  %5502 = vst [vmem:[#allocation16_spill] sm:$0xff] %v4821_v56  ;;  %v3018_v63 = vpop.f32.mrb[63].mxu0  ;;  %v3173_v7 = vpop.f32.mrb[63].mxu1  ;;  %3339 = vmatmul.mubr.msk.f32.gmra.mrb[168].mxu0 %vm67_vm4, %v2539_v42  ;;  %3494 = vmatmul.mubr.msk.f32.gmra.mrb[168].mxu1 %vm67_vm4, %v2638_v21  ;;  %v2541_v14 = vld [vmem:[%s5434_s0 + $0x438] sm:$0xff]  ;;  %v2640_v42 = vld [vmem:[%s5434_s0 + $0x5c0] sm:$0xff] }
 0x15c   :  { %3341 = vmatprep.mubr.msk.f32.mxu0 %vm3568_vm1, %v3569_v6  ;;  %3496 = vmatprep.mubr.msk.f32.mxu1 %vm3568_vm1, %v3569_v6 }
 0x15e   :  { %v4837_v63 = vpop.f32.mrb[64].mxu0  ;;  %v4839_v7 = vpop.f32.mrb[64].mxu1 }
 0x15f   :  { %5503 = vst [vmem:[#allocation17_spill] sm:$0xff] %v4837_v63  ;;  %5504 = vst [vmem:[#allocation18_spill] sm:$0xff] %v4839_v7  ;;  %v3021_v21 = vpop.f32.mrb[65].mxu0  ;;  %v3176_v56 = vpop.f32.mrb[65].mxu1  ;;  %3342 = vmatmul.mubr.msk.f32.gmra.mrb[170].mxu0 %vm67_vm4, %v2540_v28  ;;  %3497 = vmatmul.mubr.msk.f32.gmra.mrb[170].mxu1 %vm67_vm4, %v2639_v59  ;;  %v2542_v63 = vld [vmem:[%s5434_s0 + $0x440] sm:$0xff]  ;;  %v2641_v28 = vld [vmem:[%s5434_s0 + $0x5c8] sm:$0xff] }
 0x160   :  { %3344 = vmatprep.mubr.msk.f32.mxu0 %vm3568_vm1, %v3569_v6  ;;  %3499 = vmatprep.mubr.msk.f32.mxu1 %vm3568_vm1, %v3569_v6 }
 0x162   :  { %v4855_v21 = vpop.f32.mrb[66].mxu0  ;;  %v4857_v56 = vpop.f32.mrb[66].mxu1 }
 0x163   :  { %5505 = vst [vmem:[#allocation19_spill] sm:$0xff] %v4855_v21  ;;  %5506 = vst [vmem:[#allocation20_spill] sm:$0xff] %v4857_v56  ;;  %v3024_v59 = vpop.f32.mrb[67].mxu0  ;;  %v3179_v7 = vpop.f32.mrb[67].mxu1  ;;  %3345 = vmatmul.mubr.msk.f32.gmra.mrb[172].mxu0 %vm67_vm4, %v2541_v14  ;;  %3500 = vmatmul.mubr.msk.f32.gmra.mrb[172].mxu1 %vm67_vm4, %v2640_v42  ;;  %v2543_v21 = vld [vmem:[%s5434_s0 + $0x448] sm:$0xff]  ;;  %v2642_v14 = vld [vmem:[%s5434_s0 + $0x5d0] sm:$0xff] }
 0x164   :  { %3347 = vmatprep.mubr.msk.f32.mxu0 %vm3568_vm1, %v3569_v6  ;;  %3502 = vmatprep.mubr.msk.f32.mxu1 %vm3568_vm1, %v3569_v6 }
 0x166   :  { %v4873_v59 = vpop.f32.mrb[68].mxu0  ;;  %v4875_v7 = vpop.f32.mrb[68].mxu1 }
 0x167   :  { %5507 = vst [vmem:[#allocation21_spill] sm:$0xff] %v4873_v59  ;;  %5508 = vst [vmem:[#allocation22_spill] sm:$0xff] %v4875_v7  ;;  %v3027_v42 = vpop.f32.mrb[69].mxu0  ;;  %v3182_v56 = vpop.f32.mrb[69].mxu1  ;;  %3348 = vmatmul.mubr.msk.f32.gmra.mrb[174].mxu0 %vm67_vm4, %v2542_v63  ;;  %3503 = vmatmul.mubr.msk.f32.gmra.mrb[174].mxu1 %vm67_vm4, %v2641_v28  ;;  %v2544_v59 = vld [vmem:[%s5434_s0 + $0x450] sm:$0xff]  ;;  %v2643_v63 = vld [vmem:[%s5434_s0 + $0x5d8] sm:$0xff] }
 0x168   :  { %3350 = vmatprep.mubr.msk.f32.mxu0 %vm3568_vm1, %v3569_v6  ;;  %3505 = vmatprep.mubr.msk.f32.mxu1 %vm3568_vm1, %v3569_v6 }
 0x16a   :  { %v4891_v42 = vpop.f32.mrb[70].mxu0  ;;  %v4893_v56 = vpop.f32.mrb[70].mxu1 }
 0x16b   :  { %5509 = vst [vmem:[#allocation23_spill] sm:$0xff] %v4891_v42  ;;  %5510 = vst [vmem:[#allocation24_spill] sm:$0xff] %v4893_v56  ;;  %v3030_v28 = vpop.f32.mrb[71].mxu0  ;;  %v3185_v7 = vpop.f32.mrb[71].mxu1  ;;  %3351 = vmatmul.mubr.msk.f32.gmra.mrb[176].mxu0 %vm67_vm4, %v2543_v21  ;;  %3506 = vmatmul.mubr.msk.f32.gmra.mrb[176].mxu1 %vm67_vm4, %v2642_v14  ;;  %v2545_v42 = vld [vmem:[%s5434_s0 + $0x458] sm:$0xff]  ;;  %v2644_v21 = vld [vmem:[%s5434_s0 + $0x5e0] sm:$0xff] }
 0x16c   :  { %3353 = vmatprep.mubr.msk.f32.mxu0 %vm3568_vm1, %v3569_v6  ;;  %3508 = vmatprep.mubr.msk.f32.mxu1 %vm3568_vm1, %v3569_v6 }
 0x16e   :  { %v4909_v28 = vpop.f32.mrb[72].mxu0  ;;  %v4911_v7 = vpop.f32.mrb[72].mxu1 }
 0x16f   :  { %5511 = vst [vmem:[#allocation25_spill] sm:$0xff] %v4909_v28  ;;  %5512 = vst [vmem:[#allocation26_spill] sm:$0xff] %v4911_v7  ;;  %v3033_v14 = vpop.f32.mrb[73].mxu0  ;;  %v3188_v56 = vpop.f32.mrb[73].mxu1  ;;  %3354 = vmatmul.mubr.msk.f32.gmra.mrb[178].mxu0 %vm67_vm4, %v2544_v59  ;;  %3509 = vmatmul.mubr.msk.f32.gmra.mrb[178].mxu1 %vm67_vm4, %v2643_v63  ;;  %v2546_v28 = vld [vmem:[%s5434_s0 + $0x460] sm:$0xff]  ;;  %v2645_v59 = vld [vmem:[%s5434_s0 + $0x5e8] sm:$0xff] }
 0x170   :  { %3356 = vmatprep.mubr.msk.f32.mxu0 %vm3568_vm1, %v3569_v6  ;;  %3511 = vmatprep.mubr.msk.f32.mxu1 %vm3568_vm1, %v3569_v6 }
 0x172   :  { %v4927_v14 = vpop.f32.mrb[74].mxu0  ;;  %v4929_v56 = vpop.f32.mrb[74].mxu1 }
 0x173   :  { %5513 = vst [vmem:[#allocation27_spill] sm:$0xff] %v4927_v14  ;;  %5514 = vst [vmem:[#allocation28_spill] sm:$0xff] %v4929_v56  ;;  %v3036_v63 = vpop.f32.mrb[75].mxu0  ;;  %v3191_v7 = vpop.f32.mrb[75].mxu1  ;;  %3357 = vmatmul.mubr.msk.f32.gmra.mrb[180].mxu0 %vm67_vm4, %v2545_v42  ;;  %3512 = vmatmul.mubr.msk.f32.gmra.mrb[180].mxu1 %vm67_vm4, %v2644_v21  ;;  %v2547_v14 = vld [vmem:[%s5434_s0 + $0x468] sm:$0xff]  ;;  %v2646_v42 = vld [vmem:[%s5434_s0 + $0x5f0] sm:$0xff] }
 0x174   :  { %3359 = vmatprep.mubr.msk.f32.mxu0 %vm3568_vm1, %v3569_v6  ;;  %3514 = vmatprep.mubr.msk.f32.mxu1 %vm3568_vm1, %v3569_v6 }
 0x176   :  { %v4945_v63 = vpop.f32.mrb[76].mxu0  ;;  %v4947_v7 = vpop.f32.mrb[76].mxu1 }
 0x177   :  { %5515 = vst [vmem:[#allocation29_spill] sm:$0xff] %v4945_v63  ;;  %5516 = vst [vmem:[#allocation30_spill] sm:$0xff] %v4947_v7  ;;  %v3039_v21 = vpop.f32.mrb[77].mxu0  ;;  %v3194_v56 = vpop.f32.mrb[77].mxu1  ;;  %3360 = vmatmul.mubr.msk.f32.gmra.mrb[182].mxu0 %vm67_vm4, %v2546_v28  ;;  %3515 = vmatmul.mubr.msk.f32.gmra.mrb[182].mxu1 %vm67_vm4, %v2645_v59  ;;  %v2548_v63 = vld [vmem:[%s5434_s0 + $0x470] sm:$0xff]  ;;  %v2647_v28 = vld [vmem:[%s5434_s0 + $0x5f8] sm:$0xff] }
 0x178   :  { %3362 = vmatprep.mubr.msk.f32.mxu0 %vm3568_vm1, %v3569_v6  ;;  %3517 = vmatprep.mubr.msk.f32.mxu1 %vm3568_vm1, %v3569_v6 }
 0x17a   :  { %v4963_v21 = vpop.f32.mrb[78].mxu0  ;;  %v4965_v56 = vpop.f32.mrb[78].mxu1 }
 0x17b   :  { %5517 = vst [vmem:[#allocation31_spill] sm:$0xff] %v4963_v21  ;;  %5518 = vst [vmem:[#allocation32_spill] sm:$0xff] %v4965_v56  ;;  %v3042_v59 = vpop.f32.mrb[79].mxu0  ;;  %v3197_v7 = vpop.f32.mrb[79].mxu1  ;;  %3363 = vmatmul.mubr.msk.f32.gmra.mrb[184].mxu0 %vm67_vm4, %v2547_v14  ;;  %3518 = vmatmul.mubr.msk.f32.gmra.mrb[184].mxu1 %vm67_vm4, %v2646_v42  ;;  %v2549_v21 = vld [vmem:[%s5434_s0 + $0x478] sm:$0xff]  ;;  %v2648_v14 = vld [vmem:[%s5434_s0 + $0x600] sm:$0xff] }
 0x17c   :  { %3365 = vmatprep.mubr.msk.f32.mxu0 %vm3568_vm1, %v3569_v6  ;;  %3520 = vmatprep.mubr.msk.f32.mxu1 %vm3568_vm1, %v3569_v6 }
 0x17e   :  { %v4981_v59 = vpop.f32.mrb[80].mxu0  ;;  %v4983_v7 = vpop.f32.mrb[80].mxu1 }
 0x17f   :  { %5519 = vst [vmem:[#allocation33_spill] sm:$0xff] %v4981_v59  ;;  %5520 = vst [vmem:[#allocation34_spill] sm:$0xff] %v4983_v7  ;;  %v3045_v42 = vpop.f32.mrb[81].mxu0  ;;  %v3200_v56 = vpop.f32.mrb[81].mxu1  ;;  %3366 = vmatmul.mubr.msk.f32.gmra.mrb[186].mxu0 %vm67_vm4, %v2548_v63  ;;  %3521 = vmatmul.mubr.msk.f32.gmra.mrb[186].mxu1 %vm67_vm4, %v2647_v28  ;;  %v2550_v59 = vld [vmem:[%s5434_s0 + $0x480] sm:$0xff]  ;;  %v2649_v63 = vld [vmem:[%s5434_s0 + $0x608] sm:$0xff] }
 0x180   :  { %3368 = vmatprep.mubr.msk.f32.mxu0 %vm3568_vm1, %v3569_v6  ;;  %3523 = vmatprep.mubr.msk.f32.mxu1 %vm3568_vm1, %v3569_v6 }
 0x182   :  { %v4999_v42 = vpop.f32.mrb[82].mxu0  ;;  %v5001_v56 = vpop.f32.mrb[82].mxu1 }
 0x183   :  { %5521 = vst [vmem:[#allocation35_spill] sm:$0xff] %v4999_v42  ;;  %5522 = vst [vmem:[#allocation36_spill] sm:$0xff] %v5001_v56  ;;  %v3048_v28 = vpop.f32.mrb[83].mxu0  ;;  %v3203_v7 = vpop.f32.mrb[83].mxu1  ;;  %3369 = vmatmul.mubr.msk.f32.gmra.mrb[188].mxu0 %vm67_vm4, %v2549_v21  ;;  %3524 = vmatmul.mubr.msk.f32.gmra.mrb[188].mxu1 %vm67_vm4, %v2648_v14  ;;  %v2551_v42 = vld [vmem:[%s5434_s0 + $0x488] sm:$0xff]  ;;  %v2650_v21 = vld [vmem:[%s5434_s0 + $0x610] sm:$0xff] }
 0x184   :  { %3371 = vmatprep.mubr.msk.f32.mxu0 %vm3568_vm1, %v3569_v6  ;;  %3526 = vmatprep.mubr.msk.f32.mxu1 %vm3568_vm1, %v3569_v6 }
 0x186   :  { %v5017_v28 = vpop.f32.mrb[84].mxu0  ;;  %v5019_v7 = vpop.f32.mrb[84].mxu1 }
 0x187   :  { %5523 = vst [vmem:[#allocation37_spill] sm:$0xff] %v5017_v28  ;;  %5524 = vst [vmem:[#allocation38_spill] sm:$0xff] %v5019_v7  ;;  %v3051_v14 = vpop.f32.mrb[85].mxu0  ;;  %v3206_v56 = vpop.f32.mrb[85].mxu1  ;;  %3372 = vmatmul.mubr.msk.f32.gmra.mrb[190].mxu0 %vm67_vm4, %v2550_v59  ;;  %3527 = vmatmul.mubr.msk.f32.gmra.mrb[190].mxu1 %vm67_vm4, %v2649_v63  ;;  %v2552_v28 = vld [vmem:[%s5434_s0 + $0x490] sm:$0xff]  ;;  %v2651_v59 = vld [vmem:[%s5434_s0 + $0x618] sm:$0xff] }
 0x188   :  { %3374 = vmatprep.mubr.msk.f32.mxu0 %vm3568_vm1, %v3569_v6  ;;  %3529 = vmatprep.mubr.msk.f32.mxu1 %vm3568_vm1, %v3569_v6 }
 0x18a   :  { %v5035_v14 = vpop.f32.mrb[86].mxu0  ;;  %v5037_v56 = vpop.f32.mrb[86].mxu1 }
 0x18b   :  { %5525 = vst [vmem:[#allocation39_spill] sm:$0xff] %v5035_v14  ;;  %5526 = vst [vmem:[#allocation40_spill] sm:$0xff] %v5037_v56  ;;  %v3054_v63 = vpop.f32.mrb[87].mxu0  ;;  %v3209_v7 = vpop.f32.mrb[87].mxu1  ;;  %3375 = vmatmul.mubr.msk.f32.gmra.mrb[192].mxu0 %vm67_vm4, %v2551_v42  ;;  %3530 = vmatmul.mubr.msk.f32.gmra.mrb[192].mxu1 %vm67_vm4, %v2650_v21 }
 0x18c   :  { %3377 = vmatprep.mubr.msk.f32.mxu0 %vm3568_vm1, %v3569_v6  ;;  %3532 = vmatprep.mubr.msk.f32.mxu1 %vm3568_vm1, %v3569_v6 }
 0x18e   :  { %v5053_v63 = vpop.f32.mrb[88].mxu0  ;;  %v5055_v7 = vpop.f32.mrb[88].mxu1 }
 0x18f   :  { %5527 = vst [vmem:[#allocation41_spill] sm:$0xff] %v5053_v63  ;;  %5528 = vst [vmem:[#allocation42_spill] sm:$0xff] %v5055_v7  ;;  %v3057_v21 = vpop.f32.mrb[89].mxu0  ;;  %v3212_v56 = vpop.f32.mrb[89].mxu1  ;;  %3378 = vmatmul.mubr.msk.f32.gmra.mrb[194].mxu0 %vm67_vm4, %v2552_v28  ;;  %3533 = vmatmul.mubr.msk.f32.gmra.mrb[194].mxu1 %vm67_vm4, %v2651_v59  ;;  %v5088_v7 = vld [vmem:[%s5435_s2] ss:$0 sm:$0xff] }
 0x192   :  { %v5061_v6 = vpop.f32.mrb[90].mxu0  ;;  %v5063_v14 = vpop.f32.mrb[90].mxu1 }
 0x193   :  { %5529 = vst [vmem:[#allocation43_spill] sm:$0xff] %v5061_v6  ;;  %5530 = vst [vmem:[#allocation44_spill] sm:$0xff] %v5063_v14  ;;  %v3060_v35 = vpop.f32.mrb[91].mxu0  ;;  %v3215_v45 = vpop.f32.mrb[91].mxu1 }
 0x196   :  { %v5067_v49 = vpop.f32.mrb[92].mxu0  ;;  %v5069_v23 = vpop.f32.mrb[92].mxu1 }
 0x197   :  { %5531 = vst [vmem:[#allocation45_spill] sm:$0xff] %v5067_v49  ;;  %5532 = vst [vmem:[#allocation46_spill] sm:$0xff] %v5069_v23  ;;  %v3063_v21 = vpop.f32.mrb[93].mxu0  ;;  %v3218_v28 = vpop.f32.mrb[93].mxu1 }
 0x19a   :  { %v5073_v42 = vpop.f32.mrb[94].mxu0  ;;  %v5075_v59 = vpop.f32.mrb[94].mxu1 }
 0x19b   :  { %5533 = vst [vmem:[#allocation47_spill] sm:$0xff] %v5073_v42  ;;  %5534 = vst [vmem:[#allocation48_spill] sm:$0xff] %v5075_v59  ;;  %v3066_v63 = vpop.f32.mrb[95].mxu0  ;;  %v3221_v22 = vpop.f32.mrb[95].mxu1 }
 0x19c   :  { %v5537_v22 = vmax.f32 %v4261_v54, %v4263_v55 }
 0x19e   :  { %v5079_v35 = vpop.f32.mrb[96].mxu0  ;;  %v5081_v45 = vpop.f32.mrb[96].mxu1 }
 0x19f   :  { %5535 = vst [vmem:[#allocation49_spill] sm:$0xff] %v5079_v35  ;;  %5536 = vst [vmem:[#allocation50_spill] sm:$0xff] %v5081_v45  ;;  %v3069_v6 = vpop.f32.mrb[97].mxu0  ;;  %v3224_v56 = vpop.f32.mrb[97].mxu1 }
 0x1a2   :  { %v1299_v21 = vpop.f32.mrb[98].mxu0  ;;  %v1806_v28 = vpop.f32.mrb[98].mxu1 }
 0x1a3   :  { %v2099_v23 = vmax.f32 %v1299_v21, %v1806_v28  ;;  %v3235_v49 = vpop.f32.mrb[99].mxu0  ;;  %v3390_v9 = vpop.f32.mrb[99].mxu1 }
 0x1a4   :  { %v5538_v9 = vmax.f32 %v4279_v61, %v4281_v62 }
 0x1a5   :  { %v2148_v63 = vmax.f32 %v5537_v22, %v2099_v23 }
 0x1a6   :  { %v1304_v59 = vpop.f32.mrb[100].mxu0  ;;  %v1811_v42 = vpop.f32.mrb[100].mxu1 }
 0x1a7   :  { %v2204_v14 = vadd.f32 %v5088_v7, %v2148_v63  ;;  %v2100_v6 = vmax.f32 %v1304_v59, %v1811_v42  ;;  %v3238_v56 = vpop.f32.mrb[101].mxu0  ;;  %v3393_v45 = vpop.f32.mrb[101].mxu1  ;;  %v5539_v42 = vmax.f32 %v4297_v4, %v4299_v5 }
 0x1a9   :  { %v2253_v35 = vmax.f32 %v2204_v14, 0.0  ;;  %v2149_v49 = vmax.f32 %v5538_v9, %v2100_v6  ;;  %v5540_v9 = vmax.f32 %v4315_v12, %v4317_v13 }
 0x1aa   :  { %v1309_v21 = vpop.f32.mrb[102].mxu0  ;;  %v1816_v28 = vpop.f32.mrb[102].mxu1 }
 0x1ab   :  { %2302 = vst [vmem:[%s5436_s3] sm:$0xff] %v2253_v35  ;;  %v2205_v54 = vadd.f32 %v5088_v7, %v2149_v49  ;;  %v2101_v55 = vmax.f32 %v1309_v21, %v1816_v28  ;;  %v3241_v23 = vpop.f32.mrb[103].mxu0  ;;  %v3396_v22 = vpop.f32.mrb[103].mxu1 }
 0x1ac   :  { %v5541_v22 = vmax.f32 %v4333_v19, %v4335_v20 }
 0x1ad   :  { %v2254_v63 = vmax.f32 %v2205_v54, 0.0  ;;  %v2150_v14 = vmax.f32 %v5539_v42, %v2101_v55 }
 0x1ae   :  { %v1314_v59 = vpop.f32.mrb[104].mxu0  ;;  %v1821_v45 = vpop.f32.mrb[104].mxu1 }
 0x1af   :  { %2303 = vst [vmem:[%s5436_s3 + $0x8] sm:$0xff] %v2254_v63  ;;  %v2206_v61 = vadd.f32 %v5088_v7, %v2150_v14  ;;  %v2102_v62 = vmax.f32 %v1314_v59, %v1821_v45  ;;  %v3244_v35 = vpop.f32.mrb[105].mxu0  ;;  %v3399_v6 = vpop.f32.mrb[105].mxu1 }
 0x1b1   :  { %v2255_v56 = vmax.f32 %v2206_v61, 0.0  ;;  %v2151_v49 = vmax.f32 %v5540_v9, %v2102_v62  ;;  %v5542_v62 = vmax.f32 %v4351_v26, %v4353_v27 }
 0x1b2   :  { %v1319_v21 = vpop.f32.mrb[106].mxu0  ;;  %v1826_v28 = vpop.f32.mrb[106].mxu1 }
 0x1b3   :  { %2304 = vst [vmem:[%s5436_s3 + $0x10] sm:$0xff] %v2255_v56  ;;  %v2207_v4 = vadd.f32 %v5088_v7, %v2151_v49  ;;  %v2103_v5 = vmax.f32 %v1319_v21, %v1826_v28  ;;  %v3247_v54 = vpop.f32.mrb[107].mxu0  ;;  %v3402_v55 = vpop.f32.mrb[107].mxu1  ;;  %v5543_v28 = vmax.f32 %v4369_v33, %v4371_v34 }
 0x1b5   :  { %v2256_v23 = vmax.f32 %v2207_v4, 0.0  ;;  %v2152_v63 = vmax.f32 %v5541_v22, %v2103_v5 }
 0x1b6   :  { %v1324_v42 = vpop.f32.mrb[108].mxu0  ;;  %v1831_v14 = vpop.f32.mrb[108].mxu1 }
 0x1b7   :  { %2305 = vst [vmem:[%s5436_s3 + $0x18] sm:$0xff] %v2256_v23  ;;  %v2208_v12 = vadd.f32 %v5088_v7, %v2152_v63  ;;  %v2104_v13 = vmax.f32 %v1324_v42, %v1831_v14  ;;  %v3250_v59 = vpop.f32.mrb[109].mxu0  ;;  %v3405_v45 = vpop.f32.mrb[109].mxu1  ;;  %v5544_v63 = vmax.f32 %v4387_v40, %v4389_v41 }
 0x1b9   :  { %v2257_v61 = vmax.f32 %v2208_v12, 0.0  ;;  %v2153_v35 = vmax.f32 %v5542_v62, %v2104_v13 }
 0x1ba   :  { %v1329_v6 = vpop.f32.mrb[110].mxu0  ;;  %v1836_v56 = vpop.f32.mrb[110].mxu1 }
 0x1bb   :  { %2306 = vst [vmem:[%s5436_s3 + $0x20] sm:$0xff] %v2257_v61  ;;  %v2209_v19 = vadd.f32 %v5088_v7, %v2153_v35  ;;  %v2105_v20 = vmax.f32 %v1329_v6, %v1836_v56  ;;  %v3253_v9 = vpop.f32.mrb[111].mxu0  ;;  %v3408_v49 = vpop.f32.mrb[111].mxu1  ;;  %v5545_v61 = vmax.f32 %v4405_v47, %v4407_v48 }
 0x1bc   :  { %v5546_v9 = vmax.f32 %v4423_v57, %v4425_v58 }
 0x1bd   :  { %v2258_v21 = vmax.f32 %v2209_v19, 0.0  ;;  %v2154_v4 = vmax.f32 %v5543_v28, %v2105_v20 }
 0x1be   :  { %v1334_v5 = vpop.f32.mrb[112].mxu0  ;;  %v1841_v54 = vpop.f32.mrb[112].mxu1 }
 0x1bf   :  { %2307 = vst [vmem:[%s5436_s3 + $0x28] sm:$0xff] %v2258_v21  ;;  %v2210_v26 = vadd.f32 %v5088_v7, %v2154_v4  ;;  %v2106_v27 = vmax.f32 %v1334_v5, %v1841_v54  ;;  %v3256_v55 = vpop.f32.mrb[113].mxu0  ;;  %v3411_v23 = vpop.f32.mrb[113].mxu1 }
 0x1c1   :  { %v2259_v22 = vmax.f32 %v2210_v26, 0.0  ;;  %v2155_v42 = vmax.f32 %v5544_v63, %v2106_v27  ;;  %v5547_v26 = vmax.f32 %v4441_v3, %v4443_v8 }
 0x1c2   :  { %v1339_v14 = vpop.f32.mrb[114].mxu0  ;;  %v1846_v12 = vpop.f32.mrb[114].mxu1 }
 0x1c3   :  { %2308 = vst [vmem:[%s5436_s3 + $0x30] sm:$0xff] %v2259_v22  ;;  %v2211_v33 = vadd.f32 %v5088_v7, %v2155_v42  ;;  %v2107_v34 = vmax.f32 %v1339_v14, %v1846_v12  ;;  %v3259_v13 = vpop.f32.mrb[115].mxu0  ;;  %v3414_v59 = vpop.f32.mrb[115].mxu1  ;;  %v5548_v14 = vmax.f32 %v4459_v17, %v4461_v18 }
 0x1c5   :  { %v2260_v45 = vmax.f32 %v2211_v33, 0.0  ;;  %v2156_v62 = vmax.f32 %v5545_v61, %v2107_v34  ;;  %v5549_v61 = vmax.f32 %v4477_v30, %v4479_v31 }
 0x1c6   :  { %v1344_v35 = vpop.f32.mrb[116].mxu0  ;;  %v1851_v6 = vpop.f32.mrb[116].mxu1 }
 0x1c7   :  { %2309 = vst [vmem:[%s5436_s3 + $0x38] sm:$0xff] %v2260_v45  ;;  %v2212_v40 = vadd.f32 %v5088_v7, %v2156_v62  ;;  %v2108_v41 = vmax.f32 %v1344_v35, %v1851_v6  ;;  %v3262_v56 = vpop.f32.mrb[117].mxu0  ;;  %v3417_v19 = vpop.f32.mrb[117].mxu1 }
 0x1c8   :  { %v5550_v19 = vmax.f32 %v4495_v43, %v4497_v44 }
 0x1c9   :  { %v2261_v20 = vmax.f32 %v2212_v40, 0.0  ;;  %v2157_v49 = vmax.f32 %v5546_v9, %v2108_v41 }
 0x1ca   :  { %v1349_v21 = vpop.f32.mrb[118].mxu0  ;;  %v1856_v28 = vpop.f32.mrb[118].mxu1 }
 0x1cb   :  { %2310 = vst [vmem:[%s5436_s3 + $0x40] sm:$0xff] %v2261_v20  ;;  %v2213_v47 = vadd.f32 %v5088_v7, %v2157_v49  ;;  %v2109_v48 = vmax.f32 %v1349_v21, %v1856_v28  ;;  %v3265_v4 = vpop.f32.mrb[119].mxu0  ;;  %v3420_v5 = vpop.f32.mrb[119].mxu1 }
 0x1cd   :  { %v2262_v54 = vmax.f32 %v2213_v47, 0.0  ;;  %v2158_v27 = vmax.f32 %v5547_v26, %v2109_v48  ;;  %v5551_v48 = vmax.f32 %v4513_v53, %v4515_v60 }
 0x1ce   :  { %v1354_v55 = vpop.f32.mrb[120].mxu0  ;;  %v1861_v23 = vpop.f32.mrb[120].mxu1 }
 0x1cf   :  { %2311 = vst [vmem:[%s5436_s3 + $0x48] sm:$0xff] %v2262_v54  ;;  %v2214_v57 = vadd.f32 %v5088_v7, %v2158_v27  ;;  %v2110_v58 = vmax.f32 %v1354_v55, %v1861_v23  ;;  %v3268_v22 = vpop.f32.mrb[121].mxu0  ;;  %v3423_v63 = vpop.f32.mrb[121].mxu1  ;;  %v5552_v23 = vmax.f32 %v4531_v15, %v4533_v16 }
 0x1d1   :  { %v2263_v42 = vmax.f32 %v2214_v57, 0.0  ;;  %v2159_v12 = vmax.f32 %v5548_v14, %v2110_v58 }
 0x1d2   :  { %v1359_v33 = vpop.f32.mrb[122].mxu0  ;;  %v1866_v34 = vpop.f32.mrb[122].mxu1 }
 0x1d3   :  { %2312 = vst [vmem:[%s5436_s3 + $0x50] sm:$0xff] %v2263_v42  ;;  %v2215_v3 = vadd.f32 %v5088_v7, %v2159_v12  ;;  %v2111_v8 = vmax.f32 %v1359_v33, %v1866_v34  ;;  %v3271_v13 = vpop.f32.mrb[123].mxu0  ;;  %v3426_v59 = vpop.f32.mrb[123].mxu1  ;;  %v5553_v12 = vmax.f32 %v4549_v37, %v4551_v38 }
 0x1d5   :  { %v2264_v45 = vmax.f32 %v2215_v3, 0.0  ;;  %v2160_v62 = vmax.f32 %v5549_v61, %v2111_v8 }
 0x1d6   :  { %v1364_v35 = vpop.f32.mrb[124].mxu0  ;;  %v1871_v6 = vpop.f32.mrb[124].mxu1 }
 0x1d7   :  { %2313 = vst [vmem:[%s5436_s3 + $0x58] sm:$0xff] %v2264_v45  ;;  %v2216_v17 = vadd.f32 %v5088_v7, %v2160_v62  ;;  %v2112_v18 = vmax.f32 %v1364_v35, %v1871_v6  ;;  %v3274_v40 = vpop.f32.mrb[125].mxu0  ;;  %v3429_v41 = vpop.f32.mrb[125].mxu1  ;;  %v5554_v45 = vmax.f32 %v4567_v1, %v4569_v2 }
 0x1d8   :  { %v5555_v40 = vmax.f32 %v4585_v36, %v4587_v46 }
 0x1d9   :  { %v2265_v56 = vmax.f32 %v2216_v17, 0.0  ;;  %v2161_v20 = vmax.f32 %v5550_v19, %v2112_v18 }
 0x1da   :  { %v1369_v9 = vpop.f32.mrb[126].mxu0  ;;  %v1876_v49 = vpop.f32.mrb[126].mxu1 }
 0x1db   :  { %2314 = vst [vmem:[%s5436_s3 + $0x60] sm:$0xff] %v2265_v56  ;;  %v2217_v30 = vadd.f32 %v5088_v7, %v2161_v20  ;;  %v2113_v31 = vmax.f32 %v1369_v9, %v1876_v49  ;;  %v3277_v21 = vpop.f32.mrb[127].mxu0  ;;  %v3432_v28 = vpop.f32.mrb[127].mxu1 }
 0x1dd   :  { %v2266_v47 = vmax.f32 %v2217_v30, 0.0  ;;  %v2162_v4 = vmax.f32 %v5551_v48, %v2113_v31  ;;  %v5556_v30 = vmax.f32 %v4603_v51, %v4605_v52 }
 0x1de   :  { %v1374_v5 = vpop.f32.mrb[128].mxu0  ;;  %v1881_v54 = vpop.f32.mrb[128].mxu1 }
 0x1df   :  { %2315 = vst [vmem:[%s5436_s3 + $0x68] sm:$0xff] %v2266_v47  ;;  %v2218_v43 = vadd.f32 %v5088_v7, %v2162_v4  ;;  %v2114_v44 = vmax.f32 %v1374_v5, %v1881_v54  ;;  %v3280_v26 = vpop.f32.mrb[129].mxu0  ;;  %v3435_v27 = vpop.f32.mrb[129].mxu1  ;;  %v5557_v5 = vmax.f32 %v4621_v29, %v4623_v50 }
 0x1e1   :  { %v2267_v55 = vmax.f32 %v2218_v43, 0.0  ;;  %v2163_v57 = vmax.f32 %v5552_v23, %v2114_v44  ;;  %v5558_v23 = vmax.f32 %v4639_v24, %v4641_v39 }
 0x1e2   :  { %v1379_v58 = vpop.f32.mrb[130].mxu0  ;;  %v1886_v22 = vpop.f32.mrb[130].mxu1 }
 0x1e3   :  { %2316 = vst [vmem:[%s5436_s3 + $0x70] sm:$0xff] %v2267_v55  ;;  %v2219_v53 = vadd.f32 %v5088_v7, %v2163_v57  ;;  %v2115_v60 = vmax.f32 %v1379_v58, %v1886_v22  ;;  %v3283_v63 = vpop.f32.mrb[131].mxu0  ;;  %v3438_v42 = vpop.f32.mrb[131].mxu1 }
 0x1e4   :  { %v5559_v42 = vmax.f32 %v4657_v25, %v4659_v0 }
 0x1e5   :  { %v2268_v14 = vmax.f32 %v2219_v53, 0.0  ;;  %v2164_v33 = vmax.f32 %v5553_v12, %v2115_v60 }
 0x1e6   :  { %v1384_v34 = vpop.f32.mrb[132].mxu0  ;;  %v1891_v3 = vpop.f32.mrb[132].mxu1 }
 0x1e7   :  { %2317 = vst [vmem:[%s5436_s3 + $0x78] sm:$0xff] %v2268_v14  ;;  %v2220_v15 = vadd.f32 %v5088_v7, %v2164_v33  ;;  %v2116_v16 = vmax.f32 %v1384_v34, %v1891_v3  ;;  %v3286_v8 = vpop.f32.mrb[133].mxu0  ;;  %v3441_v13 = vpop.f32.mrb[133].mxu1 }
 0x1e9   :  { %v2269_v59 = vmax.f32 %v2220_v15, 0.0  ;;  %v2165_v61 = vmax.f32 %v5554_v45, %v2116_v16  ;;  %v5560_v16 = vmax.f32 %v4675_v11, %v4677_v32 }
 0x1ea   :  { %v1389_v62 = vpop.f32.mrb[134].mxu0  ;;  %v1896_v35 = vpop.f32.mrb[134].mxu1 }
 0x1eb   :  { %2318 = vst [vmem:[%s5436_s3 + $0x80] sm:$0xff] %v2269_v59  ;;  %v2221_v37 = vadd.f32 %v5088_v7, %v2165_v61  ;;  %v2117_v38 = vmax.f32 %v1389_v62, %v1896_v35  ;;  %v3289_v6 = vpop.f32.mrb[135].mxu0  ;;  %v3444_v17 = vpop.f32.mrb[135].mxu1  ;;  %v5561_v35 = vld [vmem:[#allocation2_spill] sm:$0xff] }
 0x1ed   :  { %v2270_v18 = vmax.f32 %v2221_v37, 0.0  ;;  %v2166_v41 = vmax.f32 %v5555_v40, %v2117_v38  ;;  %v5562_v37 = vmax.f32 %v4693_v10, %v5561_v35 }
 0x1ee   :  { %v1394_v56 = vpop.f32.mrb[136].mxu0  ;;  %v1901_v19 = vpop.f32.mrb[136].mxu1 }
 0x1ef   :  { %2319 = vst [vmem:[%s5436_s3 + $0x88] sm:$0xff] %v2270_v18  ;;  %v2222_v1 = vadd.f32 %v5088_v7, %v2166_v41  ;;  %v2118_v2 = vmax.f32 %v1394_v56, %v1901_v19  ;;  %v3292_v20 = vpop.f32.mrb[137].mxu0  ;;  %v3447_v9 = vpop.f32.mrb[137].mxu1  ;;  %v5563_v56 = vld [vmem:[#allocation3_spill] sm:$0xff]  ;;  %v5564_v19 = vld [vmem:[#allocation4_spill] sm:$0xff] }
 0x1f1   :  { %v2271_v49 = vmax.f32 %v2222_v1, 0.0  ;;  %v2167_v31 = vmax.f32 %v5556_v30, %v2118_v2  ;;  %v5565_v1 = vmax.f32 %v5563_v56, %v5564_v19 }
 0x1f2   :  { %v1399_v21 = vpop.f32.mrb[138].mxu0  ;;  %v1906_v28 = vpop.f32.mrb[138].mxu1 }
 0x1f3   :  { %2320 = vst [vmem:[%s5436_s3 + $0x90] sm:$0xff] %v2271_v49  ;;  %v2223_v36 = vadd.f32 %v5088_v7, %v2167_v31  ;;  %v2119_v46 = vmax.f32 %v1399_v21, %v1906_v28  ;;  %v3295_v47 = vpop.f32.mrb[139].mxu0  ;;  %v3450_v48 = vpop.f32.mrb[139].mxu1  ;;  %v5566_v28 = vld [vmem:[#allocation5_spill] sm:$0xff] }
 0x1f5   :  { %v2272_v4 = vmax.f32 %v2223_v36, 0.0  ;;  %v2168_v54 = vmax.f32 %v5557_v5, %v2119_v46  ;;  %v5567_v36 = vld [vmem:[#allocation6_spill] sm:$0xff] }
 0x1f6   :  { %v1404_v43 = vpop.f32.mrb[140].mxu0  ;;  %v1911_v44 = vpop.f32.mrb[140].mxu1  ;;  %v5568_v46 = vmax.f32 %v5566_v28, %v5567_v36 }
 0x1f7   :  { %2321 = vst [vmem:[%s5436_s3 + $0x98] sm:$0xff] %v2272_v4  ;;  %v2224_v51 = vadd.f32 %v5088_v7, %v2168_v54  ;;  %v2120_v52 = vmax.f32 %v1404_v43, %v1911_v44  ;;  %v3298_v26 = vpop.f32.mrb[141].mxu0  ;;  %v3453_v27 = vpop.f32.mrb[141].mxu1 }
 0x1f8   :  { %v5570_v26 = vld [vmem:[#allocation8_spill] sm:$0xff] }
 0x1f9   :  { %v2273_v55 = vmax.f32 %v2224_v51, 0.0  ;;  %v2169_v57 = vmax.f32 %v5558_v23, %v2120_v52  ;;  %v5569_v52 = vld [vmem:[#allocation7_spill] sm:$0xff] }
 0x1fa   :  { %v1409_v58 = vpop.f32.mrb[142].mxu0  ;;  %v1916_v22 = vpop.f32.mrb[142].mxu1  ;;  %v5571_v27 = vmax.f32 %v5569_v52, %v5570_v26 }
 0x1fb   :  { %2322 = vst [vmem:[%s5436_s3 + $0xa0] sm:$0xff] %v2273_v55  ;;  %v2225_v29 = vadd.f32 %v5088_v7, %v2169_v57  ;;  %v2121_v50 = vmax.f32 %v1409_v58, %v1916_v22  ;;  %v3301_v53 = vpop.f32.mrb[143].mxu0  ;;  %v3456_v60 = vpop.f32.mrb[143].mxu1 }
 0x1fc   :  { %v5572_v60 = vld [vmem:[#allocation9_spill] sm:$0xff] }
 0x1fd   :  { %v2274_v63 = vmax.f32 %v2225_v29, 0.0  ;;  %v2170_v14 = vmax.f32 %v5559_v42, %v2121_v50 }
 0x1fe   :  { %v1414_v12 = vpop.f32.mrb[144].mxu0  ;;  %v1921_v33 = vpop.f32.mrb[144].mxu1 }
 0x1ff   :  { %2323 = vst [vmem:[%s5436_s3 + $0xa8] sm:$0xff] %v2274_v63  ;;  %v2226_v24 = vadd.f32 %v5088_v7, %v2170_v14  ;;  %v2122_v39 = vmax.f32 %v1414_v12, %v1921_v33  ;;  %v3304_v34 = vpop.f32.mrb[145].mxu0  ;;  %v3459_v3 = vpop.f32.mrb[145].mxu1  ;;  %v5573_v63 = vld [vmem:[#allocation10_spill] sm:$0xff] }
 0x200   :  { %v5574_v42 = vmax.f32 %v5572_v60, %v5573_v63 }
 0x201   :  { %v2275_v15 = vmax.f32 %v2226_v24, 0.0  ;;  %v2171_v8 = vmax.f32 %v5560_v16, %v2122_v39  ;;  %v5575_v16 = vld [vmem:[#allocation11_spill] sm:$0xff] }
 0x202   :  { %v1419_v13 = vpop.f32.mrb[146].mxu0  ;;  %v1926_v59 = vpop.f32.mrb[146].mxu1 }
 0x203   :  { %2324 = vst [vmem:[%s5436_s3 + $0xb0] sm:$0xff] %v2275_v15  ;;  %v2227_v25 = vadd.f32 %v5088_v7, %v2171_v8  ;;  %v2123_v0 = vmax.f32 %v1419_v13, %v1926_v59  ;;  %v3307_v45 = vpop.f32.mrb[147].mxu0  ;;  %v3462_v61 = vpop.f32.mrb[147].mxu1  ;;  %v5576_v8 = vld [vmem:[#allocation12_spill] sm:$0xff] }
 0x204   :  { %v5577_v13 = vmax.f32 %v5575_v16, %v5576_v8 }
 0x205   :  { %v2276_v62 = vmax.f32 %v2227_v25, 0.0  ;;  %v2172_v38 = vmax.f32 %v5562_v37, %v2123_v0 }
 0x206   :  { %v1424_v6 = vpop.f32.mrb[148].mxu0  ;;  %v1931_v17 = vpop.f32.mrb[148].mxu1 }
 0x207   :  { %2325 = vst [vmem:[%s5436_s3 + $0xb8] sm:$0xff] %v2276_v62  ;;  %v2228_v11 = vadd.f32 %v5088_v7, %v2172_v38  ;;  %v2124_v32 = vmax.f32 %v1424_v6, %v1931_v17  ;;  %v3310_v18 = vpop.f32.mrb[149].mxu0  ;;  %v3465_v40 = vpop.f32.mrb[149].mxu1  ;;  %v5578_v38 = vld [vmem:[#allocation13_spill] sm:$0xff]  ;;  %v5579_v6 = vld [vmem:[#allocation14_spill] sm:$0xff] }
 0x208   :  { %v5580_v17 = vmax.f32 %v5578_v38, %v5579_v6 }
 0x209   :  { %v2277_v41 = vmax.f32 %v2228_v11, 0.0  ;;  %v2173_v2 = vmax.f32 %v5565_v1, %v2124_v32 }
 0x20a   :  { %v1429_v20 = vpop.f32.mrb[150].mxu0  ;;  %v1936_v9 = vpop.f32.mrb[150].mxu1 }
 0x20b   :  { %2326 = vst [vmem:[%s5436_s3 + $0xc0] sm:$0xff] %v2277_v41  ;;  %v2229_v10 = vadd.f32 %v5088_v7, %v2173_v2  ;;  %v2125_v49 = vmax.f32 %v1429_v20, %v1936_v9  ;;  %v3313_v30 = vpop.f32.mrb[151].mxu0  ;;  %v3468_v31 = vpop.f32.mrb[151].mxu1  ;;  %v5581_v2 = vld [vmem:[#allocation15_spill] sm:$0xff]  ;;  %v5582_v20 = vld [vmem:[#allocation16_spill] sm:$0xff] }
 0x20c   :  { %v5583_v9 = vmax.f32 %v5581_v2, %v5582_v20 }
 0x20d   :  { %v2278_v21 = vmax.f32 %v2229_v10, 0.0  ;;  %v2174_v47 = vmax.f32 %v5568_v46, %v2125_v49 }
 0x20e   :  { %v1434_v48 = vpop.f32.mrb[152].mxu0  ;;  %v1941_v4 = vpop.f32.mrb[152].mxu1 }
 0x20f   :  { %2327 = vst [vmem:[%s5436_s3 + $0xc8] sm:$0xff] %v2278_v21  ;;  %v2230_v5 = vadd.f32 %v5088_v7, %v2174_v47  ;;  %v2126_v54 = vmax.f32 %v1434_v48, %v1941_v4  ;;  %v3316_v43 = vpop.f32.mrb[153].mxu0  ;;  %v3471_v44 = vpop.f32.mrb[153].mxu1  ;;  %v5584_v47 = vld [vmem:[#allocation17_spill] sm:$0xff]  ;;  %v5585_v48 = vld [vmem:[#allocation18_spill] sm:$0xff] }
 0x210   :  { %v5586_v4 = vmax.f32 %v5584_v47, %v5585_v48 }
 0x211   :  { %v2279_v51 = vmax.f32 %v2230_v5, 0.0  ;;  %v2175_v55 = vmax.f32 %v5571_v27, %v2126_v54 }
 0x212   :  { %v1439_v23 = vpop.f32.mrb[154].mxu0  ;;  %v1946_v57 = vpop.f32.mrb[154].mxu1 }
 0x213   :  { %2328 = vst [vmem:[%s5436_s3 + $0xd0] sm:$0xff] %v2279_v51  ;;  %v2231_v58 = vadd.f32 %v5088_v7, %v2175_v55  ;;  %v2127_v22 = vmax.f32 %v1439_v23, %v1946_v57  ;;  %v3319_v29 = vpop.f32.mrb[155].mxu0  ;;  %v3474_v50 = vpop.f32.mrb[155].mxu1  ;;  %v5587_v55 = vld [vmem:[#allocation19_spill] sm:$0xff]  ;;  %v5588_v23 = vld [vmem:[#allocation20_spill] sm:$0xff] }
 0x214   :  { %v5589_v57 = vmax.f32 %v5587_v55, %v5588_v23 }
 0x215   :  { %v2280_v53 = vmax.f32 %v2231_v58, 0.0  ;;  %v2176_v14 = vmax.f32 %v5574_v42, %v2127_v22 }
 0x216   :  { %v1444_v12 = vpop.f32.mrb[156].mxu0  ;;  %v1951_v33 = vpop.f32.mrb[156].mxu1 }
 0x217   :  { %2329 = vst [vmem:[%s5436_s3 + $0xd8] sm:$0xff] %v2280_v53  ;;  %v2232_v24 = vadd.f32 %v5088_v7, %v2176_v14  ;;  %v2128_v39 = vmax.f32 %v1444_v12, %v1951_v33  ;;  %v3322_v34 = vpop.f32.mrb[157].mxu0  ;;  %v3477_v3 = vpop.f32.mrb[157].mxu1  ;;  %v5590_v14 = vld [vmem:[#allocation21_spill] sm:$0xff]  ;;  %v5591_v12 = vld [vmem:[#allocation22_spill] sm:$0xff] }
 0x218   :  { %v5592_v33 = vmax.f32 %v5590_v14, %v5591_v12 }
 0x219   :  { %v2281_v15 = vmax.f32 %v2232_v24, 0.0  ;;  %v2177_v59 = vmax.f32 %v5577_v13, %v2128_v39 }
 0x21a   :  { %v1449_v25 = vpop.f32.mrb[158].mxu0  ;;  %v1956_v0 = vpop.f32.mrb[158].mxu1 }
 0x21b   :  { %2330 = vst [vmem:[%s5436_s3 + $0xe0] sm:$0xff] %v2281_v15  ;;  %v2233_v45 = vadd.f32 %v5088_v7, %v2177_v59  ;;  %v2129_v61 = vmax.f32 %v1449_v25, %v1956_v0  ;;  %v3325_v62 = vpop.f32.mrb[159].mxu0  ;;  %v3480_v35 = vpop.f32.mrb[159].mxu1  ;;  %v5593_v59 = vld [vmem:[#allocation23_spill] sm:$0xff]  ;;  %v5594_v25 = vld [vmem:[#allocation24_spill] sm:$0xff] }
 0x21c   :  { %v5595_v0 = vmax.f32 %v5593_v59, %v5594_v25 }
 0x21d   :  { %v2282_v37 = vmax.f32 %v2233_v45, 0.0  ;;  %v2178_v11 = vmax.f32 %v5580_v17, %v2129_v61 }
 0x21e   :  { %v1454_v32 = vpop.f32.mrb[160].mxu0  ;;  %v1961_v18 = vpop.f32.mrb[160].mxu1 }
 0x21f   :  { %2331 = vst [vmem:[%s5436_s3 + $0xe8] sm:$0xff] %v2282_v37  ;;  %v2234_v40 = vadd.f32 %v5088_v7, %v2178_v11  ;;  %v2130_v41 = vmax.f32 %v1454_v32, %v1961_v18  ;;  %v3328_v56 = vpop.f32.mrb[161].mxu0  ;;  %v3483_v19 = vpop.f32.mrb[161].mxu1  ;;  %v5596_v11 = vld [vmem:[#allocation25_spill] sm:$0xff]  ;;  %v5597_v32 = vld [vmem:[#allocation26_spill] sm:$0xff] }
 0x220   :  { %v5598_v18 = vmax.f32 %v5596_v11, %v5597_v32 }
 0x221   :  { %v2283_v1 = vmax.f32 %v2234_v40, 0.0  ;;  %v2179_v10 = vmax.f32 %v5583_v9, %v2130_v41 }
 0x222   :  { %v1459_v49 = vpop.f32.mrb[162].mxu0  ;;  %v1966_v30 = vpop.f32.mrb[162].mxu1 }
 0x223   :  { %2332 = vst [vmem:[%s5436_s3 + $0xf0] sm:$0xff] %v2283_v1  ;;  %v2235_v31 = vadd.f32 %v5088_v7, %v2179_v10  ;;  %v2131_v21 = vmax.f32 %v1459_v49, %v1966_v30  ;;  %v3331_v28 = vpop.f32.mrb[163].mxu0  ;;  %v3486_v36 = vpop.f32.mrb[163].mxu1  ;;  %v5599_v10 = vld [vmem:[#allocation27_spill] sm:$0xff]  ;;  %v5600_v49 = vld [vmem:[#allocation28_spill] sm:$0xff] }
 0x224   :  { %v5601_v30 = vmax.f32 %v5599_v10, %v5600_v49 }
 0x225   :  { %v2284_v46 = vmax.f32 %v2235_v31, 0.0  ;;  %v2180_v5 = vmax.f32 %v5586_v4, %v2131_v21 }
 0x226   :  { %v1464_v54 = vpop.f32.mrb[164].mxu0  ;;  %v1971_v43 = vpop.f32.mrb[164].mxu1 }
 0x227   :  { %2333 = vst [vmem:[%s5436_s3 + $0xf8] sm:$0xff] %v2284_v46  ;;  %v2236_v44 = vadd.f32 %v5088_v7, %v2180_v5  ;;  %v2132_v51 = vmax.f32 %v1464_v54, %v1971_v43  ;;  %v3334_v52 = vpop.f32.mrb[165].mxu0  ;;  %v3489_v26 = vpop.f32.mrb[165].mxu1  ;;  %v5602_v5 = vld [vmem:[#allocation29_spill] sm:$0xff]  ;;  %v5603_v54 = vld [vmem:[#allocation30_spill] sm:$0xff] }
 0x228   :  { %v5604_v43 = vmax.f32 %v5602_v5, %v5603_v54 }
 0x229   :  { %v2285_v27 = vmax.f32 %v2236_v44, 0.0  ;;  %v2181_v58 = vmax.f32 %v5589_v57, %v2132_v51 }
 0x22a   :  { %v1469_v22 = vpop.f32.mrb[166].mxu0  ;;  %v1976_v29 = vpop.f32.mrb[166].mxu1 }
 0x22b   :  { %2334 = vst [vmem:[%s5436_s3 + $0x100] sm:$0xff] %v2285_v27  ;;  %v2237_v50 = vadd.f32 %v5088_v7, %v2181_v58  ;;  %v2133_v53 = vmax.f32 %v1469_v22, %v1976_v29  ;;  %v3337_v60 = vpop.f32.mrb[167].mxu0  ;;  %v3492_v63 = vpop.f32.mrb[167].mxu1  ;;  %v5605_v58 = vld [vmem:[#allocation31_spill] sm:$0xff]  ;;  %v5606_v22 = vld [vmem:[#allocation32_spill] sm:$0xff] }
 0x22c   :  { %v5607_v29 = vmax.f32 %v5605_v58, %v5606_v22 }
 0x22d   :  { %v2286_v42 = vmax.f32 %v2237_v50, 0.0  ;;  %v2182_v24 = vmax.f32 %v5592_v33, %v2133_v53 }
 0x22e   :  { %v1474_v39 = vpop.f32.mrb[168].mxu0  ;;  %v1981_v34 = vpop.f32.mrb[168].mxu1 }
 0x22f   :  { %2335 = vst [vmem:[%s5436_s3 + $0x108] sm:$0xff] %v2286_v42  ;;  %v2238_v3 = vadd.f32 %v5088_v7, %v2182_v24  ;;  %v2134_v15 = vmax.f32 %v1474_v39, %v1981_v34  ;;  %v3340_v16 = vpop.f32.mrb[169].mxu0  ;;  %v3495_v8 = vpop.f32.mrb[169].mxu1  ;;  %v5608_v24 = vld [vmem:[#allocation33_spill] sm:$0xff]  ;;  %v5609_v39 = vld [vmem:[#allocation34_spill] sm:$0xff] }
 0x230   :  { %v5610_v34 = vmax.f32 %v5608_v24, %v5609_v39 }
 0x231   :  { %v2287_v13 = vmax.f32 %v2238_v3, 0.0  ;;  %v2183_v45 = vmax.f32 %v5595_v0, %v2134_v15 }
 0x232   :  { %v1479_v61 = vpop.f32.mrb[170].mxu0  ;;  %v1986_v62 = vpop.f32.mrb[170].mxu1 }
 0x233   :  { %2336 = vst [vmem:[%s5436_s3 + $0x110] sm:$0xff] %v2287_v13  ;;  %v2239_v35 = vadd.f32 %v5088_v7, %v2183_v45  ;;  %v2135_v37 = vmax.f32 %v1479_v61, %v1986_v62  ;;  %v3343_v38 = vpop.f32.mrb[171].mxu0  ;;  %v3498_v6 = vpop.f32.mrb[171].mxu1  ;;  %v5611_v45 = vld [vmem:[#allocation35_spill] sm:$0xff]  ;;  %v5612_v61 = vld [vmem:[#allocation36_spill] sm:$0xff] }
 0x234   :  { %v5613_v62 = vmax.f32 %v5611_v45, %v5612_v61 }
 0x235   :  { %v2288_v17 = vmax.f32 %v2239_v35, 0.0  ;;  %v2184_v40 = vmax.f32 %v5598_v18, %v2135_v37 }
 0x236   :  { %v1484_v41 = vpop.f32.mrb[172].mxu0  ;;  %v1991_v56 = vpop.f32.mrb[172].mxu1 }
 0x237   :  { %2337 = vst [vmem:[%s5436_s3 + $0x118] sm:$0xff] %v2288_v17  ;;  %v2240_v19 = vadd.f32 %v5088_v7, %v2184_v40  ;;  %v2136_v1 = vmax.f32 %v1484_v41, %v1991_v56  ;;  %v3346_v2 = vpop.f32.mrb[173].mxu0  ;;  %v3501_v20 = vpop.f32.mrb[173].mxu1  ;;  %v5614_v40 = vld [vmem:[#allocation37_spill] sm:$0xff]  ;;  %v5615_v41 = vld [vmem:[#allocation38_spill] sm:$0xff] }
 0x238   :  { %v5616_v56 = vmax.f32 %v5614_v40, %v5615_v41 }
 0x239   :  { %v2289_v9 = vmax.f32 %v2240_v19, 0.0  ;;  %v2185_v31 = vmax.f32 %v5601_v30, %v2136_v1 }
 0x23a   :  { %v1489_v21 = vpop.f32.mrb[174].mxu0  ;;  %v1996_v28 = vpop.f32.mrb[174].mxu1 }
 0x23b   :  { %2338 = vst [vmem:[%s5436_s3 + $0x120] sm:$0xff] %v2289_v9  ;;  %v2241_v36 = vadd.f32 %v5088_v7, %v2185_v31  ;;  %v2137_v46 = vmax.f32 %v1489_v21, %v1996_v28  ;;  %v3349_v47 = vpop.f32.mrb[175].mxu0  ;;  %v3504_v48 = vpop.f32.mrb[175].mxu1  ;;  %v5617_v31 = vld [vmem:[#allocation39_spill] sm:$0xff]  ;;  %v5618_v21 = vld [vmem:[#allocation40_spill] sm:$0xff] }
 0x23c   :  { %v5619_v28 = vmax.f32 %v5617_v31, %v5618_v21 }
 0x23d   :  { %v2290_v4 = vmax.f32 %v2241_v36, 0.0  ;;  %v2186_v44 = vmax.f32 %v5604_v43, %v2137_v46 }
 0x23e   :  { %v1494_v51 = vpop.f32.mrb[176].mxu0  ;;  %v2001_v52 = vpop.f32.mrb[176].mxu1 }
 0x23f   :  { %2339 = vst [vmem:[%s5436_s3 + $0x128] sm:$0xff] %v2290_v4  ;;  %v2242_v26 = vadd.f32 %v5088_v7, %v2186_v44  ;;  %v2138_v27 = vmax.f32 %v1494_v51, %v2001_v52  ;;  %v3352_v55 = vpop.f32.mrb[177].mxu0  ;;  %v3507_v23 = vpop.f32.mrb[177].mxu1  ;;  %v5620_v44 = vld [vmem:[#allocation41_spill] sm:$0xff]  ;;  %v5621_v51 = vld [vmem:[#allocation42_spill] sm:$0xff] }
 0x240   :  { %v5622_v52 = vmax.f32 %v5620_v44, %v5621_v51 }
 0x241   :  { %v2291_v57 = vmax.f32 %v2242_v26, 0.0  ;;  %v2187_v50 = vmax.f32 %v5607_v29, %v2138_v27 }
 0x242   :  { %v1499_v53 = vpop.f32.mrb[178].mxu0  ;;  %v2006_v60 = vpop.f32.mrb[178].mxu1 }
 0x243   :  { %2340 = vst [vmem:[%s5436_s3 + $0x130] sm:$0xff] %v2291_v57  ;;  %v2243_v63 = vadd.f32 %v5088_v7, %v2187_v50  ;;  %v2139_v42 = vmax.f32 %v1499_v53, %v2006_v60  ;;  %v3355_v14 = vpop.f32.mrb[179].mxu0  ;;  %v3510_v12 = vpop.f32.mrb[179].mxu1  ;;  %v5623_v50 = vld [vmem:[#allocation43_spill] sm:$0xff]  ;;  %v5624_v53 = vld [vmem:[#allocation44_spill] sm:$0xff] }
 0x244   :  { %v5625_v60 = vmax.f32 %v5623_v50, %v5624_v53 }
 0x245   :  { %v2292_v33 = vmax.f32 %v2243_v63, 0.0  ;;  %v2188_v3 = vmax.f32 %v5610_v34, %v2139_v42 }
 0x246   :  { %v1504_v15 = vpop.f32.mrb[180].mxu0  ;;  %v2011_v16 = vpop.f32.mrb[180].mxu1 }
 0x247   :  { %2341 = vst [vmem:[%s5436_s3 + $0x138] sm:$0xff] %v2292_v33  ;;  %v2244_v8 = vadd.f32 %v5088_v7, %v2188_v3  ;;  %v2140_v13 = vmax.f32 %v1504_v15, %v2011_v16  ;;  %v3358_v59 = vpop.f32.mrb[181].mxu0  ;;  %v3513_v25 = vpop.f32.mrb[181].mxu1  ;;  %v5626_v3 = vld [vmem:[#allocation45_spill] sm:$0xff]  ;;  %v5627_v15 = vld [vmem:[#allocation46_spill] sm:$0xff] }
 0x248   :  { %v5628_v16 = vmax.f32 %v5626_v3, %v5627_v15 }
 0x249   :  { %v2293_v0 = vmax.f32 %v2244_v8, 0.0  ;;  %v2189_v35 = vmax.f32 %v5613_v62, %v2140_v13 }
 0x24a   :  { %v1509_v37 = vpop.f32.mrb[182].mxu0  ;;  %v2016_v38 = vpop.f32.mrb[182].mxu1 }
 0x24b   :  { %2342 = vst [vmem:[%s5436_s3 + $0x140] sm:$0xff] %v2293_v0  ;;  %v2245_v6 = vadd.f32 %v5088_v7, %v2189_v35  ;;  %v2141_v17 = vmax.f32 %v1509_v37, %v2016_v38  ;;  %v3361_v11 = vpop.f32.mrb[183].mxu0  ;;  %v3516_v32 = vpop.f32.mrb[183].mxu1  ;;  %v5629_v35 = vld [vmem:[#allocation47_spill] sm:$0xff]  ;;  %v5630_v37 = vld [vmem:[#allocation48_spill] sm:$0xff] }
 0x24c   :  { %v5631_v38 = vmax.f32 %v5629_v35, %v5630_v37 }
 0x24d   :  { %v2294_v18 = vmax.f32 %v2245_v6, 0.0  ;;  %v2190_v19 = vmax.f32 %v5616_v56, %v2141_v17 }
 0x24e   :  { %v1514_v1 = vpop.f32.mrb[184].mxu0  ;;  %v2021_v2 = vpop.f32.mrb[184].mxu1 }
 0x24f   :  { %2343 = vst [vmem:[%s5436_s3 + $0x148] sm:$0xff] %v2294_v18  ;;  %v2246_v20 = vadd.f32 %v5088_v7, %v2190_v19  ;;  %v2142_v9 = vmax.f32 %v1514_v1, %v2021_v2  ;;  %v3364_v10 = vpop.f32.mrb[185].mxu0  ;;  %v3519_v49 = vpop.f32.mrb[185].mxu1  ;;  %v5632_v19 = vld [vmem:[#allocation49_spill] sm:$0xff]  ;;  %v5633_v1 = vld [vmem:[#allocation50_spill] sm:$0xff] }
 0x250   :  { %v5634_v2 = vmax.f32 %v5632_v19, %v5633_v1 }
 0x251   :  { %v2295_v30 = vmax.f32 %v2246_v20, 0.0  ;;  %v2191_v36 = vmax.f32 %v5619_v28, %v2142_v9 }
 0x252   :  { %v1519_v46 = vpop.f32.mrb[186].mxu0  ;;  %v2026_v47 = vpop.f32.mrb[186].mxu1 }
 0x253   :  { %2344 = vst [vmem:[%s5436_s3 + $0x150] sm:$0xff] %v2295_v30  ;;  %v2247_v48 = vadd.f32 %v5088_v7, %v2191_v36  ;;  %v2143_v4 = vmax.f32 %v1519_v46, %v2026_v47  ;;  %v3367_v5 = vpop.f32.mrb[187].mxu0  ;;  %v3522_v54 = vpop.f32.mrb[187].mxu1 }
 0x255   :  { %v2296_v43 = vmax.f32 %v2247_v48, 0.0  ;;  %v2192_v26 = vmax.f32 %v5622_v52, %v2143_v4 }
 0x256   :  { %v1524_v27 = vpop.f32.mrb[188].mxu0  ;;  %v2031_v55 = vpop.f32.mrb[188].mxu1 }
 0x257   :  { %2345 = vst [vmem:[%s5436_s3 + $0x158] sm:$0xff] %v2296_v43  ;;  %v2248_v23 = vadd.f32 %v5088_v7, %v2192_v26  ;;  %v2144_v57 = vmax.f32 %v1524_v27, %v2031_v55  ;;  %v3370_v58 = vpop.f32.mrb[189].mxu0  ;;  %v3525_v22 = vpop.f32.mrb[189].mxu1 }
 0x259   :  { %v2297_v29 = vmax.f32 %v2248_v23, 0.0  ;;  %v2193_v63 = vmax.f32 %v5625_v60, %v2144_v57 }
 0x25a   :  { %v1529_v42 = vpop.f32.mrb[190].mxu0  ;;  %v2036_v14 = vpop.f32.mrb[190].mxu1 }
 0x25b   :  { %2346 = vst [vmem:[%s5436_s3 + $0x160] sm:$0xff] %v2297_v29  ;;  %v2249_v12 = vadd.f32 %v5088_v7, %v2193_v63  ;;  %v2145_v33 = vmax.f32 %v1529_v42, %v2036_v14  ;;  %v3373_v24 = vpop.f32.mrb[191].mxu0  ;;  %v3528_v39 = vpop.f32.mrb[191].mxu1 }
 0x25d   :  { %v2298_v34 = vmax.f32 %v2249_v12, 0.0  ;;  %v2194_v8 = vmax.f32 %v5628_v16, %v2145_v33 }
 0x25e   :  { %v1534_v13 = vpop.f32.mrb[192].mxu0  ;;  %v2041_v59 = vpop.f32.mrb[192].mxu1 }
 0x25f   :  { %2347 = vst [vmem:[%s5436_s3 + $0x168] sm:$0xff] %v2298_v34  ;;  %v2250_v25 = vadd.f32 %v5088_v7, %v2194_v8  ;;  %v2146_v0 = vmax.f32 %v1534_v13, %v2041_v59  ;;  %v3376_v45 = vpop.f32.mrb[193].mxu0  ;;  %v3531_v61 = vpop.f32.mrb[193].mxu1 }
 0x261   :  { %v2299_v62 = vmax.f32 %v2250_v25, 0.0  ;;  %v2195_v6 = vmax.f32 %v5631_v38, %v2146_v0 }
 0x262   :  { %v1539_v17 = vpop.f32.mrb[194].mxu0  ;;  %v2046_v11 = vpop.f32.mrb[194].mxu1 }
 0x263   :  { %2348 = vst [vmem:[%s5436_s3 + $0x170] sm:$0xff] %v2299_v62  ;;  %v2251_v32 = vadd.f32 %v5088_v7, %v2195_v6  ;;  %v2147_v18 = vmax.f32 %v1539_v17, %v2046_v11  ;;  %v3379_v40 = vpop.f32.mrb[195].mxu0  ;;  %v3534_v41 = vpop.f32.mrb[195].mxu1 }
 0x265   :  { %v2300_v56 = vmax.f32 %v2251_v32, 0.0  ;;  %v2196_v20 = vmax.f32 %v5634_v2, %v2147_v18 }
 0x267   :  { %2349 = vst [vmem:[%s5436_s3 + $0x178] sm:$0xff] %v2300_v56  ;;  %v2252_v9 = vadd.f32 %v5088_v7, %v2196_v20 }
 0x269   :  { %v2301_v10 = vmax.f32 %v2252_v9, 0.0 }
 0x26b   :  { %2350 = vst [vmem:[%s5436_s3 + $0x180] sm:$0xff] %v2301_v10 }

// kernel: net_forward.4
= control target key start
LH: loop header
LB: loop body
LE: loop exit
PB: predicated region body
PF: predicated region fallthrough
CT: control target
= control target key end

     0   :  { %v1157_v0 = vmov 0.0|0.0   ;;  %vm1158_vm0 = vmmov 0   ;;  %v1159_v6 = vmov 0.0   ;;  %vm65_vm1 = vcmask 1043456   ;;  %s1607_s1 = inlined_call_operand.vmem [shape: f32[108,128], index: 1, kind: input, shape index: {}]   ;;  %s1608_s0 = inlined_call_operand.vmem [shape: f32[4,72,108], index: 0, kind: input, shape index: {}]   ;;  %s1609_s2 = inlined_call_operand.vmem [shape: f32[1,128], index: 2, kind: input, shape index: {}]   ;;  %s1610_s3 = inlined_call_operand.vmem [shape: f32[72,128], index: 3, kind: output, shape index: {}]  }
   0x1   :  { %1065 = vmatprep.subr.bf16.mxu0 %v1157_v0  ;;  %1087 = vmatprep.subr.bf16.mxu1 %v1157_v0  ;;  %v14_v1 = vld [vmem:[%s1607_s1] sm:$0xff]  ;;  %v15_v2 = vld [vmem:[%s1607_s1 + $0x8] sm:$0xff]  ;;  %v16_v3 = vld [vmem:[%s1607_s1 + $0x10] sm:$0xff]  ;;  %vm1160_vm2 = vmmov 1   ;;  %vm37_vm4 = vcmask 883712  }
   0x2   :  { %v1066_v4 = vpack.c.bf16 %v15_v2, %v14_v1  ;;  %v17_v5 = vld [vmem:[%s1607_s1 + $0x18] sm:$0xff]  ;;  %873 = vmatprep.mubr.msk.f32.mxu0 %vm1158_vm0, %v1159_v6  ;;  %928 = vmatprep.mubr.msk.f32.mxu1 %vm1158_vm0, %v1159_v6  ;;  %v18_v8 = vld [vmem:[%s1607_s1 + $0x20] sm:$0xff]  ;;  %v19_v9 = vld [vmem:[%s1607_s1 + $0x28] sm:$0xff] }
   0x3   :  { %v1199_v7 = vpack.c.bf16 %v17_v5, %v16_v3  ;;  %v1211_v10 = vpack.c.bf16 %v19_v9, %v18_v8  ;;  %v20_v11 = vld [vmem:[%s1607_s1 + $0x30] sm:$0xff]  ;;  %v21_v12 = vld [vmem:[%s1607_s1 + $0x38] sm:$0xff]  ;;  %v22_v14 = vld [vmem:[%s1607_s1 + $0x40] sm:$0xff] }
   0x4   :  { %1067 = vmatpush3.bf16.msra.mxu0 %v1066_v4  ;;  %1089 = vmatpush3.bf16.msra.mxu1 %v1066_v4  ;;  %v1223_v13 = vpack.c.bf16 %v21_v12, %v20_v11  ;;  %v23_v15 = vld [vmem:[%s1607_s1 + $0x48] sm:$0xff]  ;;  %v24_v17 = vld [vmem:[%s1607_s1 + $0x50] sm:$0xff]  ;;  %v25_v18 = vld [vmem:[%s1607_s1 + $0x58] sm:$0xff] }
   0x5   :  { %1068 = vmatprep.subr.bf16.mxu0 %v1157_v0  ;;  %1090 = vmatprep.subr.bf16.mxu1 %v1157_v0  ;;  %v1235_v16 = vpack.c.bf16 %v23_v15, %v22_v14  ;;  %v1247_v19 = vpack.c.bf16 %v25_v18, %v24_v17  ;;  %v26_v20 = vld [vmem:[%s1607_s1 + $0x60] sm:$0xff]  ;;  %v27_v21 = vld [vmem:[%s1607_s1 + $0x68] sm:$0xf]  ;;  %vm1263_vm3 = vmpackc.low %vm65_vm1, %vm1160_vm2 }
   0x6   :  { %v1259_v22 = vpack.c.bf16 %v27_v21, %v26_v20  ;;  %v28_v24 = vld [vmem:[%s1608_s0] sm:$0xff]  ;;  %v695_v25 = vld [vmem:[%s1608_s0 + $0x48] sm:$0xff]  ;;  %v696_v27 = vld [vmem:[%s1608_s0 + $0x50] sm:$0xff] }
   0x7   :  { %v29_v26 = vld [vmem:[%s1608_s0 + $0x8] sm:$0xff]  ;;  %v30_v28 = vld [vmem:[%s1608_s0 + $0x10] sm:$0xff]  ;;  %v697_v29 = vld [vmem:[%s1608_s0 + $0x58] sm:$0xff] }
   0x8   :  { %1070 = vmatpush3.bf16.msra.mxu0 %v1199_v7  ;;  %1092 = vmatpush3.bf16.msra.mxu1 %v1199_v7  ;;  %v31_v30 = vld [vmem:[%s1608_s0 + $0x18] sm:$0xff]  ;;  %v698_v31 = vld [vmem:[%s1608_s0 + $0x60] sm:$0xff]  ;;  %v699_v33 = vld [vmem:[%s1608_s0 + $0x68] sm:$0xff] }
   0x9   :  { %1071 = vmatprep.subr.bf16.mxu0 %v1157_v0  ;;  %1093 = vmatprep.subr.bf16.mxu1 %v1157_v0  ;;  %v32_v32 = vld [vmem:[%s1608_s0 + $0x20] sm:$0xff]  ;;  %v33_v34 = vld [vmem:[%s1608_s0 + $0x28] sm:$0xff]  ;;  %v700_v35 = vld [vmem:[%s1608_s0 + $0x70] sm:$0xff] }
   0xa   :  { %v34_v36 = vld [vmem:[%s1608_s0 + $0x30] sm:$0xff]  ;;  %v701_v37 = vld [vmem:[%s1608_s0 + $0x78] sm:$0xff]  ;;  %v702_v39 = vld [vmem:[%s1608_s0 + $0x80] sm:$0xff] }
   0xb   :  { %v35_v38 = vld [vmem:[%s1608_s0 + $0x38] sm:$0xff]  ;;  %v36_v40 = vld [vmem:[%s1608_s0 + $0x40] sm:$0xff]  ;;  %v703_v41 = vld [vmem:[%s1608_s0 + $0x88] sm:$0xff] }
   0xc   :  { %1073 = vmatpush3.bf16.msra.mxu0 %v1211_v10  ;;  %1095 = vmatpush3.bf16.msra.mxu1 %v1211_v10  ;;  %v714_v42 = vld [vmem:[%s1608_s0 + $0x90] sm:$0xff]  ;;  %v733_v43 = vld [vmem:[%s1608_s0 + $0xd8] sm:$0xff]  ;;  %v734_v45 = vld [vmem:[%s1608_s0 + $0xe0] sm:$0xff] }
   0xd   :  { %1074 = vmatprep.subr.bf16.mxu0 %v1157_v0  ;;  %1096 = vmatprep.subr.bf16.mxu1 %v1157_v0  ;;  %v715_v44 = vld [vmem:[%s1608_s0 + $0x98] sm:$0xff]  ;;  %v716_v46 = vld [vmem:[%s1608_s0 + $0xa0] sm:$0xff]  ;;  %v735_v47 = vld [vmem:[%s1608_s0 + $0xe8] sm:$0xff] }
   0xe   :  { %v717_v48 = vld [vmem:[%s1608_s0 + $0xa8] sm:$0xff]  ;;  %v736_v49 = vld [vmem:[%s1608_s0 + $0xf0] sm:$0xff]  ;;  %v737_v51 = vld [vmem:[%s1608_s0 + $0xf8] sm:$0xff] }
   0xf   :  { %v718_v50 = vld [vmem:[%s1608_s0 + $0xb0] sm:$0xff]  ;;  %v719_v52 = vld [vmem:[%s1608_s0 + $0xb8] sm:$0xff]  ;;  %v738_v53 = vld [vmem:[%s1608_s0 + $0x100] sm:$0xff] }
  0x10   :  { %1076 = vmatpush3.bf16.msra.mxu0 %v1223_v13  ;;  %1098 = vmatpush3.bf16.msra.mxu1 %v1223_v13  ;;  %v720_v54 = vld [vmem:[%s1608_s0 + $0xc0] sm:$0xff]  ;;  %v739_v55 = vld [vmem:[%s1608_s0 + $0x108] sm:$0xff]  ;;  %v740_v57 = vld [vmem:[%s1608_s0 + $0x110] sm:$0xff] }
  0x11   :  { %1077 = vmatprep.subr.bf16.mxu0 %v1157_v0  ;;  %1099 = vmatprep.subr.bf16.mxu1 %v1157_v0  ;;  %v721_v56 = vld [vmem:[%s1608_s0 + $0xc8] sm:$0xff]  ;;  %v722_v58 = vld [vmem:[%s1608_s0 + $0xd0] sm:$0xff]  ;;  %v741_v59 = vld [vmem:[%s1608_s0 + $0x118] sm:$0xff] }
  0x14   :  { %1079 = vmatpush3.bf16.msra.mxu0 %v1235_v16  ;;  %1101 = vmatpush3.bf16.msra.mxu1 %v1235_v16 }
  0x15   :  { %1080 = vmatprep.subr.bf16.mxu0 %v1157_v0  ;;  %1102 = vmatprep.subr.bf16.mxu1 %v1157_v0 }
  0x18   :  { %1082 = vmatpush3.bf16.msra.mxu0 %v1247_v19  ;;  %1104 = vmatpush3.bf16.msra.mxu1 %v1247_v19 }
  0x19   :  { %1083 = vmatprep.subr.bf16.mxu0 %v1157_v0  ;;  %1105 = vmatprep.subr.bf16.mxu1 %v1157_v0 }
  0x1c   :  { %1086 = vmatpush3.bf16.msk.msra.mxu0 %vm1263_vm3, %v1259_v22  ;;  %1108 = vmatpush3.bf16.msk.msra.mxu1 %vm1263_vm3, %v1259_v22 }
  0x1d   :  { %1109 = vmatprep.subr.bf16.mxu0 %v1157_v0  ;;  %1131 = vmatprep.subr.bf16.mxu1 %v1157_v0 }
  0x1f   :  { %874 = vmatmul.mubr.msk.f32.vlgmr.msra.gmra.mrb[0].mxu0 %vm37_vm4, %v28_v24  ;;  %929 = vmatmul.mubr.msk.f32.vlgmr.msra.gmra.mrb[0].mxu1 %vm37_vm4, %v695_v25 }
  0x20   :  { %1111 = vmatpush3.bf16.msra.mxu0 %v1066_v4  ;;  %1133 = vmatpush3.bf16.msra.mxu1 %v1066_v4 }
  0x21   :  { %876 = vmatprep.mubr.msk.f32.mxu0 %vm1158_vm0, %v1159_v6  ;;  %931 = vmatprep.mubr.msk.f32.mxu1 %vm1158_vm0, %v1159_v6 }
  0x22   :  { %1112 = vmatprep.subr.bf16.mxu0 %v1157_v0  ;;  %1134 = vmatprep.subr.bf16.mxu1 %v1157_v0 }
  0x23   :  { %877 = vmatmul.mubr.msk.f32.gmra.mrb[2].mxu0 %vm37_vm4, %v29_v26  ;;  %932 = vmatmul.mubr.msk.f32.gmra.mrb[2].mxu1 %vm37_vm4, %v696_v27 }
  0x24   :  { %879 = vmatprep.mubr.msk.f32.mxu0 %vm1158_vm0, %v1159_v6  ;;  %934 = vmatprep.mubr.msk.f32.mxu1 %vm1158_vm0, %v1159_v6 }
  0x25   :  { %1114 = vmatpush3.bf16.msra.mxu0 %v1199_v7  ;;  %1136 = vmatpush3.bf16.msra.mxu1 %v1199_v7 }
  0x26   :  { %1115 = vmatprep.subr.bf16.mxu0 %v1157_v0  ;;  %1137 = vmatprep.subr.bf16.mxu1 %v1157_v0 }
  0x27   :  { %880 = vmatmul.mubr.msk.f32.gmra.mrb[4].mxu0 %vm37_vm4, %v30_v28  ;;  %935 = vmatmul.mubr.msk.f32.gmra.mrb[4].mxu1 %vm37_vm4, %v697_v29 }
  0x28   :  { %882 = vmatprep.mubr.msk.f32.mxu0 %vm1158_vm0, %v1159_v6  ;;  %937 = vmatprep.mubr.msk.f32.mxu1 %vm1158_vm0, %v1159_v6 }
  0x29   :  { %1117 = vmatpush3.bf16.msra.mxu0 %v1211_v10  ;;  %1139 = vmatpush3.bf16.msra.mxu1 %v1211_v10 }
  0x2a   :  { %1118 = vmatprep.subr.bf16.mxu0 %v1157_v0  ;;  %1140 = vmatprep.subr.bf16.mxu1 %v1157_v0 }
  0x2b   :  { %883 = vmatmul.mubr.msk.f32.gmra.mrb[6].mxu0 %vm37_vm4, %v31_v30  ;;  %938 = vmatmul.mubr.msk.f32.gmra.mrb[6].mxu1 %vm37_vm4, %v698_v31 }
  0x2c   :  { %885 = vmatprep.mubr.msk.f32.mxu0 %vm1158_vm0, %v1159_v6  ;;  %940 = vmatprep.mubr.msk.f32.mxu1 %vm1158_vm0, %v1159_v6 }
  0x2d   :  { %1120 = vmatpush3.bf16.msra.mxu0 %v1223_v13  ;;  %1142 = vmatpush3.bf16.msra.mxu1 %v1223_v13 }
  0x2e   :  { %1121 = vmatprep.subr.bf16.mxu0 %v1157_v0  ;;  %1143 = vmatprep.subr.bf16.mxu1 %v1157_v0 }
  0x2f   :  { %886 = vmatmul.mubr.msk.f32.gmra.mrb[8].mxu0 %vm37_vm4, %v32_v32  ;;  %941 = vmatmul.mubr.msk.f32.gmra.mrb[8].mxu1 %vm37_vm4, %v699_v33 }
  0x30   :  { %888 = vmatprep.mubr.msk.f32.mxu0 %vm1158_vm0, %v1159_v6  ;;  %943 = vmatprep.mubr.msk.f32.mxu1 %vm1158_vm0, %v1159_v6 }
  0x31   :  { %1123 = vmatpush3.bf16.msra.mxu0 %v1235_v16  ;;  %1145 = vmatpush3.bf16.msra.mxu1 %v1235_v16 }
  0x32   :  { %1124 = vmatprep.subr.bf16.mxu0 %v1157_v0  ;;  %1146 = vmatprep.subr.bf16.mxu1 %v1157_v0 }
  0x33   :  { %889 = vmatmul.mubr.msk.f32.gmra.mrb[10].mxu0 %vm37_vm4, %v33_v34  ;;  %944 = vmatmul.mubr.msk.f32.gmra.mrb[10].mxu1 %vm37_vm4, %v700_v35 }
  0x34   :  { %891 = vmatprep.mubr.msk.f32.mxu0 %vm1158_vm0, %v1159_v6  ;;  %946 = vmatprep.mubr.msk.f32.mxu1 %vm1158_vm0, %v1159_v6 }
  0x35   :  { %1126 = vmatpush3.bf16.msra.mxu0 %v1247_v19  ;;  %1148 = vmatpush3.bf16.msra.mxu1 %v1247_v19 }
  0x36   :  { %1127 = vmatprep.subr.bf16.mxu0 %v1157_v0  ;;  %1149 = vmatprep.subr.bf16.mxu1 %v1157_v0 }
  0x37   :  { %892 = vmatmul.mubr.msk.f32.gmra.mrb[12].mxu0 %vm37_vm4, %v34_v36  ;;  %947 = vmatmul.mubr.msk.f32.gmra.mrb[12].mxu1 %vm37_vm4, %v701_v37 }
  0x38   :  { %894 = vmatprep.mubr.msk.f32.mxu0 %vm1158_vm0, %v1159_v6  ;;  %949 = vmatprep.mubr.msk.f32.mxu1 %vm1158_vm0, %v1159_v6 }
  0x39   :  { %1130 = vmatpush3.bf16.msk.msra.mxu0 %vm1263_vm3, %v1259_v22  ;;  %1152 = vmatpush3.bf16.msk.msra.mxu1 %vm1263_vm3, %v1259_v22 }
  0x3b   :  { %895 = vmatmul.mubr.msk.f32.gmra.mrb[14].mxu0 %vm37_vm4, %v35_v38  ;;  %950 = vmatmul.mubr.msk.f32.gmra.mrb[14].mxu1 %vm37_vm4, %v702_v39 }
  0x3c   :  { %897 = vmatprep.mubr.msk.f32.mxu0 %vm1158_vm0, %v1159_v6  ;;  %952 = vmatprep.mubr.msk.f32.mxu1 %vm1158_vm0, %v1159_v6 }
  0x3f   :  { %898 = vmatmul.mubr.msk.f32.gmra.mrb[16].mxu0 %vm37_vm4, %v36_v40  ;;  %953 = vmatmul.mubr.msk.f32.gmra.mrb[16].mxu1 %vm37_vm4, %v703_v41 }
  0x40   :  { %983 = vmatprep.mubr.msk.f32.mxu0 %vm1158_vm0, %v1159_v6  ;;  %1038 = vmatprep.mubr.msk.f32.mxu1 %vm1158_vm0, %v1159_v6 }
  0x43   :  { %984 = vmatmul.mubr.msk.f32.vlgmr.msra.gmra.mrb[18].mxu0 %vm37_vm4, %v714_v42  ;;  %1039 = vmatmul.mubr.msk.f32.vlgmr.msra.gmra.mrb[18].mxu1 %vm37_vm4, %v733_v43 }
  0x44   :  { %986 = vmatprep.mubr.msk.f32.mxu0 %vm1158_vm0, %v1159_v6  ;;  %1041 = vmatprep.mubr.msk.f32.mxu1 %vm1158_vm0, %v1159_v6 }
  0x47   :  { %987 = vmatmul.mubr.msk.f32.gmra.mrb[20].mxu0 %vm37_vm4, %v715_v44  ;;  %1042 = vmatmul.mubr.msk.f32.gmra.mrb[20].mxu1 %vm37_vm4, %v734_v45 }
  0x48   :  { %989 = vmatprep.mubr.msk.f32.mxu0 %vm1158_vm0, %v1159_v6  ;;  %1044 = vmatprep.mubr.msk.f32.mxu1 %vm1158_vm0, %v1159_v6 }
  0x4b   :  { %990 = vmatmul.mubr.msk.f32.gmra.mrb[22].mxu0 %vm37_vm4, %v716_v46  ;;  %1045 = vmatmul.mubr.msk.f32.gmra.mrb[22].mxu1 %vm37_vm4, %v735_v47  ;;  %v1554_v46 = vld [vmem:[%s1609_s2] ss:$0 sm:$0xff] }
  0x4c   :  { %992 = vmatprep.mubr.msk.f32.mxu0 %vm1158_vm0, %v1159_v6  ;;  %1047 = vmatprep.mubr.msk.f32.mxu1 %vm1158_vm0, %v1159_v6 }
  0x4f   :  { %993 = vmatmul.mubr.msk.f32.gmra.mrb[24].mxu0 %vm37_vm4, %v717_v48  ;;  %1048 = vmatmul.mubr.msk.f32.gmra.mrb[24].mxu1 %vm37_vm4, %v736_v49 }
  0x50   :  { %995 = vmatprep.mubr.msk.f32.mxu0 %vm1158_vm0, %v1159_v6  ;;  %1050 = vmatprep.mubr.msk.f32.mxu1 %vm1158_vm0, %v1159_v6 }
  0x53   :  { %996 = vmatmul.mubr.msk.f32.gmra.mrb[26].mxu0 %vm37_vm4, %v718_v50  ;;  %1051 = vmatmul.mubr.msk.f32.gmra.mrb[26].mxu1 %vm37_vm4, %v737_v51 }
  0x54   :  { %998 = vmatprep.mubr.msk.f32.mxu0 %vm1158_vm0, %v1159_v6  ;;  %1053 = vmatprep.mubr.msk.f32.mxu1 %vm1158_vm0, %v1159_v6 }
  0x57   :  { %999 = vmatmul.mubr.msk.f32.gmra.mrb[28].mxu0 %vm37_vm4, %v719_v52  ;;  %1054 = vmatmul.mubr.msk.f32.gmra.mrb[28].mxu1 %vm37_vm4, %v738_v53 }
  0x58   :  { %1001 = vmatprep.mubr.msk.f32.mxu0 %vm1158_vm0, %v1159_v6  ;;  %1056 = vmatprep.mubr.msk.f32.mxu1 %vm1158_vm0, %v1159_v6 }
  0x5b   :  { %1002 = vmatmul.mubr.msk.f32.gmra.mrb[30].mxu0 %vm37_vm4, %v720_v54  ;;  %1057 = vmatmul.mubr.msk.f32.gmra.mrb[30].mxu1 %vm37_vm4, %v739_v55 }
  0x5c   :  { %1004 = vmatprep.mubr.msk.f32.mxu0 %vm1158_vm0, %v1159_v6  ;;  %1059 = vmatprep.mubr.msk.f32.mxu1 %vm1158_vm0, %v1159_v6 }
  0x5f   :  { %1005 = vmatmul.mubr.msk.f32.gmra.mrb[32].mxu0 %vm37_vm4, %v721_v56  ;;  %1060 = vmatmul.mubr.msk.f32.gmra.mrb[32].mxu1 %vm37_vm4, %v740_v57 }
  0x60   :  { %1007 = vmatprep.mubr.msk.f32.mxu0 %vm1158_vm0, %v1159_v6  ;;  %1062 = vmatprep.mubr.msk.f32.mxu1 %vm1158_vm0, %v1159_v6 }
  0x63   :  { %1008 = vmatmul.mubr.msk.f32.gmra.mrb[34].mxu0 %vm37_vm4, %v722_v58  ;;  %1063 = vmatmul.mubr.msk.f32.gmra.mrb[34].mxu1 %vm37_vm4, %v741_v59 }
  0xf2   :  { %v135_v60 = vpop.f32.mrb[0].mxu0  ;;  %v282_v61 = vpop.f32.mrb[0].mxu1 }
  0xf3   :  { %v620_v62 = vmax.f32 %v135_v60, %v282_v61  ;;  %v875_v63 = vpop.f32.mrb[1].mxu0  ;;  %v930_v0 = vpop.f32.mrb[1].mxu1 }
  0xf6   :  { %v140_v1 = vpop.f32.mrb[2].mxu0  ;;  %v287_v2 = vpop.f32.mrb[2].mxu1 }
  0xf7   :  { %v621_v3 = vmax.f32 %v140_v1, %v287_v2  ;;  %v878_v4 = vpop.f32.mrb[3].mxu0  ;;  %v933_v5 = vpop.f32.mrb[3].mxu1 }
  0xfa   :  { %v145_v6 = vpop.f32.mrb[4].mxu0  ;;  %v292_v7 = vpop.f32.mrb[4].mxu1 }
  0xfb   :  { %v622_v8 = vmax.f32 %v145_v6, %v292_v7  ;;  %v881_v9 = vpop.f32.mrb[5].mxu0  ;;  %v936_v10 = vpop.f32.mrb[5].mxu1 }
  0xfe   :  { %v1515_v11 = vpop.f32.mrb[6].mxu0  ;;  %v1517_v12 = vpop.f32.mrb[6].mxu1 }
  0xff   :  { %v623_v13 = vmax.f32 %v1515_v11, %v1517_v12  ;;  %v884_v14 = vpop.f32.mrb[7].mxu0  ;;  %v939_v15 = vpop.f32.mrb[7].mxu1 }
 0x102   :  { %v1521_v16 = vpop.f32.mrb[8].mxu0  ;;  %v1523_v17 = vpop.f32.mrb[8].mxu1 }
 0x103   :  { %v624_v18 = vmax.f32 %v1521_v16, %v1523_v17  ;;  %v887_v19 = vpop.f32.mrb[9].mxu0  ;;  %v942_v20 = vpop.f32.mrb[9].mxu1 }
 0x106   :  { %v1527_v21 = vpop.f32.mrb[10].mxu0  ;;  %v1529_v22 = vpop.f32.mrb[10].mxu1 }
 0x107   :  { %v625_v23 = vmax.f32 %v1527_v21, %v1529_v22  ;;  %v890_v24 = vpop.f32.mrb[11].mxu0  ;;  %v945_v25 = vpop.f32.mrb[11].mxu1 }
 0x10a   :  { %v1533_v26 = vpop.f32.mrb[12].mxu0  ;;  %v1535_v27 = vpop.f32.mrb[12].mxu1 }
 0x10b   :  { %v626_v28 = vmax.f32 %v1533_v26, %v1535_v27  ;;  %v893_v29 = vpop.f32.mrb[13].mxu0  ;;  %v948_v30 = vpop.f32.mrb[13].mxu1 }
 0x10e   :  { %v1539_v31 = vpop.f32.mrb[14].mxu0  ;;  %v1541_v32 = vpop.f32.mrb[14].mxu1 }
 0x10f   :  { %v627_v33 = vmax.f32 %v1539_v31, %v1541_v32  ;;  %v896_v34 = vpop.f32.mrb[15].mxu0  ;;  %v951_v35 = vpop.f32.mrb[15].mxu1 }
 0x112   :  { %v1545_v36 = vpop.f32.mrb[16].mxu0  ;;  %v1547_v37 = vpop.f32.mrb[16].mxu1 }
 0x113   :  { %v628_v38 = vmax.f32 %v1545_v36, %v1547_v37  ;;  %v899_v39 = vpop.f32.mrb[17].mxu0  ;;  %v954_v40 = vpop.f32.mrb[17].mxu1 }
 0x116   :  { %v429_v41 = vpop.f32.mrb[18].mxu0  ;;  %v576_v42 = vpop.f32.mrb[18].mxu1 }
 0x117   :  { %v629_v43 = vmax.f32 %v429_v41, %v576_v42  ;;  %v985_v44 = vpop.f32.mrb[19].mxu0  ;;  %v1040_v45 = vpop.f32.mrb[19].mxu1 }
 0x119   :  { %v638_v47 = vmax.f32 %v620_v62, %v629_v43 }
 0x11a   :  { %v434_v48 = vpop.f32.mrb[20].mxu0  ;;  %v581_v49 = vpop.f32.mrb[20].mxu1 }
 0x11b   :  { %v654_v50 = vadd.f32 %v1554_v46, %v638_v47  ;;  %v630_v51 = vmax.f32 %v434_v48, %v581_v49  ;;  %v988_v52 = vpop.f32.mrb[21].mxu0  ;;  %v1043_v53 = vpop.f32.mrb[21].mxu1 }
 0x11d   :  { %v663_v54 = vmax.f32 %v654_v50, 0.0  ;;  %v639_v55 = vmax.f32 %v621_v3, %v630_v51 }
 0x11e   :  { %v439_v56 = vpop.f32.mrb[22].mxu0  ;;  %v586_v57 = vpop.f32.mrb[22].mxu1 }
 0x11f   :  { %672 = vst [vmem:[%s1610_s3] sm:$0xff] %v663_v54  ;;  %v655_v58 = vadd.f32 %v1554_v46, %v639_v55  ;;  %v631_v59 = vmax.f32 %v439_v56, %v586_v57  ;;  %v991_v60 = vpop.f32.mrb[23].mxu0  ;;  %v1046_v61 = vpop.f32.mrb[23].mxu1 }
 0x121   :  { %v664_v62 = vmax.f32 %v655_v58, 0.0  ;;  %v640_v63 = vmax.f32 %v622_v8, %v631_v59 }
 0x122   :  { %v444_v0 = vpop.f32.mrb[24].mxu0  ;;  %v591_v1 = vpop.f32.mrb[24].mxu1 }
 0x123   :  { %673 = vst [vmem:[%s1610_s3 + $0x8] sm:$0xff] %v664_v62  ;;  %v656_v2 = vadd.f32 %v1554_v46, %v640_v63  ;;  %v632_v3 = vmax.f32 %v444_v0, %v591_v1  ;;  %v994_v4 = vpop.f32.mrb[25].mxu0  ;;  %v1049_v5 = vpop.f32.mrb[25].mxu1 }
 0x125   :  { %v665_v6 = vmax.f32 %v656_v2, 0.0  ;;  %v641_v7 = vmax.f32 %v623_v13, %v632_v3 }
 0x126   :  { %v449_v9 = vpop.f32.mrb[26].mxu0  ;;  %v596_v10 = vpop.f32.mrb[26].mxu1 }
 0x127   :  { %674 = vst [vmem:[%s1610_s3 + $0x10] sm:$0xff] %v665_v6  ;;  %v657_v8 = vadd.f32 %v1554_v46, %v641_v7  ;;  %v633_v11 = vmax.f32 %v449_v9, %v596_v10  ;;  %v997_v12 = vpop.f32.mrb[27].mxu0  ;;  %v1052_v14 = vpop.f32.mrb[27].mxu1 }
 0x129   :  { %v666_v15 = vmax.f32 %v657_v8, 0.0  ;;  %v642_v19 = vmax.f32 %v624_v18, %v633_v11 }
 0x12a   :  { %v454_v20 = vpop.f32.mrb[28].mxu0  ;;  %v601_v24 = vpop.f32.mrb[28].mxu1 }
 0x12b   :  { %675 = vst [vmem:[%s1610_s3 + $0x18] sm:$0xff] %v666_v15  ;;  %v658_v13 = vadd.f32 %v1554_v46, %v642_v19  ;;  %v634_v25 = vmax.f32 %v454_v20, %v601_v24  ;;  %v1000_v29 = vpop.f32.mrb[29].mxu0  ;;  %v1055_v30 = vpop.f32.mrb[29].mxu1 }
 0x12d   :  { %v667_v34 = vmax.f32 %v658_v13, 0.0  ;;  %v643_v35 = vmax.f32 %v625_v23, %v634_v25 }
 0x12e   :  { %v459_v39 = vpop.f32.mrb[30].mxu0  ;;  %v606_v40 = vpop.f32.mrb[30].mxu1 }
 0x12f   :  { %676 = vst [vmem:[%s1610_s3 + $0x20] sm:$0xff] %v667_v34  ;;  %v659_v16 = vadd.f32 %v1554_v46, %v643_v35  ;;  %v635_v17 = vmax.f32 %v459_v39, %v606_v40  ;;  %v1003_v18 = vpop.f32.mrb[31].mxu0  ;;  %v1058_v41 = vpop.f32.mrb[31].mxu1 }
 0x131   :  { %v668_v42 = vmax.f32 %v659_v16, 0.0  ;;  %v644_v43 = vmax.f32 %v626_v28, %v635_v17 }
 0x132   :  { %v464_v44 = vpop.f32.mrb[32].mxu0  ;;  %v611_v45 = vpop.f32.mrb[32].mxu1 }
 0x133   :  { %677 = vst [vmem:[%s1610_s3 + $0x28] sm:$0xff] %v668_v42  ;;  %v660_v21 = vadd.f32 %v1554_v46, %v644_v43  ;;  %v636_v22 = vmax.f32 %v464_v44, %v611_v45  ;;  %v1006_v23 = vpop.f32.mrb[33].mxu0  ;;  %v1061_v47 = vpop.f32.mrb[33].mxu1 }
 0x135   :  { %v669_v48 = vmax.f32 %v660_v21, 0.0  ;;  %v645_v49 = vmax.f32 %v627_v33, %v636_v22 }
 0x136   :  { %v469_v50 = vpop.f32.mrb[34].mxu0  ;;  %v616_v51 = vpop.f32.mrb[34].mxu1 }
 0x137   :  { %678 = vst [vmem:[%s1610_s3 + $0x30] sm:$0xff] %v669_v48  ;;  %v661_v26 = vadd.f32 %v1554_v46, %v645_v49  ;;  %v637_v27 = vmax.f32 %v469_v50, %v616_v51  ;;  %v1009_v28 = vpop.f32.mrb[35].mxu0  ;;  %v1064_v52 = vpop.f32.mrb[35].mxu1 }
 0x139   :  { %v670_v53 = vmax.f32 %v661_v26, 0.0  ;;  %v646_v54 = vmax.f32 %v628_v38, %v637_v27 }
 0x13b   :  { %679 = vst [vmem:[%s1610_s3 + $0x38] sm:$0xff] %v670_v53  ;;  %v662_v31 = vadd.f32 %v1554_v46, %v646_v54 }
 0x13d   :  { %v671_v32 = vmax.f32 %v662_v31, 0.0 }
 0x13f   :  { %680 = vst [vmem:[%s1610_s3 + $0x40] sm:$0xff] %v671_v32 }

// kernel: net_forward.5
= control target key start
LH: loop header
LB: loop body
LE: loop exit
PB: predicated region body
PF: predicated region fallthrough
CT: control target
= control target key end

     0   :  { %v2257_v3 = vmov 0.0|0.0   ;;  %vm56_vm0 = vcmask 719872   ;;  %s3545_s0 = inlined_call_operand.vmem [shape: f32[4,8,216], index: 0, kind: input, shape index: {}]   ;;  %s3546_s1 = inlined_call_operand.vmem [shape: f32[216,128], index: 1, kind: input, shape index: {}]   ;;  %s3547_s2 = inlined_call_operand.vmem [shape: f32[1,128], index: 2, kind: input, shape index: {}]   ;;  %s3548_s3 = inlined_call_operand.vmem [shape: f32[4,128,512], index: 3, kind: input, shape index: {}]   ;;  %s3549_s4 = inlined_call_operand.vmem [shape: f32[1,512], index: 4, kind: input, shape index: {}]   ;;  %s3550_s5 = inlined_call_operand.vmem [shape: f32[512,128], index: 5, kind: input, shape index: {}]   ;;  %s3551_s6 = inlined_call_operand.vmem [shape: f32[1,128], index: 6, kind: input, shape index: {}]   ;;  %s3552_s7 = inlined_call_operand.hbm [shape: f32[2,128], index: 7, kind: output, shape index: {}]  }
   0x1   :  { %v27_v0 = vld [vmem:[%s3546_s1] sm:$0xff]  ;;  %v28_v1 = vld [vmem:[%s3546_s1 + $0x8] sm:$0xff]  ;;  %v29_v2 = vld [vmem:[%s3546_s1 + $0x10] sm:$0xff]  ;;  %1742 = vmatprep.subr.bf16.mxu0 %v2257_v3  ;;  %1781 = vmatprep.subr.bf16.mxu1 %v2257_v3 }
   0x2   :  { %v2311_v4 = vpack.c.bf16 %v28_v1, %v27_v0  ;;  %v30_v5 = vld [vmem:[%s3546_s1 + $0x18] sm:$0xff]  ;;  %v31_v7 = vld [vmem:[%s3546_s1 + $0x20] sm:$0xff]  ;;  %v32_v8 = vld [vmem:[%s3546_s1 + $0x28] sm:$0xff] }
   0x3   :  { %v2318_v6 = vpack.c.bf16 %v30_v5, %v29_v2  ;;  %v2330_v9 = vpack.c.bf16 %v32_v8, %v31_v7  ;;  %v33_v10 = vld [vmem:[%s3546_s1 + $0x30] sm:$0xff]  ;;  %v34_v11 = vld [vmem:[%s3546_s1 + $0x38] sm:$0xff]  ;;  %v55_v12 = vld [vmem:[%s3545_s0 + $0x8] sm:$0xff] }
   0x4   :  { %1744 = vmatpush1.bf16.msra.mxu0 %v2311_v4  ;;  %1783 = vmatpush1.bf16.msra.mxu1 %v2311_v4  ;;  %v1470_v13 = vld [vmem:[%s3545_s0 + $0x18] sm:$0xff]  ;;  %v2350_v14 = vpack.c.bf16 %v34_v11, %v33_v10 }
   0x5   :  { %1745 = vmatprep.subr.bf16.mxu0 %v2257_v3  ;;  %1784 = vmatprep.subr.bf16.mxu1 %v2257_v3 }
   0x6   :  { %1468 = vmatprep.mubr.msk.f32.mxu0 %vm56_vm0, %v55_v12  ;;  %1471 = vmatprep.mubr.msk.f32.mxu1 %vm56_vm0, %v1470_v13 }
   0x8   :  { %1747 = vmatpush1.bf16.msra.mxu0 %v2318_v6  ;;  %1786 = vmatpush1.bf16.msra.mxu1 %v2318_v6 }
   0x9   :  { %1748 = vmatprep.subr.bf16.mxu0 %v2257_v3  ;;  %1787 = vmatprep.subr.bf16.mxu1 %v2257_v3 }
   0xc   :  { %1750 = vmatpush1.bf16.msra.mxu0 %v2330_v9  ;;  %1789 = vmatpush1.bf16.msra.mxu1 %v2330_v9 }
   0xd   :  { %12 = vsyncpa [#allocation3], 0  ;;  %1751 = vmatprep.subr.bf16.mxu0 %v2257_v3  ;;  %1790 = vmatprep.subr.bf16.mxu1 %v2257_v3  ;;  %v35_v15 = vld [vmem:[%s3546_s1 + $0x40] sm:$0xff]  ;;  %v36_v16 = vld [vmem:[%s3546_s1 + $0x48] sm:$0xff]  ;;  %v2258_v42 = vmov 0.0   ;;  %s2259_s19 = smov [#allocation2]  }
   0xe   :  { %v2362_v17 = vpack.c.bf16 %v36_v16, %v35_v15  ;;  %v37_v18 = vld [vmem:[%s3546_s1 + $0x50] sm:$0xff]  ;;  %v38_v19 = vld [vmem:[%s3546_s1 + $0x58] sm:$0xff]  ;;  %v39_v21 = vld [vmem:[%s3546_s1 + $0x60] sm:$0xff]  ;;  %s1460_s20 = sshll.u32 %s2259_s19, 4  ;;  %s1461_s20 = int_to_ptr.vmem [resolvable:$true] %s1460_s20 }
   0xf   :  { %v2374_v20 = vpack.c.bf16 %v38_v19, %v37_v18  ;;  %v40_v22 = vld [vmem:[%s3546_s1 + $0x68] sm:$0xff]  ;;  %v41_v24 = vld [vmem:[%s3546_s1 + $0x70] sm:$0xff]  ;;  %v42_v25 = vld [vmem:[%s3546_s1 + $0x78] sm:$0xff]  ;;  %p2238_p1 = scmp.lt.s32.totalorder %s1461_s20, %s1461_s20 }
  0x10   :  { %1753 = vmatpush1.bf16.msra.mxu0 %v2350_v14  ;;  %1792 = vmatpush1.bf16.msra.mxu1 %v2350_v14  ;;  %v2386_v23 = vpack.c.bf16 %v40_v22, %v39_v21  ;;  %v2398_v26 = vpack.c.bf16 %v42_v25, %v41_v24  ;;  %v43_v27 = vld [vmem:[%s3546_s1 + $0x80] sm:$0xff]  ;;  %v44_v28 = vld [vmem:[%s3546_s1 + $0x88] sm:$0xff]  ;;  %v45_v30 = vld [vmem:[%s3546_s1 + $0x90] sm:$0xff] }
  0x11   :  { %1754 = vmatprep.subr.bf16.mxu0 %v2257_v3  ;;  %1793 = vmatprep.subr.bf16.mxu1 %v2257_v3  ;;  %v2410_v29 = vpack.c.bf16 %v44_v28, %v43_v27  ;;  %v46_v31 = vld [vmem:[%s3546_s1 + $0x98] sm:$0xff]  ;;  %v47_v33 = vld [vmem:[%s3546_s1 + $0xa0] sm:$0xff]  ;;  %v48_v34 = vld [vmem:[%s3546_s1 + $0xa8] sm:$0xff] }
  0x12   :  { %v2422_v32 = vpack.c.bf16 %v46_v31, %v45_v30  ;;  %v2434_v35 = vpack.c.bf16 %v48_v34, %v47_v33  ;;  %v49_v36 = vld [vmem:[%s3546_s1 + $0xb0] sm:$0xff]  ;;  %v50_v37 = vld [vmem:[%s3546_s1 + $0xb8] sm:$0xff]  ;;  %v51_v39 = vld [vmem:[%s3546_s1 + $0xc0] sm:$0xff] }
  0x13   :  { %v2446_v38 = vpack.c.bf16 %v50_v37, %v49_v36  ;;  %v52_v40 = vld [vmem:[%s3546_s1 + $0xc8] sm:$0xff]  ;;  %v2469_v43 = vld [vmem:[%s3546_s1 + $0xd0] sm:$0xff]  ;;  %v54_v44 = vld [vmem:[%s3545_s0] sm:$0xff] }
  0x14   :  { %1756 = vmatpush1.bf16.msra.mxu0 %v2362_v17  ;;  %1795 = vmatpush1.bf16.msra.mxu1 %v2362_v17  ;;  %v2458_v41 = vpack.c.bf16 %v52_v40, %v51_v39  ;;  %v1469_v45 = vld [vmem:[%s3545_s0 + $0x10] sm:$0xff]  ;;  %v1473_v46 = vld [vmem:[%s3545_s0 + $0x28] sm:$0xff]  ;;  %v1476_v47 = vld [vmem:[%s3545_s0 + $0x38] sm:$0xff] }
  0x15   :  { %1757 = vmatprep.subr.bf16.mxu0 %v2257_v3  ;;  %1796 = vmatprep.subr.bf16.mxu1 %v2257_v3  ;;  %v1472_v48 = vld [vmem:[%s3545_s0 + $0x20] sm:$0xff]  ;;  %v1475_v49 = vld [vmem:[%s3545_s0 + $0x30] sm:$0xff]  ;;  %v1480_v50 = vld [vmem:[%s3548_s3 + $0x208] sm:$0xff] }
  0x16   :  { %v1484_v51 = vld [vmem:[%s3548_s3 + $0x228] sm:$0xff]  ;;  %v1482_v52 = vld [vmem:[%s3548_s3 + $0x218] sm:$0xff]  ;;  %v1479_v55 = vld [vmem:[%s3548_s3 + $0x200] sm:$0xff] }
  0x17   :  { %v1898_v53 = vpack.c.bf16 %v1484_v51, %v1480_v50  ;;  %v1486_v54 = vld [vmem:[%s3548_s3 + $0x238] sm:$0xff]  ;;  %v1483_v56 = vld [vmem:[%s3548_s3 + $0x220] sm:$0xff]  ;;  %v1481_v59 = vld [vmem:[%s3548_s3 + $0x210] sm:$0xff] }
  0x18   :  { %1759 = vmatpush1.bf16.msra.mxu0 %v2374_v20  ;;  %1798 = vmatpush1.bf16.msra.mxu1 %v2374_v20  ;;  %v1930_v57 = vpack.c.bf16 %v1486_v54, %v1482_v52  ;;  %v1900_v58 = vpack.c.bf16 %v1483_v56, %v1479_v55  ;;  %v1485_v60 = vld [vmem:[%s3548_s3 + $0x230] sm:$0xff]  ;;  %v1488_v61 = vld [vmem:[%s3548_s3 + $0x248] sm:$0xff]  ;;  %v1490_v0 = vld [vmem:[%s3548_s3 + $0x258] sm:$0xff] }
  0x19   :  { %1760 = vmatprep.subr.bf16.mxu0 %v2257_v3  ;;  %1799 = vmatprep.subr.bf16.mxu1 %v2257_v3  ;;  %v1932_v62 = vpack.c.bf16 %v1485_v60, %v1481_v59  ;;  %v1492_v63 = vld [vmem:[%s3548_s3 + $0x268] sm:$0xff]  ;;  %v1494_v1 = vld [vmem:[%s3548_s3 + $0x278] sm:$0xff]  ;;  %v1491_v5 = vld [vmem:[%s3548_s3 + $0x260] sm:$0xff] }
  0x1a   :  { %v1902_v2 = vpack.c.bf16 %v1492_v63, %v1488_v61  ;;  %v1493_v8 = vld [vmem:[%s3548_s3 + $0x270] sm:$0xff]  ;;  %v1500_v10 = vld [vmem:[%s3548_s3 + $0x2a8] sm:$0xff]  ;;  %v1498_v13 = vld [vmem:[%s3548_s3 + $0x298] sm:$0xff] }
  0x1b   :  { %v1495_v15 = vld [vmem:[%s3548_s3 + $0x280] sm:$0xff]  ;;  %v1497_v18 = vld [vmem:[%s3548_s3 + $0x290] sm:$0xff]  ;;  %v1504_v21 = vld [vmem:[%s3548_s3 + $0x2c8] sm:$0xff] }
  0x1c   :  { %1762 = vmatpush1.bf16.msra.mxu0 %v2386_v23  ;;  %1801 = vmatpush1.bf16.msra.mxu1 %v2386_v23  ;;  %v1501_v19 = vld [vmem:[%s3548_s3 + $0x2b0] sm:$0xff]  ;;  %v1508_v22 = vld [vmem:[%s3548_s3 + $0x2e8] sm:$0xff]  ;;  %v1503_v27 = vld [vmem:[%s3548_s3 + $0x2c0] sm:$0xff] }
  0x1d   :  { %1763 = vmatprep.subr.bf16.mxu0 %v2257_v3  ;;  %1802 = vmatprep.subr.bf16.mxu1 %v2257_v3  ;;  %v1940_v24 = vpack.c.bf16 %v1501_v19, %v1497_v18  ;;  %v1910_v25 = vpack.c.bf16 %v1508_v22, %v1504_v21  ;;  %v1507_v28 = vld [vmem:[%s3548_s3 + $0x2e0] sm:$0xff]  ;;  %v1505_v30 = vld [vmem:[%s3548_s3 + $0x2d0] sm:$0xff]  ;;  %v1516_v33 = vld [vmem:[%s3548_s3 + $0x328] sm:$0xff] }
  0x1e   :  { %v1509_v31 = vld [vmem:[%s3548_s3 + $0x2f0] sm:$0xff]  ;;  %v1514_v34 = vld [vmem:[%s3548_s3 + $0x318] sm:$0xff]  ;;  %v1912_v36 = vpack.c.bf16 %v1507_v28, %v1503_v27  ;;  %v1511_v39 = vld [vmem:[%s3548_s3 + $0x300] sm:$0xff] }
  0x1f   :  { %v1944_v37 = vpack.c.bf16 %v1509_v31, %v1505_v30  ;;  %v1515_v40 = vld [vmem:[%s3548_s3 + $0x320] sm:$0xff]  ;;  %v1521_v55 = vld [vmem:[%s3548_s3 + $0x350] sm:$0xff]  ;;  %v1528_v59 = vld [vmem:[%s3548_s3 + $0x388] sm:$0xff] }
  0x20   :  { %1765 = vmatpush1.bf16.msra.mxu0 %v2398_v26  ;;  %1804 = vmatpush1.bf16.msra.mxu1 %v2398_v26  ;;  %v1519_v52 = vld [vmem:[%s3548_s3 + $0x340] sm:$0xff]  ;;  %v1525_v56 = vld [vmem:[%s3548_s3 + $0x370] sm:$0xff]  ;;  %v1532_v60 = vld [vmem:[%s3548_s3 + $0x3a8] sm:$0xff] }
  0x21   :  { %1766 = vmatprep.subr.bf16.mxu0 %v2257_v3  ;;  %1805 = vmatprep.subr.bf16.mxu1 %v2257_v3  ;;  %v1530_v61 = vld [vmem:[%s3548_s3 + $0x398] sm:$0xff]  ;;  %v371_v19 = vld [vmem:[%s3548_s3 + $0x8] sm:$0xff] }
  0x22   :  { %v1534_v63 = vld [vmem:[%s3548_s3 + $0x3b8] sm:$0xff] }
  0x23   :  { %v373_v21 = vld [vmem:[%s3548_s3 + $0x18] sm:$0xff] }
  0x24   :  { %1768 = vmatpush1.bf16.msra.mxu0 %v2410_v29  ;;  %1807 = vmatpush1.bf16.msra.mxu1 %v2410_v29 }
  0x25   :  { %1769 = vmatprep.subr.bf16.mxu0 %v2257_v3  ;;  %1808 = vmatprep.subr.bf16.mxu1 %v2257_v3 }
  0x28   :  { %1771 = vmatpush1.bf16.msra.mxu0 %v2422_v32  ;;  %1810 = vmatpush1.bf16.msra.mxu1 %v2422_v32 }
  0x29   :  { %1772 = vmatprep.subr.bf16.mxu0 %v2257_v3  ;;  %1811 = vmatprep.subr.bf16.mxu1 %v2257_v3 }
  0x2c   :  { %1774 = vmatpush1.bf16.msra.mxu0 %v2434_v35  ;;  %1813 = vmatpush1.bf16.msra.mxu1 %v2434_v35 }
  0x2d   :  { %1775 = vmatprep.subr.bf16.mxu0 %v2257_v3  ;;  %1814 = vmatprep.subr.bf16.mxu1 %v2257_v3 }
  0x30   :  { %1777 = vmatpush1.bf16.msra.mxu0 %v2446_v38  ;;  %1816 = vmatpush1.bf16.msra.mxu1 %v2446_v38 }
  0x31   :  { %1778 = vmatprep.subr.bf16.mxu0 %v2257_v3  ;;  %1817 = vmatprep.subr.bf16.mxu1 %v2257_v3 }
  0x34   :  { %1780 = vmatpush1.bf16.msra.mxu0 %v2458_v41  ;;  %1819 = vmatpush1.bf16.msra.mxu1 %v2458_v41 }
  0x35   :  { %112 = vmatprep.subr.mxu0 %v2258_v42  ;;  %188 = vmatprep.subr.mxu1 %v2258_v42 }
  0x38   :  { %113 = vmatpush1.msra.mxu0 %v2469_v43  ;;  %189 = vmatpush1.msra.mxu1 %v2469_v43 }
  0x39   :  { %125 = vmatmul.mubr.f32.vlgmr.msra.gmra.mrb[0].mxu0 %v54_v44  ;;  %201 = vmatmul.mubr.f32.vlgmr.msra.gmra.mrb[0].mxu1 %v1469_v45  ;;  %v1517_v44 = vld [vmem:[%s3548_s3 + $0x330] sm:$0xff]  ;;  %v1520_v45 = vld [vmem:[%s3548_s3 + $0x348] sm:$0xff] }
  0x3a   :  { %1820 = vmatprep.subr.bf16.mxu0 %v2257_v3  ;;  %1859 = vmatprep.subr.bf16.mxu1 %v2257_v3 }
  0x3b   :  { %1822 = vmatpush1.bf16.msra.mxu0 %v2311_v4  ;;  %1861 = vmatpush1.bf16.msra.mxu1 %v2311_v4  ;;  %v1487_v4 = vld [vmem:[%s3548_s3 + $0x240] sm:$0xff] }
  0x3c   :  { %1823 = vmatprep.subr.bf16.mxu0 %v2257_v3  ;;  %1862 = vmatprep.subr.bf16.mxu1 %v2257_v3  ;;  %v1904_v7 = vpack.c.bf16 %v1491_v5, %v1487_v4  ;;  %v1529_v4 = vld [vmem:[%s3548_s3 + $0x390] sm:$0xff] }
  0x3d   :  { %1474 = vmatprep.mubr.msk.f32.mxu0 %vm56_vm0, %v1473_v46  ;;  %1477 = vmatprep.mubr.msk.f32.mxu1 %vm56_vm0, %v1476_v47  ;;  %v1524_v46 = vld [vmem:[%s3548_s3 + $0x368] sm:$0xff]  ;;  %v1522_v47 = vld [vmem:[%s3548_s3 + $0x358] sm:$0xff]  ;;  %v1533_v5 = vld [vmem:[%s3548_s3 + $0x3b0] sm:$0xff] }
  0x3e   :  { %v1918_v51 = vpack.c.bf16 %v1524_v46, %v1520_v45  ;;  %v381_v45 = vld [vmem:[%s3548_s3 + $0x58] sm:$0xff] }
  0x3f   :  { %1825 = vmatpush1.bf16.msra.mxu0 %v2318_v6  ;;  %1864 = vmatpush1.bf16.msra.mxu1 %v2318_v6  ;;  %v1489_v6 = vld [vmem:[%s3548_s3 + $0x250] sm:$0xff]  ;;  %v385_v46 = vld [vmem:[%s3548_s3 + $0x78] sm:$0xff] }
  0x40   :  { %1826 = vmatprep.subr.bf16.mxu0 %v2257_v3  ;;  %1865 = vmatprep.subr.bf16.mxu1 %v2257_v3  ;;  %v1936_v11 = vpack.c.bf16 %v1493_v8, %v1489_v6  ;;  %v1956_v6 = vpack.c.bf16 %v1533_v5, %v1529_v4  ;;  %v1540_v8 = vld [vmem:[%s3548_s3 + $0x3e8] sm:$0xff]  ;;  %v392_v4 = vld [vmem:[%s3548_s3 + $0xb0] sm:$0xff] }
  0x41   :  { %v395_v5 = vld [vmem:[%s3548_s3 + $0xc8] sm:$0xff] }
  0x43   :  { %1828 = vmatpush1.bf16.msra.mxu0 %v2330_v9  ;;  %1867 = vmatpush1.bf16.msra.mxu1 %v2330_v9  ;;  %v1496_v9 = vld [vmem:[%s3548_s3 + $0x288] sm:$0xff] }
  0x44   :  { %1829 = vmatprep.subr.bf16.mxu0 %v2257_v3  ;;  %1868 = vmatprep.subr.bf16.mxu1 %v2257_v3  ;;  %v1906_v12 = vpack.c.bf16 %v1500_v10, %v1496_v9  ;;  %v1538_v10 = vld [vmem:[%s3548_s3 + $0x3d8] sm:$0xff] }
  0x47   :  { %1831 = vmatpush1.bf16.msra.mxu0 %v2350_v14  ;;  %1870 = vmatpush1.bf16.msra.mxu1 %v2350_v14  ;;  %v1502_v14 = vld [vmem:[%s3548_s3 + $0x2b8] sm:$0xff] }
  0x48   :  { %1832 = vmatprep.subr.bf16.mxu0 %v2257_v3  ;;  %1871 = vmatprep.subr.bf16.mxu1 %v2257_v3  ;;  %v1938_v16 = vpack.c.bf16 %v1502_v14, %v1498_v13  ;;  %v1539_v14 = vld [vmem:[%s3548_s3 + $0x3e0] sm:$0xff] }
  0x4b   :  { %1834 = vmatpush1.bf16.msra.mxu0 %v2362_v17  ;;  %1873 = vmatpush1.bf16.msra.mxu1 %v2362_v17  ;;  %v1499_v17 = vld [vmem:[%s3548_s3 + $0x2a0] sm:$0xff] }
  0x4c   :  { %1835 = vmatprep.subr.bf16.mxu0 %v2257_v3  ;;  %1874 = vmatprep.subr.bf16.mxu1 %v2257_v3 }
  0x4f   :  { %1837 = vmatpush1.bf16.msra.mxu0 %v2374_v20  ;;  %1876 = vmatpush1.bf16.msra.mxu1 %v2374_v20  ;;  %v1908_v20 = vpack.c.bf16 %v1499_v17, %v1495_v15  ;;  %v1537_v15 = vld [vmem:[%s3548_s3 + $0x3d0] sm:$0xff] }
  0x50   :  { %1838 = vmatprep.subr.bf16.mxu0 %v2257_v3  ;;  %1877 = vmatprep.subr.bf16.mxu1 %v2257_v3 }
  0x53   :  { %1840 = vmatpush1.bf16.msra.mxu0 %v2386_v23  ;;  %1879 = vmatpush1.bf16.msra.mxu1 %v2386_v23  ;;  %v1506_v23 = vld [vmem:[%s3548_s3 + $0x2d8] sm:$0xff] }
  0x54   :  { %1841 = vmatprep.subr.bf16.mxu0 %v2257_v3  ;;  %1880 = vmatprep.subr.bf16.mxu1 %v2257_v3 }
  0x57   :  { %1843 = vmatpush1.bf16.msra.mxu0 %v2398_v26  ;;  %1882 = vmatpush1.bf16.msra.mxu1 %v2398_v26  ;;  %v1510_v26 = vld [vmem:[%s3548_s3 + $0x2f8] sm:$0xff] }
  0x58   :  { %1844 = vmatprep.subr.bf16.mxu0 %v2257_v3  ;;  %1883 = vmatprep.subr.bf16.mxu1 %v2257_v3 }
  0x5b   :  { %1846 = vmatpush1.bf16.msra.mxu0 %v2410_v29  ;;  %1885 = vmatpush1.bf16.msra.mxu1 %v2410_v29  ;;  %v1942_v29 = vpack.c.bf16 %v1510_v26, %v1506_v23  ;;  %v377_v23 = vld [vmem:[%s3548_s3 + $0x38] sm:$0xff] }
  0x5c   :  { %1847 = vmatprep.subr.bf16.mxu0 %v2257_v3  ;;  %1886 = vmatprep.subr.bf16.mxu1 %v2257_v3 }
  0x5f   :  { %1849 = vmatpush1.bf16.msra.mxu0 %v2422_v32  ;;  %1888 = vmatpush1.bf16.msra.mxu1 %v2422_v32  ;;  %v1512_v32 = vld [vmem:[%s3548_s3 + $0x308] sm:$0xff] }
  0x60   :  { %1850 = vmatprep.subr.bf16.mxu0 %v2257_v3  ;;  %1889 = vmatprep.subr.bf16.mxu1 %v2257_v3 }
  0x63   :  { %1852 = vmatpush1.bf16.msra.mxu0 %v2434_v35  ;;  %1891 = vmatpush1.bf16.msra.mxu1 %v2434_v35  ;;  %v1518_v35 = vld [vmem:[%s3548_s3 + $0x338] sm:$0xff] }
  0x64   :  { %1853 = vmatprep.subr.bf16.mxu0 %v2257_v3  ;;  %1892 = vmatprep.subr.bf16.mxu1 %v2257_v3 }
  0x67   :  { %1855 = vmatpush1.bf16.msra.mxu0 %v2446_v38  ;;  %1894 = vmatpush1.bf16.msra.mxu1 %v2446_v38  ;;  %v1914_v38 = vpack.c.bf16 %v1516_v33, %v1512_v32 }
  0x68   :  { %1856 = vmatprep.subr.bf16.mxu0 %v2257_v3  ;;  %1895 = vmatprep.subr.bf16.mxu1 %v2257_v3  ;;  %v1934_v3 = vpack.c.bf16 %v1494_v1, %v1490_v0  ;;  %v1527_v0 = vld [vmem:[%s3548_s3 + $0x380] sm:$0xff] }
  0x69   :  { %v1531_v1 = vld [vmem:[%s3548_s3 + $0x3a0] sm:$0xff] }
  0x6b   :  { %1858 = vmatpush1.bf16.msra.mxu0 %v2458_v41  ;;  %1897 = vmatpush1.bf16.msra.mxu1 %v2458_v41  ;;  %v1513_v41 = vld [vmem:[%s3548_s3 + $0x310] sm:$0xff] }
  0x6c   :  { %264 = vmatprep.subr.mxu0 %v2258_v42  ;;  %340 = vmatprep.subr.mxu1 %v2258_v42  ;;  %v1948_v50 = vpack.c.bf16 %v1517_v44, %v1513_v41  ;;  %v376_v41 = vld [vmem:[%s3548_s3 + $0x30] sm:$0xff]  ;;  %v383_v44 = vld [vmem:[%s3548_s3 + $0x68] sm:$0xff] }
  0x6f   :  { %265 = vmatpush1.msra.mxu0 %v2469_v43  ;;  %341 = vmatpush1.msra.mxu1 %v2469_v43  ;;  %v1946_v43 = vpack.c.bf16 %v1518_v35, %v1514_v34  ;;  %v1478_v35 = vld [vmem:[%s3547_s2] ss:$0 sm:$0xff]  ;;  %s2233_s2 = scalar_lea.vmem %s1461_s20, 32 }
  0x70   :  { %277 = vmatmul.mubr.f32.vlgmr.msra.gmra.mrb[2].mxu0 %v1472_v48  ;;  %353 = vmatmul.mubr.f32.vlgmr.msra.gmra.mrb[2].mxu1 %v1475_v49  ;;  %v1526_v48 = vld [vmem:[%s3548_s3 + $0x378] sm:$0xff]  ;;  %v1916_v49 = vpack.c.bf16 %v1515_v40, %v1511_v39  ;;  %v372_v40 = vld [vmem:[%s3548_s3 + $0x10] sm:$0xff]  ;;  %p2234_p0 = scmp.ne.s32.totalorder %s1461_s20, %s2233_s2  ;;  %p2239_p2 = scmp.lt.s32.totalorder %s2233_s2, %s2233_s2 }
  0x71   :  { %566 = vmatprep.mubr.f32.mxu0 %v2258_v42  ;;  %637 = vmatprep.mubr.f32.mxu1 %v2258_v42  ;;  %v1950_v54 = vpack.c.bf16 %v1526_v48, %v1522_v47 }
  0x72   :  { %1899 = vmatprep.subr.bf16.mxu0 %v1898_v53  ;;  %1931 = vmatprep.subr.bf16.mxu1 %v1930_v57  ;;  %v1523_v53 = vld [vmem:[%s3548_s3 + $0x360] sm:$0xff]  ;;  %p2240_p3 = por %p2239_p2, %p2238_p1 }
  0x73   :  { %1901 = vmatpush1.bf16.msra.mxu0 %v1900_v58  ;;  %1933 = vmatpush1.bf16.msra.mxu1 %v1932_v62  ;;  %v1920_v57 = vpack.c.bf16 %v1523_v53, %v1519_v52  ;;  %v1952_v58 = vpack.c.bf16 %v1525_v56, %v1521_v55  ;;  %v1922_v62 = vpack.c.bf16 %v1532_v60, %v1528_v59  ;;  %v380_v55 = vld [vmem:[%s3548_s3 + $0x50] sm:$0xff]  ;;  %v389_v59 = vld [vmem:[%s3548_s3 + $0x98] sm:$0xff] }
  0x74   :  { %1903 = vmatprep.subr.bf16.mxu0 %v1902_v2  ;;  %1935 = vmatprep.subr.bf16.mxu1 %v1934_v3  ;;  %v1954_v2 = vpack.c.bf16 %v1534_v63, %v1530_v61  ;;  %v1924_v3 = vpack.c.bf16 %v1531_v1, %v1527_v0  ;;  %v384_v56 = vld [vmem:[%s3548_s3 + $0x70] sm:$0xff]  ;;  %v393_v60 = vld [vmem:[%s3548_s3 + $0xb8] sm:$0xff]  ;;  %v386_v63 = vld [vmem:[%s3548_s3 + $0x80] sm:$0xff]  ;;  %p2241_p4 = pnand %p2240_p3, %p2234_p0 }
  0x75   :  { %v390_v0 = vld [vmem:[%s3548_s3 + $0xa0] sm:$0xff] }
  0x77   :  { %1905 = vmatpush1.bf16.msra.mxu0 %v1904_v7  ;;  %1937 = vmatpush1.bf16.msra.mxu1 %v1936_v11  ;;  %v1536_v7 = vld [vmem:[%s3548_s3 + $0x3c8] sm:$0xff]  ;;  %v1542_v11 = vld [vmem:[%s3548_s3 + $0x3f8] sm:$0xff] }
  0x78   :  { %1907 = vmatprep.subr.bf16.mxu0 %v1906_v12  ;;  %1939 = vmatprep.subr.bf16.mxu1 %v1938_v16  ;;  %v1926_v9 = vpack.c.bf16 %v1540_v8, %v1536_v7  ;;  %v1535_v12 = vld [vmem:[%s3548_s3 + $0x3c0] sm:$0xff]  ;;  %v1958_v13 = vpack.c.bf16 %v1542_v11, %v1538_v10  ;;  %v1541_v16 = vld [vmem:[%s3548_s3 + $0x3f0] sm:$0xff]  ;;  %v397_v7 = vld [vmem:[%s3548_s3 + $0xd8] sm:$0xff] }
  0x79   :  { %v1928_v17 = vpack.c.bf16 %v1539_v14, %v1535_v12  ;;  %v1960_v18 = vpack.c.bf16 %v1541_v16, %v1537_v15  ;;  %v401_v8 = vld [vmem:[%s3548_s3 + $0xf8] sm:$0xff]  ;;  %v394_v11 = vld [vmem:[%s3548_s3 + $0xc0] sm:$0xff]  ;;  %v396_v15 = vld [vmem:[%s3548_s3 + $0xd0] sm:$0xff] }
  0x7a   :  { %v398_v12 = vld [vmem:[%s3548_s3 + $0xe0] sm:$0xff]  ;;  %v2006_v14 = vpack.c.bf16 %v401_v8, %v397_v7  ;;  %v400_v16 = vld [vmem:[%s3548_s3 + $0xf0] sm:$0xff] }
  0x7b   :  { %1909 = vmatpush1.bf16.msra.mxu0 %v1908_v20  ;;  %1941 = vmatpush1.bf16.msra.mxu1 %v1940_v24  ;;  %v375_v20 = vld [vmem:[%s3548_s3 + $0x28] sm:$0xff]  ;;  %v1994_v24 = vpack.c.bf16 %v377_v23, %v373_v21  ;;  %v1976_v21 = vpack.c.bf16 %v398_v12, %v394_v11  ;;  %v402_v23 = vld [vmem:[%s3548_s3 + $0x100] sm:$0xff] }
  0x7c   :  { %1911 = vmatprep.subr.bf16.mxu0 %v1910_v25  ;;  %1943 = vmatprep.subr.bf16.mxu1 %v1942_v29  ;;  %v1962_v22 = vpack.c.bf16 %v375_v20, %v371_v19  ;;  %v405_v19 = vld [vmem:[%s3548_s3 + $0x118] sm:$0xff] }
  0x7d   :  { %v409_v20 = vld [vmem:[%s3548_s3 + $0x138] sm:$0xff] }
  0x7f   :  { %1913 = vmatpush1.bf16.msra.mxu0 %v1912_v36  ;;  %1945 = vmatpush1.bf16.msra.mxu1 %v1944_v37  ;;  %v370_v37 = vld [vmem:[%s3548_s3] sm:$0xff] }
  0x80   :  { %1915 = vmatprep.subr.bf16.mxu0 %v1914_v38  ;;  %1947 = vmatprep.subr.bf16.mxu1 %v1946_v43  ;;  %v374_v38 = vld [vmem:[%s3548_s3 + $0x20] sm:$0xff]  ;;  %v379_v43 = vld [vmem:[%s3548_s3 + $0x48] sm:$0xff] }
  0x81   :  { %v1964_v48 = vpack.c.bf16 %v374_v38, %v370_v37  ;;  %v1966_v53 = vpack.c.bf16 %v383_v44, %v379_v43  ;;  %v423_v43 = vld [vmem:[%s3548_s3 + $0x1a8] sm:$0xff]  ;;  %v421_v44 = vld [vmem:[%s3548_s3 + $0x198] sm:$0xff] }
  0x83   :  { %1917 = vmatpush1.bf16.msra.mxu0 %v1916_v49  ;;  %1949 = vmatpush1.bf16.msra.mxu1 %v1948_v50  ;;  %v1996_v49 = vpack.c.bf16 %v376_v41, %v372_v40  ;;  %v378_v50 = vld [vmem:[%s3548_s3 + $0x40] sm:$0xff]  ;;  %v416_v40 = vld [vmem:[%s3548_s3 + $0x170] sm:$0xff]  ;;  %v419_v41 = vld [vmem:[%s3548_s3 + $0x188] sm:$0xff] }
  0x84   :  { %1919 = vmatprep.subr.bf16.mxu0 %v1918_v51  ;;  %1951 = vmatprep.subr.bf16.mxu1 %v1950_v54  ;;  %v382_v51 = vld [vmem:[%s3548_s3 + $0x60] sm:$0xff]  ;;  %v1998_v54 = vpack.c.bf16 %v385_v46, %v381_v45  ;;  %v425_v45 = vld [vmem:[%s3548_s3 + $0x1b8] sm:$0xff] }
  0x85   :  { %v1968_v61 = vpack.c.bf16 %v382_v51, %v378_v50  ;;  %v422_v50 = vld [vmem:[%s3548_s3 + $0x1a0] sm:$0xff]  ;;  %v1986_v51 = vpack.c.bf16 %v423_v43, %v419_v41  ;;  %v1570_v41 = vld [vmem:[%s3548_s3 + $0x4d8] sm:$0xff] }
  0x86   :  { %v1574_v43 = vld [vmem:[%s3548_s3 + $0x4f8] sm:$0xff] }
  0x87   :  { %1921 = vmatpush1.bf16.msra.mxu0 %v1920_v57  ;;  %1953 = vmatpush1.bf16.msra.mxu1 %v1952_v58  ;;  %v387_v57 = vld [vmem:[%s3548_s3 + $0x88] sm:$0xff] }
  0x88   :  { %1923 = vmatprep.subr.bf16.mxu0 %v1922_v62  ;;  %1955 = vmatprep.subr.bf16.mxu1 %v1954_v2  ;;  %v391_v58 = vld [vmem:[%s3548_s3 + $0xa8] sm:$0xff]  ;;  %v2000_v62 = vpack.c.bf16 %v384_v56, %v380_v55  ;;  %v2002_v2 = vpack.c.bf16 %v393_v60, %v389_v59 }
  0x89   :  { %v1970_v1 = vpack.c.bf16 %v391_v58, %v387_v57  ;;  %v427_v55 = vld [vmem:[%s3548_s3 + $0x1c8] sm:$0xff]  ;;  %v429_v57 = vld [vmem:[%s3548_s3 + $0x1d8] sm:$0xff] }
  0x8a   :  { %v431_v56 = vld [vmem:[%s3548_s3 + $0x1e8] sm:$0xff]  ;;  %v433_v58 = vld [vmem:[%s3548_s3 + $0x1f8] sm:$0xff] }
  0x8b   :  { %1925 = vmatpush1.bf16.msra.mxu0 %v1924_v3  ;;  %1957 = vmatpush1.bf16.msra.mxu1 %v1956_v6  ;;  %v388_v3 = vld [vmem:[%s3548_s3 + $0x90] sm:$0xff]  ;;  %v399_v6 = vld [vmem:[%s3548_s3 + $0xe8] sm:$0xff] }
  0x8c   :  { %1927 = vmatprep.subr.bf16.mxu0 %v1926_v9  ;;  %1959 = vmatprep.subr.bf16.mxu1 %v1958_v13  ;;  %v1972_v9 = vpack.c.bf16 %v390_v0, %v386_v63  ;;  %v2004_v10 = vpack.c.bf16 %v392_v4, %v388_v3  ;;  %v1974_v13 = vpack.c.bf16 %v399_v6, %v395_v5  ;;  %v1544_v3 = vld [vmem:[%s3548_s3 + $0x408] sm:$0xff]  ;;  %v1546_v5 = vld [vmem:[%s3548_s3 + $0x418] sm:$0xff] }
  0x8d   :  { %v1990_v63 = vpack.c.bf16 %v431_v56, %v427_v55  ;;  %v2022_v0 = vpack.c.bf16 %v433_v58, %v429_v57  ;;  %v1548_v4 = vld [vmem:[%s3548_s3 + $0x428] sm:$0xff]  ;;  %v1550_v6 = vld [vmem:[%s3548_s3 + $0x438] sm:$0xff] }
  0x8e   :  { %v2026_v11 = vpack.c.bf16 %v1548_v4, %v1544_v3  ;;  %v2058_v12 = vpack.c.bf16 %v1550_v6, %v1546_v5  ;;  %v1578_v55 = vld [vmem:[%s3548_s3 + $0x518] sm:$0xff] }
  0x8f   :  { %1929 = vmatpush1.bf16.msra.mxu0 %v1928_v17  ;;  %1961 = vmatpush1.bf16.msra.mxu1 %v1960_v18  ;;  %v403_v17 = vld [vmem:[%s3548_s3 + $0x108] sm:$0xff]  ;;  %v1582_v56 = vld [vmem:[%s3548_s3 + $0x538] sm:$0xff] }
  0x90   :  { %1963 = vmatprep.subr.bf16.mxu0 %v1962_v22  ;;  %1995 = vmatprep.subr.bf16.mxu1 %v1994_v24  ;;  %v407_v18 = vld [vmem:[%s3548_s3 + $0x128] sm:$0xff]  ;;  %v2008_v22 = vpack.c.bf16 %v400_v16, %v396_v15  ;;  %v406_v24 = vld [vmem:[%s3548_s3 + $0x120] sm:$0xff]  ;;  %v1586_v3 = vld [vmem:[%s3548_s3 + $0x558] sm:$0xff] }
  0x91   :  { %v1552_v15 = vld [vmem:[%s3548_s3 + $0x448] sm:$0xff]  ;;  %v1590_v4 = vld [vmem:[%s3548_s3 + $0x578] sm:$0xff] }
  0x92   :  { %v1556_v16 = vld [vmem:[%s3548_s3 + $0x468] sm:$0xff] }
 0x10c   :  { %v126_v25 = vpop.f32.mrb[0].mxu0  ;;  %v202_v26 = vpop.f32.mrb[0].mxu1 }
 0x10d   :  { %v358_v27 = vmax.f32 %v126_v25, %v202_v26  ;;  %v128_v28 = vpop.f32.mrb[1].mxu0  ;;  %v204_v29 = vpop.f32.mrb[1].mxu1  ;;  %v1978_v25 = vpack.c.bf16 %v407_v18, %v403_v17  ;;  %v2010_v26 = vpack.c.bf16 %v409_v20, %v405_v19  ;;  %v1554_v17 = vld [vmem:[%s3548_s3 + $0x458] sm:$0xff] }
 0x10e   :  { %v408_v28 = vld [vmem:[%s3548_s3 + $0x130] sm:$0xff]  ;;  %v411_v29 = vld [vmem:[%s3548_s3 + $0x148] sm:$0xff]  ;;  %v1558_v18 = vld [vmem:[%s3548_s3 + $0x478] sm:$0xff] }
 0x143   :  { %v278_v30 = vpop.f32.mrb[2].mxu0  ;;  %v354_v31 = vpop.f32.mrb[2].mxu1 }
 0x144   :  { %v359_v32 = vmax.f32 %v278_v30, %v354_v31  ;;  %v280_v33 = vpop.f32.mrb[3].mxu0  ;;  %v356_v34 = vpop.f32.mrb[3].mxu1  ;;  %v415_v30 = vld [vmem:[%s3548_s3 + $0x168] sm:$0xff]  ;;  %v413_v31 = vld [vmem:[%s3548_s3 + $0x158] sm:$0xff] }
 0x145   :  { %v1980_v33 = vpack.c.bf16 %v406_v24, %v402_v23  ;;  %v1982_v37 = vpack.c.bf16 %v415_v30, %v411_v29  ;;  %v2030_v23 = vpack.c.bf16 %v1556_v16, %v1552_v15  ;;  %v2062_v24 = vpack.c.bf16 %v1558_v18, %v1554_v17  ;;  %v1562_v29 = vld [vmem:[%s3548_s3 + $0x498] sm:$0xff] }
 0x146   :  { %v360_v36 = vmax.f32 %v358_v27, %v359_v32  ;;  %v404_v27 = vld [vmem:[%s3548_s3 + $0x110] sm:$0xff]  ;;  %v417_v32 = vld [vmem:[%s3548_s3 + $0x178] sm:$0xff] }
 0x147   :  { %v2012_v34 = vpack.c.bf16 %v408_v28, %v404_v27  ;;  %v2014_v38 = vpack.c.bf16 %v417_v32, %v413_v31  ;;  %v1560_v27 = vld [vmem:[%s3548_s3 + $0x488] sm:$0xff]  ;;  %v1566_v30 = vld [vmem:[%s3548_s3 + $0x4b8] sm:$0xff] }
 0x148   :  { %v368_v39 = vadd.f32 %v1478_v35, %v360_v36  ;;  %v410_v35 = vld [vmem:[%s3548_s3 + $0x140] sm:$0xff]  ;;  %v1564_v28 = vld [vmem:[%s3548_s3 + $0x4a8] sm:$0xff]  ;;  %v1594_v15 = vld [vmem:[%s3548_s3 + $0x598] sm:$0xff] }
 0x149   :  { %v414_v36 = vld [vmem:[%s3548_s3 + $0x160] sm:$0xff]  ;;  %v1598_v16 = vld [vmem:[%s3548_s3 + $0x5b8] sm:$0xff] }
 0x14a   :  { %v2782_v47 = vmax.f32 %v368_v39, 0.0  ;;  %v412_v39 = vld [vmem:[%s3548_s3 + $0x150] sm:$0xff]  ;;  %v1984_v46 = vpack.c.bf16 %v414_v36, %v410_v35  ;;  %v2034_v35 = vpack.c.bf16 %v1564_v28, %v1560_v27  ;;  %v2066_v36 = vpack.c.bf16 %v1566_v30, %v1562_v29  ;;  %v1602_v27 = vld [vmem:[%s3548_s3 + $0x5d8] sm:$0xff] }
 0x14b   :  { %v1606_v28 = vld [vmem:[%s3548_s3 + $0x5f8] sm:$0xff] }
 0x14c   :  { %v500_v52 = vrot.slane %v2782_v47, 2 }
 0x14e   :  { %567 = vmatmul.mubr.f32.vlgmr.msra.gmra.mrb[4].mxu0 %v500_v52  ;;  %638 = vmatmul.mubr.f32.vlgmr.msra.gmra.mrb[4].mxu1 %v500_v52  ;;  %v2018_v52 = vpack.c.bf16 %v425_v45, %v421_v44 }
 0x14f   :  { %1965 = vmatpush1.bf16.msra.mxu0 %v1964_v48  ;;  %1997 = vmatpush1.bf16.msra.mxu1 %v1996_v49  ;;  %v2016_v48 = vpack.c.bf16 %v416_v40, %v412_v39  ;;  %v418_v49 = vld [vmem:[%s3548_s3 + $0x180] sm:$0xff]  ;;  %v1568_v39 = vld [vmem:[%s3548_s3 + $0x4c8] sm:$0xff] }
 0x150   :  { %1967 = vmatprep.subr.bf16.mxu0 %v1966_v53  ;;  %1999 = vmatprep.subr.bf16.mxu1 %v1998_v54  ;;  %v420_v53 = vld [vmem:[%s3548_s3 + $0x190] sm:$0xff]  ;;  %v1988_v59 = vpack.c.bf16 %v422_v50, %v418_v49  ;;  %v1572_v40 = vld [vmem:[%s3548_s3 + $0x4e8] sm:$0xff]  ;;  %v2070_v50 = vpack.c.bf16 %v1574_v43, %v1570_v41 }
 0x151   :  { %708 = vmatprep.mubr.f32.mxu0 %v2258_v42  ;;  %779 = vmatprep.mubr.f32.mxu1 %v2258_v42  ;;  %v424_v54 = vld [vmem:[%s3548_s3 + $0x1b0] sm:$0xff]  ;;  %v2038_v49 = vpack.c.bf16 %v1572_v40, %v1568_v39  ;;  %v1610_v39 = vld [vmem:[%s3548_s3 + $0x618] sm:$0xff] }
 0x152   :  { %v2020_v60 = vpack.c.bf16 %v424_v54, %v420_v53  ;;  %v1576_v53 = vld [vmem:[%s3548_s3 + $0x508] sm:$0xff]  ;;  %v1614_v40 = vld [vmem:[%s3548_s3 + $0x638] sm:$0xff] }
 0x153   :  { %1969 = vmatpush1.bf16.msra.mxu0 %v1968_v61  ;;  %2001 = vmatpush1.bf16.msra.mxu1 %v2000_v62  ;;  %v426_v61 = vld [vmem:[%s3548_s3 + $0x1c0] sm:$0xff]  ;;  %v1580_v54 = vld [vmem:[%s3548_s3 + $0x528] sm:$0xff] }
 0x154   :  { %1971 = vmatprep.subr.bf16.mxu0 %v1970_v1  ;;  %2003 = vmatprep.subr.bf16.mxu1 %v2002_v2  ;;  %v430_v62 = vld [vmem:[%s3548_s3 + $0x1e0] sm:$0xff]  ;;  %v428_v1 = vld [vmem:[%s3548_s3 + $0x1d0] sm:$0xff] }
 0x155   :  { %v432_v2 = vld [vmem:[%s3548_s3 + $0x1f0] sm:$0xff]  ;;  %v1992_v7 = vpack.c.bf16 %v430_v62, %v426_v61  ;;  %v2042_v61 = vpack.c.bf16 %v1580_v54, %v1576_v53  ;;  %v2074_v62 = vpack.c.bf16 %v1582_v56, %v1578_v55  ;;  %v1618_v53 = vld [vmem:[%s3548_s3 + $0x658] sm:$0xff] }
 0x156   :  { %v2024_v8 = vpack.c.bf16 %v432_v2, %v428_v1  ;;  %v1584_v1 = vld [vmem:[%s3548_s3 + $0x548] sm:$0xff]  ;;  %v1622_v54 = vld [vmem:[%s3548_s3 + $0x678] sm:$0xff] }
 0x157   :  { %1973 = vmatpush1.bf16.msra.mxu0 %v1972_v9  ;;  %2005 = vmatpush1.bf16.msra.mxu1 %v2004_v10  ;;  %v1543_v9 = vld [vmem:[%s3548_s3 + $0x400] sm:$0xff]  ;;  %v1588_v2 = vld [vmem:[%s3548_s3 + $0x568] sm:$0xff] }
 0x158   :  { %1975 = vmatprep.subr.bf16.mxu0 %v1974_v13  ;;  %2007 = vmatprep.subr.bf16.mxu1 %v2006_v14  ;;  %v1547_v10 = vld [vmem:[%s3548_s3 + $0x420] sm:$0xff]  ;;  %v1545_v13 = vld [vmem:[%s3548_s3 + $0x410] sm:$0xff] }
 0x159   :  { %v1549_v14 = vld [vmem:[%s3548_s3 + $0x430] sm:$0xff]  ;;  %v2028_v19 = vpack.c.bf16 %v1547_v10, %v1543_v9  ;;  %v2046_v9 = vpack.c.bf16 %v1588_v2, %v1584_v1  ;;  %v2078_v10 = vpack.c.bf16 %v1590_v4, %v1586_v3  ;;  %v1628_v1 = vld [vmem:[%s3548_s3 + $0x6a8] sm:$0xff]  ;;  %v1626_v2 = vld [vmem:[%s3548_s3 + $0x698] sm:$0xff] }
 0x15a   :  { %v2060_v20 = vpack.c.bf16 %v1549_v14, %v1545_v13  ;;  %v1592_v13 = vld [vmem:[%s3548_s3 + $0x588] sm:$0xff]  ;;  %v1630_v3 = vld [vmem:[%s3548_s3 + $0x6b8] sm:$0xff] }
 0x15b   :  { %1977 = vmatpush1.bf16.msra.mxu0 %v1976_v21  ;;  %2009 = vmatpush1.bf16.msra.mxu1 %v2008_v22  ;;  %v1551_v21 = vld [vmem:[%s3548_s3 + $0x440] sm:$0xff]  ;;  %v1596_v14 = vld [vmem:[%s3548_s3 + $0x5a8] sm:$0xff] }
 0x15c   :  { %1979 = vmatprep.subr.bf16.mxu0 %v1978_v25  ;;  %2011 = vmatprep.subr.bf16.mxu1 %v2010_v26  ;;  %v1555_v22 = vld [vmem:[%s3548_s3 + $0x460] sm:$0xff]  ;;  %v1553_v25 = vld [vmem:[%s3548_s3 + $0x450] sm:$0xff] }
 0x15d   :  { %v1557_v26 = vld [vmem:[%s3548_s3 + $0x470] sm:$0xff]  ;;  %v2032_v31 = vpack.c.bf16 %v1555_v22, %v1551_v21  ;;  %v2050_v21 = vpack.c.bf16 %v1596_v14, %v1592_v13  ;;  %v2082_v22 = vpack.c.bf16 %v1598_v16, %v1594_v15  ;;  %v1636_v13 = vld [vmem:[%s3548_s3 + $0x6e8] sm:$0xff]  ;;  %v1634_v14 = vld [vmem:[%s3548_s3 + $0x6d8] sm:$0xff] }
 0x15e   :  { %v2064_v32 = vpack.c.bf16 %v1557_v26, %v1553_v25  ;;  %v1600_v25 = vld [vmem:[%s3548_s3 + $0x5c8] sm:$0xff]  ;;  %v1638_v15 = vld [vmem:[%s3548_s3 + $0x6f8] sm:$0xff] }
 0x15f   :  { %1981 = vmatpush1.bf16.msra.mxu0 %v1980_v33  ;;  %2013 = vmatpush1.bf16.msra.mxu1 %v2012_v34  ;;  %v1559_v33 = vld [vmem:[%s3548_s3 + $0x480] sm:$0xff]  ;;  %v1604_v26 = vld [vmem:[%s3548_s3 + $0x5e8] sm:$0xff] }
 0x160   :  { %1983 = vmatprep.subr.bf16.mxu0 %v1982_v37  ;;  %2015 = vmatprep.subr.bf16.mxu1 %v2014_v38  ;;  %v1563_v34 = vld [vmem:[%s3548_s3 + $0x4a0] sm:$0xff]  ;;  %v1561_v37 = vld [vmem:[%s3548_s3 + $0x490] sm:$0xff] }
 0x161   :  { %v1565_v38 = vld [vmem:[%s3548_s3 + $0x4b0] sm:$0xff]  ;;  %v2036_v44 = vpack.c.bf16 %v1563_v34, %v1559_v33  ;;  %v2054_v33 = vpack.c.bf16 %v1604_v26, %v1600_v25  ;;  %v2086_v34 = vpack.c.bf16 %v1606_v28, %v1602_v27  ;;  %v1642_v25 = vld [vmem:[%s3548_s3 + $0x718] sm:$0xff] }
 0x162   :  { %v2068_v45 = vpack.c.bf16 %v1565_v38, %v1561_v37  ;;  %v1608_v37 = vld [vmem:[%s3548_s3 + $0x608] sm:$0xff]  ;;  %v1646_v26 = vld [vmem:[%s3548_s3 + $0x738] sm:$0xff] }
 0x163   :  { %1985 = vmatpush1.bf16.msra.mxu0 %v1984_v46  ;;  %2017 = vmatpush1.bf16.msra.mxu1 %v2016_v48  ;;  %v1567_v46 = vld [vmem:[%s3548_s3 + $0x4c0] sm:$0xff]  ;;  %v1612_v38 = vld [vmem:[%s3548_s3 + $0x628] sm:$0xff] }
 0x164   :  { %1987 = vmatprep.subr.bf16.mxu0 %v1986_v51  ;;  %2019 = vmatprep.subr.bf16.mxu1 %v2018_v52  ;;  %v1571_v48 = vld [vmem:[%s3548_s3 + $0x4e0] sm:$0xff]  ;;  %v1569_v51 = vld [vmem:[%s3548_s3 + $0x4d0] sm:$0xff] }
 0x165   :  { %v1573_v52 = vld [vmem:[%s3548_s3 + $0x4f0] sm:$0xff]  ;;  %v2040_v57 = vpack.c.bf16 %v1571_v48, %v1567_v46  ;;  %v2090_v46 = vpack.c.bf16 %v1612_v38, %v1608_v37  ;;  %v2122_v48 = vpack.c.bf16 %v1614_v40, %v1610_v39  ;;  %v1650_v37 = vld [vmem:[%s3548_s3 + $0x758] sm:$0xff] }
 0x166   :  { %v2072_v58 = vpack.c.bf16 %v1573_v52, %v1569_v51  ;;  %v1616_v51 = vld [vmem:[%s3548_s3 + $0x648] sm:$0xff]  ;;  %v1654_v38 = vld [vmem:[%s3548_s3 + $0x778] sm:$0xff] }
 0x167   :  { %1989 = vmatpush1.bf16.msra.mxu0 %v1988_v59  ;;  %2021 = vmatpush1.bf16.msra.mxu1 %v2020_v60  ;;  %v1575_v59 = vld [vmem:[%s3548_s3 + $0x500] sm:$0xff]  ;;  %v1620_v52 = vld [vmem:[%s3548_s3 + $0x668] sm:$0xff] }
 0x168   :  { %1991 = vmatprep.subr.bf16.mxu0 %v1990_v63  ;;  %2023 = vmatprep.subr.bf16.mxu1 %v2022_v0  ;;  %v1579_v60 = vld [vmem:[%s3548_s3 + $0x520] sm:$0xff]  ;;  %v1577_v63 = vld [vmem:[%s3548_s3 + $0x510] sm:$0xff] }
 0x169   :  { %v1581_v0 = vld [vmem:[%s3548_s3 + $0x530] sm:$0xff]  ;;  %v2044_v5 = vpack.c.bf16 %v1579_v60, %v1575_v59  ;;  %v851_v59 = vrot.slane %v2782_v47, 4  ;;  %v2094_v60 = vpack.c.bf16 %v1620_v52, %v1616_v51  ;;  %v1658_v51 = vld [vmem:[%s3548_s3 + $0x798] sm:$0xff] }
 0x16a   :  { %v2076_v6 = vpack.c.bf16 %v1581_v0, %v1577_v63  ;;  %v1621_v63 = vld [vmem:[%s3548_s3 + $0x670] sm:$0xff]  ;;  %v1624_v0 = vld [vmem:[%s3548_s3 + $0x688] sm:$0xff]  ;;  %v1662_v52 = vld [vmem:[%s3548_s3 + $0x7b8] sm:$0xff] }
 0x16b   :  { %1993 = vmatpush1.bf16.msra.mxu0 %v1992_v7  ;;  %2025 = vmatpush1.bf16.msra.mxu1 %v2024_v8  ;;  %v1583_v7 = vld [vmem:[%s3548_s3 + $0x540] sm:$0xff] }
 0x16c   :  { %2027 = vmatprep.subr.bf16.mxu0 %v2026_v11  ;;  %2059 = vmatprep.subr.bf16.mxu1 %v2058_v12  ;;  %v1587_v8 = vld [vmem:[%s3548_s3 + $0x560] sm:$0xff]  ;;  %v1585_v11 = vld [vmem:[%s3548_s3 + $0x550] sm:$0xff] }
 0x16d   :  { %v1589_v12 = vld [vmem:[%s3548_s3 + $0x570] sm:$0xff]  ;;  %v2048_v17 = vpack.c.bf16 %v1587_v8, %v1583_v7  ;;  %v1627_v7 = vld [vmem:[%s3548_s3 + $0x6a0] sm:$0xff]  ;;  %v2098_v8 = vpack.c.bf16 %v1628_v1, %v1624_v0  ;;  %v1670_v0 = vld [vmem:[%s3548_s3 + $0x7f8] sm:$0xff] }
 0x16e   :  { %709 = vmatmul.mubr.f32.vlgmr.msra.gmra.mrb[4].mxu0 %v2782_v47  ;;  %780 = vmatmul.mubr.f32.vlgmr.msra.gmra.mrb[4].mxu1 %v2782_v47  ;;  %v2080_v18 = vpack.c.bf16 %v1589_v12, %v1585_v11  ;;  %v1629_v11 = vld [vmem:[%s3548_s3 + $0x6b0] sm:$0xff]  ;;  %v1632_v12 = vld [vmem:[%s3548_s3 + $0x6c8] sm:$0xff] }
 0x16f   :  { %2029 = vmatpush1.bf16.msra.mxu0 %v2028_v19  ;;  %2061 = vmatpush1.bf16.msra.mxu1 %v2060_v20  ;;  %v1591_v19 = vld [vmem:[%s3548_s3 + $0x580] sm:$0xff] }
 0x170   :  { %2031 = vmatprep.subr.bf16.mxu0 %v2030_v23  ;;  %2063 = vmatprep.subr.bf16.mxu1 %v2062_v24  ;;  %v1595_v20 = vld [vmem:[%s3548_s3 + $0x5a0] sm:$0xff]  ;;  %v1593_v23 = vld [vmem:[%s3548_s3 + $0x590] sm:$0xff] }
 0x171   :  { %917 = vmatprep.mubr.f32.mxu0 %v2258_v42  ;;  %988 = vmatprep.mubr.f32.mxu1 %v2258_v42  ;;  %v1597_v24 = vld [vmem:[%s3548_s3 + $0x5b0] sm:$0xff]  ;;  %v2052_v29 = vpack.c.bf16 %v1595_v20, %v1591_v19  ;;  %v1635_v19 = vld [vmem:[%s3548_s3 + $0x6e0] sm:$0xff]  ;;  %v2102_v20 = vpack.c.bf16 %v1636_v13, %v1632_v12  ;;  %v1291_v12 = vld [vmem:[%s3550_s5 + $0x188] sm:$0xff] }
 0x172   :  { %v2084_v30 = vpack.c.bf16 %v1597_v24, %v1593_v23  ;;  %v1640_v23 = vld [vmem:[%s3548_s3 + $0x708] sm:$0xff] }
 0x173   :  { %2033 = vmatpush1.bf16.msra.mxu0 %v2032_v31  ;;  %2065 = vmatpush1.bf16.msra.mxu1 %v2064_v32  ;;  %v1599_v31 = vld [vmem:[%s3548_s3 + $0x5c0] sm:$0xff]  ;;  %v1644_v24 = vld [vmem:[%s3548_s3 + $0x728] sm:$0xff] }
 0x174   :  { %2035 = vmatprep.subr.bf16.mxu0 %v2034_v35  ;;  %2067 = vmatprep.subr.bf16.mxu1 %v2066_v36  ;;  %v1603_v32 = vld [vmem:[%s3548_s3 + $0x5e0] sm:$0xff]  ;;  %v1601_v35 = vld [vmem:[%s3548_s3 + $0x5d0] sm:$0xff] }
 0x175   :  { %v1605_v36 = vld [vmem:[%s3548_s3 + $0x5f0] sm:$0xff]  ;;  %v2056_v41 = vpack.c.bf16 %v1603_v32, %v1599_v31  ;;  %v2106_v31 = vpack.c.bf16 %v1644_v24, %v1640_v23  ;;  %v2138_v32 = vpack.c.bf16 %v1646_v26, %v1642_v25  ;;  %v1293_v23 = vld [vmem:[%s3550_s5 + $0x198] sm:$0xff] }
 0x176   :  { %v2088_v43 = vpack.c.bf16 %v1605_v36, %v1601_v35  ;;  %v1648_v35 = vld [vmem:[%s3548_s3 + $0x748] sm:$0xff]  ;;  %v1244_v26 = vld [vmem:[%s3550_s5 + $0x10] sm:$0xff] }
 0x177   :  { %2037 = vmatpush1.bf16.msra.mxu0 %v2036_v44  ;;  %2069 = vmatpush1.bf16.msra.mxu1 %v2068_v45  ;;  %v1607_v44 = vld [vmem:[%s3548_s3 + $0x600] sm:$0xff]  ;;  %v1652_v36 = vld [vmem:[%s3548_s3 + $0x768] sm:$0xff] }
 0x178   :  { %2039 = vmatprep.subr.bf16.mxu0 %v2038_v49  ;;  %2071 = vmatprep.subr.bf16.mxu1 %v2070_v50  ;;  %v1611_v45 = vld [vmem:[%s3548_s3 + $0x620] sm:$0xff]  ;;  %v1609_v49 = vld [vmem:[%s3548_s3 + $0x610] sm:$0xff] }
 0x179   :  { %v1613_v50 = vld [vmem:[%s3548_s3 + $0x630] sm:$0xff]  ;;  %v2092_v55 = vpack.c.bf16 %v1611_v45, %v1607_v44  ;;  %v2110_v44 = vpack.c.bf16 %v1652_v36, %v1648_v35  ;;  %v2142_v45 = vpack.c.bf16 %v1654_v38, %v1650_v37  ;;  %v1295_v35 = vld [vmem:[%s3550_s5 + $0x1a8] sm:$0xff]  ;;  %v1246_v38 = vld [vmem:[%s3550_s5 + $0x20] sm:$0xff] }
 0x17a   :  { %v2124_v56 = vpack.c.bf16 %v1613_v50, %v1609_v49  ;;  %v1656_v49 = vld [vmem:[%s3548_s3 + $0x788] sm:$0xff] }
 0x17b   :  { %2041 = vmatpush1.bf16.msra.mxu0 %v2040_v57  ;;  %2073 = vmatpush1.bf16.msra.mxu1 %v2072_v58  ;;  %v1615_v57 = vld [vmem:[%s3548_s3 + $0x640] sm:$0xff]  ;;  %v1660_v50 = vld [vmem:[%s3548_s3 + $0x7a8] sm:$0xff] }
 0x17c   :  { %2043 = vmatprep.subr.bf16.mxu0 %v2042_v61  ;;  %2075 = vmatprep.subr.bf16.mxu1 %v2074_v62  ;;  %v1619_v58 = vld [vmem:[%s3548_s3 + $0x660] sm:$0xff]  ;;  %v2126_v61 = vpack.c.bf16 %v1622_v54, %v1618_v53  ;;  %v1617_v62 = vld [vmem:[%s3548_s3 + $0x650] sm:$0xff] }
 0x17d   :  { %v2096_v4 = vpack.c.bf16 %v1619_v58, %v1615_v57  ;;  %v2114_v57 = vpack.c.bf16 %v1660_v50, %v1656_v49  ;;  %v2146_v58 = vpack.c.bf16 %v1662_v52, %v1658_v51  ;;  %v1297_v49 = vld [vmem:[%s3550_s5 + $0x1b8] sm:$0xff]  ;;  %v1248_v52 = vld [vmem:[%s3550_s5 + $0x30] sm:$0xff] }
 0x17f   :  { %2045 = vmatpush1.bf16.msra.mxu0 %v2044_v5  ;;  %2077 = vmatpush1.bf16.msra.mxu1 %v2076_v6  ;;  %v2128_v5 = vpack.c.bf16 %v1621_v63, %v1617_v62  ;;  %v1623_v6 = vld [vmem:[%s3548_s3 + $0x680] sm:$0xff]  ;;  %v1668_v62 = vld [vmem:[%s3548_s3 + $0x7e8] sm:$0xff]  ;;  %v1666_v63 = vld [vmem:[%s3548_s3 + $0x7d8] sm:$0xff] }
 0x180   :  { %2047 = vmatprep.subr.bf16.mxu0 %v2046_v9  ;;  %2079 = vmatprep.subr.bf16.mxu1 %v2078_v10  ;;  %v2130_v9 = vpack.c.bf16 %v1630_v3, %v1626_v2  ;;  %v1625_v10 = vld [vmem:[%s3548_s3 + $0x690] sm:$0xff]  ;;  %v2100_v16 = vpack.c.bf16 %v1627_v7, %v1623_v6  ;;  %v1663_v3 = vld [vmem:[%s3548_s3 + $0x7c0] sm:$0xff]  ;;  %v2150_v6 = vpack.c.bf16 %v1670_v0, %v1666_v63 }
 0x181   :  { %v1665_v7 = vld [vmem:[%s3548_s3 + $0x7d0] sm:$0xff]  ;;  %v1250_v0 = vld [vmem:[%s3550_s5 + $0x40] sm:$0xff] }
 0x183   :  { %2049 = vmatpush1.bf16.msra.mxu0 %v2048_v17  ;;  %2081 = vmatpush1.bf16.msra.mxu1 %v2080_v18  ;;  %v2132_v17 = vpack.c.bf16 %v1629_v11, %v1625_v10  ;;  %v1631_v18 = vld [vmem:[%s3548_s3 + $0x6c0] sm:$0xff]  ;;  %v1259_v10 = vld [vmem:[%s3550_s5 + $0x88] sm:$0xff] }
 0x184   :  { %2051 = vmatprep.subr.bf16.mxu0 %v2050_v21  ;;  %2083 = vmatprep.subr.bf16.mxu1 %v2082_v22  ;;  %v2134_v21 = vpack.c.bf16 %v1638_v15, %v1634_v14  ;;  %v1637_v22 = vld [vmem:[%s3548_s3 + $0x6f0] sm:$0xff]  ;;  %v2104_v27 = vpack.c.bf16 %v1635_v19, %v1631_v18  ;;  %v1290_v11 = vld [vmem:[%s3550_s5 + $0x180] sm:$0xff] }
 0x185   :  { %v1242_v15 = vld [vmem:[%s3550_s5] sm:$0xff]  ;;  %v2186_v18 = vpack.c.bf16 %v1291_v12, %v1290_v11  ;;  %v1252_v12 = vld [vmem:[%s3550_s5 + $0x50] sm:$0xff] }
 0x186   :  { %v1274_v19 = vld [vmem:[%s3550_s5 + $0x100] sm:$0xff] }
 0x187   :  { %2053 = vmatpush1.bf16.msra.mxu0 %v2052_v29  ;;  %2085 = vmatpush1.bf16.msra.mxu1 %v2084_v30  ;;  %v1639_v29 = vld [vmem:[%s3548_s3 + $0x700] sm:$0xff] }
 0x188   :  { %2055 = vmatprep.subr.bf16.mxu0 %v2054_v33  ;;  %2087 = vmatprep.subr.bf16.mxu1 %v2086_v34  ;;  %v1643_v30 = vld [vmem:[%s3548_s3 + $0x720] sm:$0xff]  ;;  %v1641_v33 = vld [vmem:[%s3548_s3 + $0x710] sm:$0xff] }
 0x189   :  { %v1645_v34 = vld [vmem:[%s3548_s3 + $0x730] sm:$0xff]  ;;  %v2108_v39 = vpack.c.bf16 %v1643_v30, %v1639_v29 }
 0x18a   :  { %v2140_v40 = vpack.c.bf16 %v1645_v34, %v1641_v33  ;;  %v1262_v33 = vld [vmem:[%s3550_s5 + $0xa0] sm:$0xff] }
 0x18b   :  { %2057 = vmatpush1.bf16.msra.mxu0 %v2056_v41  ;;  %2089 = vmatpush1.bf16.msra.mxu1 %v2088_v43  ;;  %v1647_v41 = vld [vmem:[%s3548_s3 + $0x740] sm:$0xff] }
 0x18c   :  { %2091 = vmatprep.subr.bf16.mxu0 %v2090_v46  ;;  %2123 = vmatprep.subr.bf16.mxu1 %v2122_v48  ;;  %v1651_v43 = vld [vmem:[%s3548_s3 + $0x760] sm:$0xff]  ;;  %v1649_v46 = vld [vmem:[%s3548_s3 + $0x750] sm:$0xff] }
 0x18d   :  { %v1653_v48 = vld [vmem:[%s3548_s3 + $0x770] sm:$0xff]  ;;  %v2112_v53 = vpack.c.bf16 %v1651_v43, %v1647_v41  ;;  %v1294_v34 = vld [vmem:[%s3550_s5 + $0x1a0] sm:$0xff] }
 0x18e   :  { %918 = vmatmul.mubr.f32.vlgmr.msra.gmra.mrb[4].mxu0 %v851_v59  ;;  %989 = vmatmul.mubr.f32.vlgmr.msra.gmra.mrb[4].mxu1 %v851_v59  ;;  %v2144_v54 = vpack.c.bf16 %v1653_v48, %v1649_v46  ;;  %v1657_v59 = vld [vmem:[%s3548_s3 + $0x790] sm:$0xff]  ;;  %v2194_v41 = vpack.c.bf16 %v1295_v35, %v1294_v34  ;;  %v1278_v43 = vld [vmem:[%s3550_s5 + $0x120] sm:$0xff]  ;;  %v1265_v46 = vld [vmem:[%s3550_s5 + $0xb8] sm:$0xff] }
 0x18f   :  { %2093 = vmatpush1.bf16.msra.mxu0 %v2092_v55  ;;  %2125 = vmatpush1.bf16.msra.mxu1 %v2124_v56  ;;  %v1655_v55 = vld [vmem:[%s3548_s3 + $0x780] sm:$0xff]  ;;  %v1296_v48 = vld [vmem:[%s3550_s5 + $0x1b0] sm:$0xff]  ;;  %v1305_v34 = vld [vmem:[%s3550_s5 + $0x1f8] sm:$0xff] }
 0x190   :  { %2095 = vmatprep.subr.bf16.mxu0 %v2094_v60  ;;  %2127 = vmatprep.subr.bf16.mxu1 %v2126_v61  ;;  %v1659_v56 = vld [vmem:[%s3548_s3 + $0x7a0] sm:$0xff]  ;;  %v1661_v60 = vld [vmem:[%s3548_s3 + $0x7b0] sm:$0xff]  ;;  %v1664_v61 = vld [vmem:[%s3548_s3 + $0x7c8] sm:$0xff] }
 0x191   :  { %1130 = vmatprep.mubr.f32.mxu0 %v2258_v42  ;;  %1201 = vmatprep.mubr.f32.mxu1 %v2258_v42  ;;  %v1633_v42 = vld [vmem:[%s3548_s3 + $0x6d0] sm:$0xff]  ;;  %v2116_v1 = vpack.c.bf16 %v1659_v56, %v1655_v55  ;;  %v2148_v2 = vpack.c.bf16 %v1661_v60, %v1657_v59  ;;  %v2198_v55 = vpack.c.bf16 %v1297_v49, %v1296_v48  ;;  %v1267_v59 = vld [vmem:[%s3550_s5 + $0xc8] sm:$0xff]  ;;  %v1298_v60 = vld [vmem:[%s3550_s5 + $0x1c0] sm:$0xff] }
 0x192   :  { %v2136_v28 = vpack.c.bf16 %v1637_v22, %v1633_v42  ;;  %v1261_v42 = vld [vmem:[%s3550_s5 + $0x98] sm:$0xff]  ;;  %v1292_v22 = vld [vmem:[%s3550_s5 + $0x190] sm:$0xff]  ;;  %v1212_v48 = vld [vmem:[%s3549_s4] sm:$0xf] }
 0x193   :  { %2097 = vmatpush1.bf16.msra.mxu0 %v2096_v4  ;;  %2129 = vmatpush1.bf16.msra.mxu1 %v2128_v5  ;;  %v1667_v4 = vld [vmem:[%s3548_s3 + $0x7e0] sm:$0xff]  ;;  %v2118_v5 = vpack.c.bf16 %v1668_v62, %v1664_v61  ;;  %v2190_v30 = vpack.c.bf16 %v1293_v23, %v1292_v22  ;;  %v1280_v56 = vld [vmem:[%s3550_s5 + $0x130] sm:$0xff]  ;;  %v1299_v61 = vld [vmem:[%s3550_s5 + $0x1c8] sm:$0xff] }
 0x194   :  { %2099 = vmatprep.subr.bf16.mxu0 %v2098_v8  ;;  %2131 = vmatprep.subr.bf16.mxu1 %v2130_v9  ;;  %v1669_v8 = vld [vmem:[%s3548_s3 + $0x7f0] sm:$0xff]  ;;  %v1258_v9 = vld [vmem:[%s3550_s5 + $0x80] sm:$0xff]  ;;  %v2120_v13 = vpack.c.bf16 %v1667_v4, %v1663_v3  ;;  %v2202_v3 = vpack.c.bf16 %v1299_v61, %v1298_v60 }
 0x195   :  { %v2152_v14 = vpack.c.bf16 %v1669_v8, %v1665_v7  ;;  %v1282_v4 = vld [vmem:[%s3550_s5 + $0x140] sm:$0xff]  ;;  %v1269_v7 = vld [vmem:[%s3550_s5 + $0xd8] sm:$0xff]  ;;  %v1300_v8 = vld [vmem:[%s3550_s5 + $0x1d0] sm:$0xff] }
 0x196   :  { %v1256_v35 = vld [vmem:[%s3550_s5 + $0x70] sm:$0xff] }
 0x197   :  { %2101 = vmatpush1.bf16.msra.mxu0 %v2100_v16  ;;  %2133 = vmatpush1.bf16.msra.mxu1 %v2132_v17  ;;  %v1243_v16 = vld [vmem:[%s3550_s5 + $0x8] sm:$0xff]  ;;  %v2154_v17 = vpack.c.bf16 %v1259_v10, %v1258_v9  ;;  %v1301_v9 = vld [vmem:[%s3550_s5 + $0x1d8] sm:$0xff] }
 0x198   :  { %2103 = vmatprep.subr.bf16.mxu0 %v2102_v20  ;;  %2135 = vmatprep.subr.bf16.mxu1 %v2134_v21  ;;  %v1275_v20 = vld [vmem:[%s3550_s5 + $0x108] sm:$0xff]  ;;  %v1260_v21 = vld [vmem:[%s3550_s5 + $0x90] sm:$0xff]  ;;  %v2156_v24 = vpack.c.bf16 %v1243_v16, %v1242_v15  ;;  %v2206_v15 = vpack.c.bf16 %v1301_v9, %v1300_v8 }
 0x199   :  { %v2188_v25 = vpack.c.bf16 %v1275_v20, %v1274_v19  ;;  %v2158_v29 = vpack.c.bf16 %v1261_v42, %v1260_v21  ;;  %v1284_v16 = vld [vmem:[%s3550_s5 + $0x150] sm:$0xff]  ;;  %v1271_v19 = vld [vmem:[%s3550_s5 + $0xe8] sm:$0xff]  ;;  %v1302_v20 = vld [vmem:[%s3550_s5 + $0x1e0] sm:$0xff] }
 0x19a   :  { %v1303_v21 = vld [vmem:[%s3550_s5 + $0x1e8] sm:$0xff] }
 0x19b   :  { %2105 = vmatpush1.bf16.msra.mxu0 %v2104_v27  ;;  %2137 = vmatpush1.bf16.msra.mxu1 %v2136_v28  ;;  %v1245_v27 = vld [vmem:[%s3550_s5 + $0x18] sm:$0xff]  ;;  %v1064_v28 = vrot.slane %v2782_v47, 6  ;;  %v1263_v47 = vld [vmem:[%s3550_s5 + $0xa8] sm:$0xff] }
 0x19c   :  { %2107 = vmatprep.subr.bf16.mxu0 %v2106_v31  ;;  %2139 = vmatprep.subr.bf16.mxu1 %v2138_v32  ;;  %v1276_v31 = vld [vmem:[%s3550_s5 + $0x110] sm:$0xff]  ;;  %v1277_v32 = vld [vmem:[%s3550_s5 + $0x118] sm:$0xff]  ;;  %v2160_v36 = vpack.c.bf16 %v1245_v27, %v1244_v26  ;;  %v1255_v26 = vld [vmem:[%s3550_s5 + $0x68] sm:$0xff] }
 0x19d   :  { %v2192_v37 = vpack.c.bf16 %v1277_v32, %v1276_v31  ;;  %v1286_v27 = vld [vmem:[%s3550_s5 + $0x160] sm:$0xff]  ;;  %v1272_v31 = vld [vmem:[%s3550_s5 + $0xf0] sm:$0xff]  ;;  %v1273_v32 = vld [vmem:[%s3550_s5 + $0xf8] sm:$0xff] }
 0x19f   :  { %2109 = vmatpush1.bf16.msra.mxu0 %v2108_v39  ;;  %2141 = vmatpush1.bf16.msra.mxu1 %v2140_v40  ;;  %v1247_v39 = vld [vmem:[%s3550_s5 + $0x28] sm:$0xff]  ;;  %v2162_v40 = vpack.c.bf16 %v1263_v47, %v1262_v33  ;;  %v1304_v33 = vld [vmem:[%s3550_s5 + $0x1f0] sm:$0xff]  ;;  %v2182_v47 = vpack.c.bf16 %v1273_v32, %v1272_v31 }
 0x1a0   :  { %2111 = vmatprep.subr.bf16.mxu0 %v2110_v44  ;;  %2143 = vmatprep.subr.bf16.mxu1 %v2142_v45  ;;  %v1279_v44 = vld [vmem:[%s3550_s5 + $0x128] sm:$0xff]  ;;  %v1264_v45 = vld [vmem:[%s3550_s5 + $0xb0] sm:$0xff]  ;;  %v2164_v50 = vpack.c.bf16 %v1247_v39, %v1246_v38 }
 0x1a1   :  { %v2196_v51 = vpack.c.bf16 %v1279_v44, %v1278_v43  ;;  %v1288_v39 = vld [vmem:[%s3550_s5 + $0x170] sm:$0xff]  ;;  %v1214_v43 = vlaneseq }
 0x1a3   :  { %2113 = vmatpush1.bf16.msra.mxu0 %v2112_v53  ;;  %2145 = vmatpush1.bf16.msra.mxu1 %v2144_v54  ;;  %v1249_v53 = vld [vmem:[%s3550_s5 + $0x38] sm:$0xff]  ;;  %v2166_v54 = vpack.c.bf16 %v1265_v46, %v1264_v45  ;;  %v1215_v44 = vshrl.u32 %v1214_v43, 7 }
 0x1a4   :  { %2115 = vmatprep.subr.bf16.mxu0 %v2114_v57  ;;  %2147 = vmatprep.subr.bf16.mxu1 %v2146_v58  ;;  %v1281_v57 = vld [vmem:[%s3550_s5 + $0x138] sm:$0xff]  ;;  %v1266_v58 = vld [vmem:[%s3550_s5 + $0xc0] sm:$0xff]  ;;  %v2168_v62 = vpack.c.bf16 %v1249_v53, %v1248_v52 }
 0x1a5   :  { %v2200_v63 = vpack.c.bf16 %v1281_v57, %v1280_v56  ;;  %v1216_v45 = vsub.s32 0, %v1215_v44  ;;  %v1224_v46 = vsub.s32 2, %v1215_v44  ;;  %v1220_v49 = vsub.s32 1, %v1215_v44 }
 0x1a7   :  { %2117 = vmatpush1.bf16.msra.mxu0 %v2116_v1  ;;  %2149 = vmatpush1.bf16.msra.mxu1 %v2148_v2  ;;  %v1251_v1 = vld [vmem:[%s3550_s5 + $0x48] sm:$0xff]  ;;  %v2170_v2 = vpack.c.bf16 %v1267_v59, %v1266_v58  ;;  %v1225_v52 = vrot.slane %v1212_v48, %v1224_v46  ;;  %v1221_v53 = vrot.slane %v1212_v48, %v1220_v49 }
 0x1a8   :  { %2119 = vmatprep.subr.bf16.mxu0 %v2118_v5  ;;  %2151 = vmatprep.subr.bf16.mxu1 %v2150_v6  ;;  %v1283_v5 = vld [vmem:[%s3550_s5 + $0x148] sm:$0xff]  ;;  %v1268_v6 = vld [vmem:[%s3550_s5 + $0xd0] sm:$0xff]  ;;  %v2172_v10 = vpack.c.bf16 %v1251_v1, %v1250_v0 }
 0x1a9   :  { %v2204_v11 = vpack.c.bf16 %v1283_v5, %v1282_v4  ;;  %v1671_v5 = vld [vmem:[%s3551_s6] ss:$0 sm:$0xff] }
 0x1ab   :  { %2121 = vmatpush1.bf16.msra.mxu0 %v2120_v13  ;;  %2153 = vmatpush1.bf16.msra.mxu1 %v2152_v14  ;;  %v1253_v13 = vld [vmem:[%s3550_s5 + $0x58] sm:$0xff]  ;;  %v2174_v14 = vpack.c.bf16 %v1269_v7, %v1268_v6 }
 0x1ac   :  { %2155 = vmatprep.subr.bf16.mxu0 %v2154_v17  ;;  %2187 = vmatprep.subr.bf16.mxu1 %v2186_v18  ;;  %v1285_v17 = vld [vmem:[%s3550_s5 + $0x158] sm:$0xff]  ;;  %v1270_v18 = vld [vmem:[%s3550_s5 + $0xe0] sm:$0xff]  ;;  %v2176_v42 = vpack.c.bf16 %v1253_v13, %v1252_v12 }
 0x1ad   :  { %v2208_v22 = vpack.c.bf16 %v1285_v17, %v1284_v16  ;;  %v2178_v23 = vpack.c.bf16 %v1271_v19, %v1270_v18 }
 0x1ae   :  { %1131 = vmatmul.mubr.f32.vlgmr.msra.gmra.mrb[4].mxu0 %v1064_v28  ;;  %1202 = vmatmul.mubr.f32.vlgmr.msra.gmra.mrb[4].mxu1 %v1064_v28 }
 0x1af   :  { %2157 = vmatpush3.bf16.msra.mxu0 %v2156_v24  ;;  %2189 = vmatpush3.bf16.msra.mxu1 %v2188_v25  ;;  %v2210_v24 = vpack.c.bf16 %v1303_v21, %v1302_v20  ;;  %v1254_v25 = vld [vmem:[%s3550_s5 + $0x60] sm:$0xff] }
 0x1b0   :  { %2159 = vmatprep.subr.bf16.mxu0 %v2158_v29  ;;  %2191 = vmatprep.subr.bf16.mxu1 %v2190_v30  ;;  %v2180_v28 = vpack.c.bf16 %v1255_v26, %v1254_v25  ;;  %v1287_v29 = vld [vmem:[%s3550_s5 + $0x168] sm:$0xff] }
 0x1b1   :  { %v2212_v30 = vpack.c.bf16 %v1287_v29, %v1286_v27 }
 0x1b3   :  { %2161 = vmatpush3.bf16.msra.mxu0 %v2160_v36  ;;  %2193 = vmatpush3.bf16.msra.mxu1 %v2192_v37  ;;  %v1257_v36 = vld [vmem:[%s3550_s5 + $0x78] sm:$0xff]  ;;  %v2214_v37 = vpack.c.bf16 %v1305_v34, %v1304_v33 }
 0x1b4   :  { %2163 = vmatprep.subr.bf16.mxu0 %v2162_v40  ;;  %2195 = vmatprep.subr.bf16.mxu1 %v2194_v41  ;;  %v2184_v38 = vpack.c.bf16 %v1257_v36, %v1256_v35  ;;  %v1289_v40 = vld [vmem:[%s3550_s5 + $0x178] sm:$0xff] }
 0x1b5   :  { %v2216_v41 = vpack.c.bf16 %v1289_v40, %v1288_v39 }
 0x1b7   :  { %2165 = vmatpush3.bf16.msra.mxu0 %v2164_v50  ;;  %2197 = vmatpush3.bf16.msra.mxu1 %v2196_v51  ;;  %v1228_v50 = vsub.s32 3, %v1215_v44  ;;  %v1217_v51 = vrot.slane %v1212_v48, %v1216_v45 }
 0x1b8   :  { %2167 = vmatprep.subr.bf16.mxu0 %v2166_v54  ;;  %2199 = vmatprep.subr.bf16.mxu1 %v2198_v55 }
 0x1b9   :  { %v1229_v54 = vrot.slane %v1212_v48, %v1228_v50 }
 0x1bb   :  { %2169 = vmatpush3.bf16.msra.mxu0 %v2168_v62  ;;  %2201 = vmatpush3.bf16.msra.mxu1 %v2200_v63 }
 0x1bc   :  { %2171 = vmatprep.subr.bf16.mxu0 %v2170_v2  ;;  %2203 = vmatprep.subr.bf16.mxu1 %v2202_v3 }
 0x1bf   :  { %2173 = vmatpush3.bf16.msra.mxu0 %v2172_v10  ;;  %2205 = vmatpush3.bf16.msra.mxu1 %v2204_v11 }
 0x1c0   :  { %2175 = vmatprep.subr.bf16.mxu0 %v2174_v14  ;;  %2207 = vmatprep.subr.bf16.mxu1 %v2206_v15 }
 0x1c3   :  { %2177 = vmatpush3.bf16.msra.mxu0 %v2176_v42  ;;  %2209 = vmatpush3.bf16.msra.mxu1 %v2208_v22 }
 0x1c4   :  { %2179 = vmatprep.subr.bf16.mxu0 %v2178_v23  ;;  %2211 = vmatprep.subr.bf16.mxu1 %v2210_v24 }
 0x1c7   :  { %2181 = vmatpush3.bf16.msra.mxu0 %v2180_v28  ;;  %2213 = vmatpush3.bf16.msra.mxu1 %v2212_v30 }
 0x1c8   :  { %2183 = vmatprep.subr.bf16.mxu0 %v2182_v47  ;;  %2215 = vmatprep.subr.bf16.mxu1 %v2214_v37 }
 0x1cb   :  { %2185 = vmatpush3.bf16.msra.mxu0 %v2184_v38  ;;  %2217 = vmatpush3.bf16.msra.mxu1 %v2216_v41 }
 0x281   :  { %v1132_v55 = vpop.f32.mrb[4].mxu0  ;;  %v1203_v56 = vpop.f32.mrb[4].mxu1 }
 0x282   :  { %v1234_v57 = vadd.f32 %v1217_v51, %v1132_v55  ;;  %v1236_v58 = vadd.f32 %v1225_v52, %v1203_v56  ;;  %v1134_v59 = vpop.f32.mrb[5].mxu0  ;;  %v1205_v60 = vpop.f32.mrb[5].mxu1 }
 0x283   :  { %v1235_v61 = vadd.f32 %v1221_v53, %v1134_v59  ;;  %v1237_v62 = vadd.f32 %v1229_v54, %v1205_v60 }
 0x284   :  { %v1238_v1 = vmax.f32 %v1234_v57, 0.0  ;;  %v1240_v2 = vmax.f32 %v1236_v58, 0.0 }
 0x285   :  { %v1239_v63 = vmax.f32 %v1235_v61, 0.0  ;;  %v1241_v0 = vmax.f32 %v1237_v62, 0.0 }
 0x287   :  { %1377 = vmatprep.mubr.f32.mxu0 %v1239_v63  ;;  %1447 = vmatprep.mubr.f32.mxu1 %v1241_v0 }
 0x288   :  { %1378 = vmatmul.mubr.f32.vlgmr.msra.gmra.mrb[6].mxu0 %v1238_v1  ;;  %1448 = vmatmul.mubr.f32.vlgmr.msra.gmra.mrb[6].mxu1 %v1240_v2 }
 0x35b   :  { %v1704_v3 = vpop.f32.mrb[6].mxu0  ;;  %v1739_v4 = vpop.f32.mrb[6].mxu1 }
 0x35c   :  { %v1705_v6 = vpop.f32.mrb[7].mxu0  ;;  %v1740_v7 = vpop.f32.mrb[7].mxu1 }
 0x35d   :  { %v1706_v8 = vadd.f32 %v1705_v6, %v1704_v3  ;;  %v1741_v9 = vadd.f32 %v1740_v7, %v1739_v4 }
 0x35f   :  { %v1380_v10 = vadd.f32 %v1706_v8, %v1671_v5 }
 0x361   :  { %v1450_v11 = vadd.f32 %v1741_v9, %v1380_v10 }
 0x363   :  { %1453 = vst [vmem:[#allocation2] sm:$0x3] %v1450_v11 }
 0x364   :  { %2244 = shalt.err (!%p2241_p4)
}
 0x365   :  { %s2245_s6 = scalar_lea.hbm %s3552_s7, 32 }
 0x366   :  { %p2246_p5 = scmp.ne.s32.totalorder %s3552_s7, %s2245_s6  ;;  %p2249_p6 = scmp.lt.u32.totalorder %s2245_s6, %s3552_s7 }
 0x368   :  { %p2251_p7 = pnand %p2249_p6, %p2246_p5 }
 0x36a   :  { %2254 = shalt.err (!%p2251_p7)
}
 0x36b   :  { %1463 = dma.vmem_to_hbm [thread:$0]  %s1461_s20, 32, %s3552_s7, [#allocation3]  }
 0x36c   :  { %2255 = dma.done.wait [#allocation3], 32  }
 0x36d   :  { %2256 = vsyncadd [#allocation3], 4294967264 }
 0x36e   :  { %1467 = vsyncpa [#allocation3], 1 }

</bundles_post_ra>
